<compile_context>
chip_gen: v7x
topology: tpu7x:2x2x1
jax: 0.10.0
libtpu: 0.0.40
codegen_flags: <defaults>
</compile_context>

<pallas_src>
import functools

import jax
import jax.numpy as jnp
from jax.experimental import pallas as pl
from jax.experimental.pallas import tpu as pltpu


_VMEM_LIMIT_BYTES = 32 * 1024 * 1024   # explicit scoped-VMEM cap for all calls
_VMEM_BUDGET_BYTES = 20 * 1024 * 1024  # planning budget for the tile picker


def _compiler_params():
    return pltpu.CompilerParams(
        dimension_semantics=("parallel",),      # M tiles are independent
        vmem_limit_bytes=_VMEM_LIMIT_BYTES,
    )


def _pick_tile_m(M, Kd, Cout, y_bytes):
    """Largest power-of-two M tile that divides M and fits the VMEM budget."""
    w_bytes = 2 * Kd * Cout * 2  # bf16 weight, conservatively counted x2 buffers
    for t in (2048, 1024, 512, 256, 128, 64, 32, 16, 8):
        if t > M or M % t:
            continue
        need = (w_bytes
                + 2 * t * Kd * 2           # double-buffered bf16 patch tile
                + 2 * t * Cout * y_bytes   # double-buffered output tile
                + 2 * t * Cout * 4)        # slack for f32 intermediates / stats
        if need <= _VMEM_BUDGET_BYTES:
            return t
    return M  # tiny-M fallback: single full block


# ----------------------------------------------------------------------------
# Pallas kernels
# ----------------------------------------------------------------------------
def _mm_lrelu_kernel(p_ref, w_ref, o_ref, *, slope):
    # (TILE_M, Kd) bf16 @ (Kd, Cout) bf16 -> f32 -> LeakyReLU -> bf16
    y = jnp.dot(p_ref[...], w_ref[...], preferred_element_type=jnp.float32)
    o_ref[...] = jnp.where(y > 0, y, slope * y).astype(o_ref.dtype)


def _mm_stats_kernel(p_ref, w_ref, y_ref, s_ref):
    # Pass 1 of BN layers: matmul + per-tile partial (sum, sum_of_squares).
    y = jnp.dot(p_ref[...], w_ref[...], preferred_element_type=jnp.float32)
    y_ref[...] = y
    ps = jnp.sum(y, axis=0, keepdims=True)        # (1, Cout)
    pss = jnp.sum(y * y, axis=0, keepdims=True)   # (1, Cout)
    s_ref[...] = jnp.concatenate([ps, pss], axis=0).reshape(s_ref.shape)


def _bn_lrelu_kernel(y_ref, scale_ref, shift_ref, o_ref, *, slope):
    # Pass 2 of BN layers: per-channel scale/shift (already folded with
    # gamma/beta/mean/var) + LeakyReLU.
    z = y_ref[...] * scale_ref[...] + shift_ref[...]
    o_ref[...] = jnp.where(z > 0, z, slope * z).astype(o_ref.dtype)


# ----------------------------------------------------------------------------
# Glue: im2col on NHWC (pure slicing, no compute)
# ----------------------------------------------------------------------------
def _im2col_nhwc(x, k, stride, pad):
    B, H, W, C = x.shape
    Ho = (H + 2 * pad - k) // stride + 1
    Wo = (W + 2 * pad - k) // stride + 1
    xp = jnp.pad(x, ((0, 0), (pad, pad), (pad, pad), (0, 0))) if pad else x
    cols = []
    for i in range(k):
        for j in range(k):
            cols.append(xp[:, i:i + stride * Ho:stride, j:j + stride * Wo:stride, :])
    # feature order = (kh, kw, cin) -- matches the pre-flattened weights.
    patches = jnp.stack(cols, axis=3).reshape(B * Ho * Wo, k * k * C)
    return patches, Ho, Wo


# ----------------------------------------------------------------------------
# Layer wrappers
# ----------------------------------------------------------------------------
def _conv_lrelu_block(x_nhwc, w2d, *, stride, pad, slope=0.2, k=4):
    """Conv(no bias) + LeakyReLU.  x: (B,H,W,Cin) bf16, w2d: (k*k*Cin, Cout) bf16."""
    B = x_nhwc.shape[0]
    patches, Ho, Wo = _im2col_nhwc(x_nhwc, k, stride, pad)
    patches = patches.astype(jnp.bfloat16)
    M, Kd = patches.shape
    Cout = w2d.shape[1]
    tm = _pick_tile_m(M, Kd, Cout, y_bytes=2)
    nt = M // tm
    out = pl.pallas_call(
        functools.partial(_mm_lrelu_kernel, slope=slope),
        out_shape=jax.ShapeDtypeStruct((M, Cout), jnp.bfloat16),
        grid=(nt,),
        in_specs=[
            pl.BlockSpec((tm, Kd), lambda i: (i, 0)),
            pl.BlockSpec((Kd, Cout), lambda i: (0, 0)),
        ],
        out_specs=pl.BlockSpec((tm, Cout), lambda i: (i, 0)),
        compiler_params=_compiler_params(),
    )(patches, w2d)
    return out.reshape(B, Ho, Wo, Cout)


def _conv_bn_lrelu_block(x_nhwc, w2d, gamma, beta, *, stride, pad,
                         slope=0.2, eps=1e-5, k=4):
    """Conv(no bias) + BatchNorm2d (training-mode batch stats) + LeakyReLU."""
    B = x_nhwc.shape[0]
    patches, Ho, Wo = _im2col_nhwc(x_nhwc, k, stride, pad)
    patches = patches.astype(jnp.bfloat16)
    M, Kd = patches.shape
    Cout = w2d.shape[1]
    tm = _pick_tile_m(M, Kd, Cout, y_bytes=4)
    nt = M // tm

    # ---- Pass 1: tiled matmul + per-tile partial stats over the M axis ----
    y, stats = pl.pallas_call(
        _mm_stats_kernel,
        out_shape=(
            jax.ShapeDtypeStruct((M, Cout), jnp.float32),
            jax.ShapeDtypeStruct((nt, 2, Cout), jnp.float32),
        ),
        grid=(nt,),
        in_specs=[
            pl.BlockSpec((tm, Kd), lambda i: (i, 0)),
            pl.BlockSpec((Kd, Cout), lambda i: (0, 0)),
        ],
        out_specs=(
            pl.BlockSpec((tm, Cout), lambda i: (i, 0)),
            pl.BlockSpec((1, 2, Cout), lambda i: (i, 0, 0)),
        ),
        compiler_params=_compiler_params(),
    )(patches, w2d)

    # ---- Tiny cross-tile reduction (Cout scalars per channel) in JAX ----
    # Global batch mean / biased variance (nn.BatchNorm2d training mode),
    # folded with gamma/beta into one per-channel scale & shift.
    tot = jnp.sum(stats, axis=0)                       # (2, Cout)
    mean = tot[0] / M
    var = jnp.maximum(tot[1] / M - mean * mean, 0.0)
    scale = gamma[0] * jax.lax.rsqrt(var + eps)
    shift = beta[0] - mean * scale
    scale = scale[None, :].astype(jnp.float32)         # (1, Cout)
    shift = shift[None, :].astype(jnp.float32)

    # ---- Pass 2: tiled normalize + affine + LeakyReLU ----
    out = pl.pallas_call(
        functools.partial(_bn_lrelu_kernel, slope=slope),
        out_shape=jax.ShapeDtypeStruct((M, Cout), jnp.bfloat16),
        grid=(nt,),
        in_specs=[
            pl.BlockSpec((tm, Cout), lambda i: (i, 0)),
            pl.BlockSpec((1, Cout), lambda i: (0, 0)),
            pl.BlockSpec((1, Cout), lambda i: (0, 0)),
        ],
        out_specs=pl.BlockSpec((tm, Cout), lambda i: (i, 0)),
        compiler_params=_compiler_params(),
    )(y, scale, shift)
    return out.reshape(B, Ho, Wo, Cout)


# ----------------------------------------------------------------------------
# Discriminator: parameters + forward
# ----------------------------------------------------------------------------
def init_discriminator_params(key, num_kernels):
    nk = num_kernels
    conv_cfg = [(nk, 3), (nk * 2, nk), (nk * 4, nk * 2), (nk * 8, nk * 4), (1, nk * 8)]
    keys = jax.random.split(key, len(conv_cfg))
    ws2d = []
    for kk, (cout, cin) in zip(keys, conv_cfg):
        w = 0.02 * jax.random.normal(kk, (cout, cin, 4, 4), dtype=jnp.float32)
        # Pre-flatten ONCE (perf review): (Cout,Cin,kh,kw)->(kh,kw,Cin,Cout)->(16*Cin,Cout), bf16.
        ws2d.append(
            jnp.transpose(w, (2, 3, 1, 0)).reshape(16 * cin, cout).astype(jnp.bfloat16))
    # BatchNorm2d default init (weight=1, bias=0) for the 3 BN layers.
    bn = [(jnp.ones((1, c), jnp.float32), jnp.zeros((1, c), jnp.float32))
          for c in (nk * 2, nk * 4, nk * 8)]
    return {"w": ws2d, "bn": bn}


def discriminator_forward(img, params):
    """img: (B, 3, 64, 64) NCHW float32 -> logits (B, 1, 1, 1) float32."""
    ws, bn = params["w"], params["bn"]
    x = jnp.transpose(img, (0, 2, 3, 1)).astype(jnp.bfloat16)   # NCHW -> NHWC, once
    x = _conv_lrelu_block(x, ws[0], stride=2, pad=1)            # 64 -> 32, nk
    x = _conv_bn_lrelu_block(x, ws[1], *bn[0], stride=2, pad=1)  # 32 -> 16, 2nk
    x = _conv_bn_lrelu_block(x, ws[2], *bn[1], stride=2, pad=1)  # 16 ->  8, 4nk
    x = _conv_bn_lrelu_block(x, ws[3], *bn[2], stride=2, pad=1)  #  8 ->  4, 8nk
    # Final Conv2d(nk*8, 1, 4, 1, 0): per-sample GEMV with one output lane ->
    # plain jnp.dot (per perf review; a Pallas launch here is pure overhead).
    B = x.shape[0]
    flat = x.reshape(B, -1)   # NHWC (4,4,C) flatten == (kh,kw,cin) weight order
    logits = jnp.dot(flat, ws[4], preferred_element_type=jnp.float32)
    return logits.reshape(B, 1, 1, 1)


if __name__ == "__main__":
    key = jax.random.PRNGKey(0)
    k_img, k_par = jax.random.split(key)

    B, NUM_KERNELS, IMG_SIZE = 2, 8, 64  # IMG_SIZE=64 so the final 4x4 conv -> 1x1
    img = jax.random.normal(k_img, (B, 3, IMG_SIZE, IMG_SIZE), dtype=jnp.float32)
    params = init_discriminator_params(k_par, NUM_KERNELS)

    fwd = jax.jit(discriminator_forward)
    out = jax.block_until_ready(fwd(img, params))

    assert out.shape == (B, 1, 1, 1), out.shape
    assert bool(jnp.all(jnp.isfinite(out)))
    print("KERNEL_OK")
</pallas_src>

<mosaic_0001>
module attributes {stable_mosaic.version = 11 : i64} {
  func.func @_mm_lrelu_kernel(%arg0: i32, %arg1: memref<2048x48xbf16, #tpu.memory_space<vmem>>, %arg2: memref<48x8xbf16, #tpu.memory_space<vmem>>, %arg3: memref<2048x8xbf16, #tpu.memory_space<vmem>>) attributes {dimension_semantics = [#tpu.dimension_semantics<parallel>], iteration_bounds = array<i64: 1>, scalar_prefetch = 0 : i64, scratch_operands = 0 : i64, tpu.core_type = #tpu.core_type<tc>, window_params = [{transform_indices = @transform_0, window_bounds = array<i64: 2048, 48>}, {pipeline_mode = #tpu.pipeline_mode<synchronous>, transform_indices = @transform_1, window_bounds = array<i64: 48, 8>}, {transform_indices = @transform_2, window_bounds = array<i64: 2048, 8>}]} {
    %c0 = arith.constant 0 : index
    %c0_0 = arith.constant 0 : index
    %0 = vector.load %arg1[%c0, %c0_0] : memref<2048x48xbf16, #tpu.memory_space<vmem>>, vector<2048x48xbf16>
    %c0_1 = arith.constant 0 : index
    %c0_2 = arith.constant 0 : index
    %1 = vector.load %arg2[%c0_1, %c0_2] : memref<48x8xbf16, #tpu.memory_space<vmem>>, vector<48x8xbf16>
    %cst = arith.constant dense<0.000000e+00> : vector<2048x8xf32>
    %2 = tpu.matmul %0, %1, %cst {dimension_numbers = #tpu.dot_dimension_numbers<[1], [0], [0], [1], [0, 0, 1, 1], [], []>} : vector<2048x48xbf16>, vector<48x8xbf16>, vector<2048x8xf32> -> vector<2048x8xf32>
    %cst_3 = arith.constant 0.000000e+00 : f32
    %3 = vector.broadcast %cst_3 : f32 to vector<2048x8xf32>
    %4 = arith.cmpf ogt, %2, %3 : vector<2048x8xf32>
    %cst_4 = arith.constant 2.000000e-01 : f32
    %5 = vector.broadcast %cst_4 : f32 to vector<2048x8xf32>
    %6 = arith.mulf %5, %2 : vector<2048x8xf32>
    %7 = arith.select %4, %2, %6 : vector<2048x8xi1>, vector<2048x8xf32>
    %8 = arith.truncf %7 : vector<2048x8xf32> to vector<2048x8xbf16>
    %c0_5 = arith.constant 0 : index
    %c0_6 = arith.constant 0 : index
    %9 = vector.load %arg3[%c0_5, %c0_6] : memref<2048x8xbf16, #tpu.memory_space<vmem>>, vector<2048x8xbf16>
    tpu.vector_store %arg3[%c0_5, %c0_6], %8 {strides = array<i32>} : memref<2048x8xbf16, #tpu.memory_space<vmem>>, vector<2048x8xbf16>,
    return
  }
  func.func @transform_0(%arg0: i32) -> (i32, i32) {
    %c0_i32 = arith.constant 0 : i32
    %c0_i32_0 = arith.constant 0 : i32
    return %arg0, %c0_i32 : i32, i32
  }
  func.func @transform_1(%arg0: i32) -> (i32, i32) {
    %c0_i32 = arith.constant 0 : i32
    %c0_i32_0 = arith.constant 0 : i32
    %c0_i32_1 = arith.constant 0 : i32
    return %c0_i32, %c0_i32_0 : i32, i32
  }
  func.func @transform_2(%arg0: i32) -> (i32, i32) {
    %c0_i32 = arith.constant 0 : i32
    %c0_i32_0 = arith.constant 0 : i32
    return %arg0, %c0_i32 : i32, i32
  }
}

module attributes {stable_mosaic.version = 11 : i64} {
  func.func @_mm_stats_kernel(%arg0: i32, %arg1: memref<512x128xbf16, #tpu.memory_space<vmem>>, %arg2: memref<128x16xbf16, #tpu.memory_space<vmem>>, %arg3: memref<512x16xf32, #tpu.memory_space<vmem>>, %arg4: memref<1x2x16xf32, #tpu.memory_space<vmem>>) attributes {dimension_semantics = [#tpu.dimension_semantics<parallel>], iteration_bounds = array<i64: 1>, scalar_prefetch = 0 : i64, scratch_operands = 0 : i64, tpu.core_type = #tpu.core_type<tc>, window_params = [{transform_indices = @transform_0, window_bounds = array<i64: 512, 128>}, {pipeline_mode = #tpu.pipeline_mode<synchronous>, transform_indices = @transform_1, window_bounds = array<i64: 128, 16>}, {transform_indices = @transform_2, window_bounds = array<i64: 512, 16>}, {transform_indices = @transform_3, window_bounds = array<i64: 1, 2, 16>}]} {
    %c0 = arith.constant 0 : index
    %c0_0 = arith.constant 0 : index
    %0 = vector.load %arg1[%c0, %c0_0] : memref<512x128xbf16, #tpu.memory_space<vmem>>, vector<512x128xbf16>
    %c0_1 = arith.constant 0 : index
    %c0_2 = arith.constant 0 : index
    %1 = vector.load %arg2[%c0_1, %c0_2] : memref<128x16xbf16, #tpu.memory_space<vmem>>, vector<128x16xbf16>
    %cst = arith.constant dense<0.000000e+00> : vector<512x16xf32>
    %2 = tpu.matmul %0, %1, %cst {dimension_numbers = #tpu.dot_dimension_numbers<[1], [0], [0], [1], [0, 0, 1, 1], [], []>} : vector<512x128xbf16>, vector<128x16xbf16>, vector<512x16xf32> -> vector<512x16xf32>
    %c0_3 = arith.constant 0 : index
    %c0_4 = arith.constant 0 : index
    %3 = vector.load %arg3[%c0_3, %c0_4] : memref<512x16xf32, #tpu.memory_space<vmem>>, vector<512x16xf32>
    tpu.vector_store %arg3[%c0_3, %c0_4], %2 {strides = array<i32>} : memref<512x16xf32, #tpu.memory_space<vmem>>, vector<512x16xf32>,
    %cst_5 = arith.constant dense<0.000000e+00> : vector<16xf32>
    %4 = vector.multi_reduction <add>, %2, %cst_5 [0] : vector<512x16xf32> to vector<16xf32>
    %5 = vector.shape_cast %4 : vector<16xf32> to vector<1x16xf32>
    %6 = arith.mulf %2, %2 : vector<512x16xf32>
    %cst_6 = arith.constant dense<0.000000e+00> : vector<16xf32>
    %7 = vector.multi_reduction <add>, %6, %cst_6 [0] : vector<512x16xf32> to vector<16xf32>
    %8 = vector.shape_cast %7 : vector<16xf32> to vector<1x16xf32>
    %9 = tpu.concatenate %5, %8 in 0 : vector<1x16xf32>, vector<1x16xf32> -> vector<2x16xf32>
    %10 = vector.shape_cast %9 : vector<2x16xf32> to vector<1x2x16xf32>
    %c0_7 = arith.constant 0 : index
    %c0_8 = arith.constant 0 : index
    %c0_9 = arith.constant 0 : index
    %11 = vector.load %arg4[%c0_7, %c0_8, %c0_9] : memref<1x2x16xf32, #tpu.memory_space<vmem>>, vector<1x2x16xf32>
    tpu.vector_store %arg4[%c0_7, %c0_8, %c0_9], %10 {strides = array<i32>} : memref<1x2x16xf32, #tpu.memory_space<vmem>>, vector<1x2x16xf32>,
    return
  }
  func.func @transform_0(%arg0: i32) -> (i32, i32) {
    %c0_i32 = arith.constant 0 : i32
    %c0_i32_0 = arith.constant 0 : i32
    return %arg0, %c0_i32 : i32, i32
  }
  func.func @transform_1(%arg0: i32) -> (i32, i32) {
    %c0_i32 = arith.constant 0 : i32
    %c0_i32_0 = arith.constant 0 : i32
    %c0_i32_1 = arith.constant 0 : i32
    return %c0_i32, %c0_i32_0 : i32, i32
  }
  func.func @transform_2(%arg0: i32) -> (i32, i32) {
    %c0_i32 = arith.constant 0 : i32
    %c0_i32_0 = arith.constant 0 : i32
    return %arg0, %c0_i32 : i32, i32
  }
  func.func @transform_3(%arg0: i32) -> (i32, i32, i32) {
    %c0_i32 = arith.constant 0 : i32
    %c0_i32_0 = arith.constant 0 : i32
    %c0_i32_1 = arith.constant 0 : i32
    return %arg0, %c0_i32, %c0_i32_0 : i32, i32, i32
  }
}

module attributes {stable_mosaic.version = 11 : i64} {
  func.func @_bn_lrelu_kernel(%arg0: i32, %arg1: memref<512x16xf32, #tpu.memory_space<vmem>>, %arg2: memref<1x16xf32, #tpu.memory_space<vmem>>, %arg3: memref<1x16xf32, #tpu.memory_space<vmem>>, %arg4: memref<512x16xbf16, #tpu.memory_space<vmem>>) attributes {dimension_semantics = [#tpu.dimension_semantics<parallel>], iteration_bounds = array<i64: 1>, scalar_prefetch = 0 : i64, scratch_operands = 0 : i64, tpu.core_type = #tpu.core_type<tc>, window_params = [{transform_indices = @transform_0, window_bounds = array<i64: 512, 16>}, {pipeline_mode = #tpu.pipeline_mode<synchronous>, transform_indices = @transform_1, window_bounds = array<i64: 1, 16>}, {pipeline_mode = #tpu.pipeline_mode<synchronous>, transform_indices = @transform_2, window_bounds = array<i64: 1, 16>}, {transform_indices = @transform_3, window_bounds = array<i64: 512, 16>}]} {
    %c0 = arith.constant 0 : index
    %c0_0 = arith.constant 0 : index
    %0 = vector.load %arg1[%c0, %c0_0] : memref<512x16xf32, #tpu.memory_space<vmem>>, vector<512x16xf32>
    %c0_1 = arith.constant 0 : index
    %c0_2 = arith.constant 0 : index
    %1 = vector.load %arg2[%c0_1, %c0_2] : memref<1x16xf32, #tpu.memory_space<vmem>>, vector<1x16xf32>
    %2 = vector.broadcast %1 : vector<1x16xf32> to vector<512x16xf32>
    %3 = arith.mulf %0, %2 : vector<512x16xf32>
    %c0_3 = arith.constant 0 : index
    %c0_4 = arith.constant 0 : index
    %4 = vector.load %arg3[%c0_3, %c0_4] : memref<1x16xf32, #tpu.memory_space<vmem>>, vector<1x16xf32>
    %5 = vector.broadcast %4 : vector<1x16xf32> to vector<512x16xf32>
    %6 = arith.addf %3, %5 : vector<512x16xf32>
    %cst = arith.constant 0.000000e+00 : f32
    %7 = vector.broadcast %cst : f32 to vector<512x16xf32>
    %8 = arith.cmpf ogt, %6, %7 : vector<512x16xf32>
    %cst_5 = arith.constant 2.000000e-01 : f32
    %9 = vector.broadcast %cst_5 : f32 to vector<512x16xf32>
    %10 = arith.mulf %9, %6 : vector<512x16xf32>
    %11 = arith.select %8, %6, %10 : vector<512x16xi1>, vector<512x16xf32>
    %12 = arith.truncf %11 : vector<512x16xf32> to vector<512x16xbf16>
    %c0_6 = arith.constant 0 : index
    %c0_7 = arith.constant 0 : index
    %13 = vector.load %arg4[%c0_6, %c0_7] : memref<512x16xbf16, #tpu.memory_space<vmem>>, vector<512x16xbf16>
    tpu.vector_store %arg4[%c0_6, %c0_7], %12 {strides = array<i32>} : memref<512x16xbf16, #tpu.memory_space<vmem>>, vector<512x16xbf16>,
    return
  }
  func.func @transform_0(%arg0: i32) -> (i32, i32) {
    %c0_i32 = arith.constant 0 : i32
    %c0_i32_0 = arith.constant 0 : i32
    return %arg0, %c0_i32 : i32, i32
  }
  func.func @transform_1(%arg0: i32) -> (i32, i32) {
    %c0_i32 = arith.constant 0 : i32
    %c0_i32_0 = arith.constant 0 : i32
    %c0_i32_1 = arith.constant 0 : i32
    return %c0_i32, %c0_i32_0 : i32, i32
  }
  func.func @transform_2(%arg0: i32) -> (i32, i32) {
    %c0_i32 = arith.constant 0 : i32
    %c0_i32_0 = arith.constant 0 : i32
    %c0_i32_1 = arith.constant 0 : i32
    return %c0_i32, %c0_i32_0 : i32, i32
  }
  func.func @transform_3(%arg0: i32) -> (i32, i32) {
    %c0_i32 = arith.constant 0 : i32
    %c0_i32_0 = arith.constant 0 : i32
    return %arg0, %c0_i32 : i32, i32
  }
}

module attributes {stable_mosaic.version = 11 : i64} {
  func.func @_mm_stats_kernel(%arg0: i32, %arg1: memref<128x256xbf16, #tpu.memory_space<vmem>>, %arg2: memref<256x32xbf16, #tpu.memory_space<vmem>>, %arg3: memref<128x32xf32, #tpu.memory_space<vmem>>, %arg4: memref<1x2x32xf32, #tpu.memory_space<vmem>>) attributes {dimension_semantics = [#tpu.dimension_semantics<parallel>], iteration_bounds = array<i64: 1>, scalar_prefetch = 0 : i64, scratch_operands = 0 : i64, tpu.core_type = #tpu.core_type<tc>, window_params = [{transform_indices = @transform_0, window_bounds = array<i64: 128, 256>}, {pipeline_mode = #tpu.pipeline_mode<synchronous>, transform_indices = @transform_1, window_bounds = array<i64: 256, 32>}, {transform_indices = @transform_2, window_bounds = array<i64: 128, 32>}, {transform_indices = @transform_3, window_bounds = array<i64: 1, 2, 32>}]} {
    %c0 = arith.constant 0 : index
    %c0_0 = arith.constant 0 : index
    %0 = vector.load %arg1[%c0, %c0_0] : memref<128x256xbf16, #tpu.memory_space<vmem>>, vector<128x256xbf16>
    %c0_1 = arith.constant 0 : index
    %c0_2 = arith.constant 0 : index
    %1 = vector.load %arg2[%c0_1, %c0_2] : memref<256x32xbf16, #tpu.memory_space<vmem>>, vector<256x32xbf16>
    %cst = arith.constant dense<0.000000e+00> : vector<128x32xf32>
    %2 = tpu.matmul %0, %1, %cst {dimension_numbers = #tpu.dot_dimension_numbers<[1], [0], [0], [1], [0, 0, 1, 1], [], []>} : vector<128x256xbf16>, vector<256x32xbf16>, vector<128x32xf32> -> vector<128x32xf32>
    %c0_3 = arith.constant 0 : index
    %c0_4 = arith.constant 0 : index
    %3 = vector.load %arg3[%c0_3, %c0_4] : memref<128x32xf32, #tpu.memory_space<vmem>>, vector<128x32xf32>
    tpu.vector_store %arg3[%c0_3, %c0_4], %2 {strides = array<i32>} : memref<128x32xf32, #tpu.memory_space<vmem>>, vector<128x32xf32>,
    %cst_5 = arith.constant dense<0.000000e+00> : vector<32xf32>
    %4 = vector.multi_reduction <add>, %2, %cst_5 [0] : vector<128x32xf32> to vector<32xf32>
    %5 = vector.shape_cast %4 : vector<32xf32> to vector<1x32xf32>
    %6 = arith.mulf %2, %2 : vector<128x32xf32>
    %cst_6 = arith.constant dense<0.000000e+00> : vector<32xf32>
    %7 = vector.multi_reduction <add>, %6, %cst_6 [0] : vector<128x32xf32> to vector<32xf32>
    %8 = vector.shape_cast %7 : vector<32xf32> to vector<1x32xf32>
    %9 = tpu.concatenate %5, %8 in 0 : vector<1x32xf32>, vector<1x32xf32> -> vector<2x32xf32>
    %10 = vector.shape_cast %9 : vector<2x32xf32> to vector<1x2x32xf32>
    %c0_7 = arith.constant 0 : index
    %c0_8 = arith.constant 0 : index
    %c0_9 = arith.constant 0 : index
    %11 = vector.load %arg4[%c0_7, %c0_8, %c0_9] : memref<1x2x32xf32, #tpu.memory_space<vmem>>, vector<1x2x32xf32>
    tpu.vector_store %arg4[%c0_7, %c0_8, %c0_9], %10 {strides = array<i32>} : memref<1x2x32xf32, #tpu.memory_space<vmem>>, vector<1x2x32xf32>,
    return
  }
  func.func @transform_0(%arg0: i32) -> (i32, i32) {
    %c0_i32 = arith.constant 0 : i32
    %c0_i32_0 = arith.constant 0 : i32
    return %arg0, %c0_i32 : i32, i32
  }
  func.func @transform_1(%arg0: i32) -> (i32, i32) {
    %c0_i32 = arith.constant 0 : i32
    %c0_i32_0 = arith.constant 0 : i32
    %c0_i32_1 = arith.constant 0 : i32
    return %c0_i32, %c0_i32_0 : i32, i32
  }
  func.func @transform_2(%arg0: i32) -> (i32, i32) {
    %c0_i32 = arith.constant 0 : i32
    %c0_i32_0 = arith.constant 0 : i32
    return %arg0, %c0_i32 : i32, i32
  }
  func.func @transform_3(%arg0: i32) -> (i32, i32, i32) {
    %c0_i32 = arith.constant 0 : i32
    %c0_i32_0 = arith.constant 0 : i32
    %c0_i32_1 = arith.constant 0 : i32
    return %arg0, %c0_i32, %c0_i32_0 : i32, i32, i32
  }
}

module attributes {stable_mosaic.version = 11 : i64} {
  func.func @_bn_lrelu_kernel(%arg0: i32, %arg1: memref<128x32xf32, #tpu.memory_space<vmem>>, %arg2: memref<1x32xf32, #tpu.memory_space<vmem>>, %arg3: memref<1x32xf32, #tpu.memory_space<vmem>>, %arg4: memref<128x32xbf16, #tpu.memory_space<vmem>>) attributes {dimension_semantics = [#tpu.dimension_semantics<parallel>], iteration_bounds = array<i64: 1>, scalar_prefetch = 0 : i64, scratch_operands = 0 : i64, tpu.core_type = #tpu.core_type<tc>, window_params = [{transform_indices = @transform_0, window_bounds = array<i64: 128, 32>}, {pipeline_mode = #tpu.pipeline_mode<synchronous>, transform_indices = @transform_1, window_bounds = array<i64: 1, 32>}, {pipeline_mode = #tpu.pipeline_mode<synchronous>, transform_indices = @transform_2, window_bounds = array<i64: 1, 32>}, {transform_indices = @transform_3, window_bounds = array<i64: 128, 32>}]} {
    %c0 = arith.constant 0 : index
    %c0_0 = arith.constant 0 : index
    %0 = vector.load %arg1[%c0, %c0_0] : memref<128x32xf32, #tpu.memory_space<vmem>>, vector<128x32xf32>
    %c0_1 = arith.constant 0 : index
    %c0_2 = arith.constant 0 : index
    %1 = vector.load %arg2[%c0_1, %c0_2] : memref<1x32xf32, #tpu.memory_space<vmem>>, vector<1x32xf32>
    %2 = vector.broadcast %1 : vector<1x32xf32> to vector<128x32xf32>
    %3 = arith.mulf %0, %2 : vector<128x32xf32>
    %c0_3 = arith.constant 0 : index
    %c0_4 = arith.constant 0 : index
    %4 = vector.load %arg3[%c0_3, %c0_4] : memref<1x32xf32, #tpu.memory_space<vmem>>, vector<1x32xf32>
    %5 = vector.broadcast %4 : vector<1x32xf32> to vector<128x32xf32>
    %6 = arith.addf %3, %5 : vector<128x32xf32>
    %cst = arith.constant 0.000000e+00 : f32
    %7 = vector.broadcast %cst : f32 to vector<128x32xf32>
    %8 = arith.cmpf ogt, %6, %7 : vector<128x32xf32>
    %cst_5 = arith.constant 2.000000e-01 : f32
    %9 = vector.broadcast %cst_5 : f32 to vector<128x32xf32>
    %10 = arith.mulf %9, %6 : vector<128x32xf32>
    %11 = arith.select %8, %6, %10 : vector<128x32xi1>, vector<128x32xf32>
    %12 = arith.truncf %11 : vector<128x32xf32> to vector<128x32xbf16>
    %c0_6 = arith.constant 0 : index
    %c0_7 = arith.constant 0 : index
    %13 = vector.load %arg4[%c0_6, %c0_7] : memref<128x32xbf16, #tpu.memory_space<vmem>>, vector<128x32xbf16>
    tpu.vector_store %arg4[%c0_6, %c0_7], %12 {strides = array<i32>} : memref<128x32xbf16, #tpu.memory_space<vmem>>, vector<128x32xbf16>,
    return
  }
  func.func @transform_0(%arg0: i32) -> (i32, i32) {
    %c0_i32 = arith.constant 0 : i32
    %c0_i32_0 = arith.constant 0 : i32
    return %arg0, %c0_i32 : i32, i32
  }
  func.func @transform_1(%arg0: i32) -> (i32, i32) {
    %c0_i32 = arith.constant 0 : i32
    %c0_i32_0 = arith.constant 0 : i32
    %c0_i32_1 = arith.constant 0 : i32
    return %c0_i32, %c0_i32_0 : i32, i32
  }
  func.func @transform_2(%arg0: i32) -> (i32, i32) {
    %c0_i32 = arith.constant 0 : i32
    %c0_i32_0 = arith.constant 0 : i32
    %c0_i32_1 = arith.constant 0 : i32
    return %c0_i32, %c0_i32_0 : i32, i32
  }
  func.func @transform_3(%arg0: i32) -> (i32, i32) {
    %c0_i32 = arith.constant 0 : i32
    %c0_i32_0 = arith.constant 0 : i32
    return %arg0, %c0_i32 : i32, i32
  }
}

module attributes {stable_mosaic.version = 11 : i64} {
  func.func @_mm_stats_kernel(%arg0: i32, %arg1: memref<32x512xbf16, #tpu.memory_space<vmem>>, %arg2: memref<512x64xbf16, #tpu.memory_space<vmem>>, %arg3: memref<32x64xf32, #tpu.memory_space<vmem>>, %arg4: memref<1x2x64xf32, #tpu.memory_space<vmem>>) attributes {dimension_semantics = [#tpu.dimension_semantics<parallel>], iteration_bounds = array<i64: 1>, scalar_prefetch = 0 : i64, scratch_operands = 0 : i64, tpu.core_type = #tpu.core_type<tc>, window_params = [{transform_indices = @transform_0, window_bounds = array<i64: 32, 512>}, {pipeline_mode = #tpu.pipeline_mode<synchronous>, transform_indices = @transform_1, window_bounds = array<i64: 512, 64>}, {transform_indices = @transform_2, window_bounds = array<i64: 32, 64>}, {transform_indices = @transform_3, window_bounds = array<i64: 1, 2, 64>}]} {
    %c0 = arith.constant 0 : index
    %c0_0 = arith.constant 0 : index
    %0 = vector.load %arg1[%c0, %c0_0] : memref<32x512xbf16, #tpu.memory_space<vmem>>, vector<32x512xbf16>
    %c0_1 = arith.constant 0 : index
    %c0_2 = arith.constant 0 : index
    %1 = vector.load %arg2[%c0_1, %c0_2] : memref<512x64xbf16, #tpu.memory_space<vmem>>, vector<512x64xbf16>
    %cst = arith.constant dense<0.000000e+00> : vector<32x64xf32>
    %2 = tpu.matmul %0, %1, %cst {dimension_numbers = #tpu.dot_dimension_numbers<[1], [0], [0], [1], [0, 0, 1, 1], [], []>} : vector<32x512xbf16>, vector<512x64xbf16>, vector<32x64xf32> -> vector<32x64xf32>
    %c0_3 = arith.constant 0 : index
    %c0_4 = arith.constant 0 : index
    %3 = vector.load %arg3[%c0_3, %c0_4] : memref<32x64xf32, #tpu.memory_space<vmem>>, vector<32x64xf32>
    tpu.vector_store %arg3[%c0_3, %c0_4], %2 {strides = array<i32>} : memref<32x64xf32, #tpu.memory_space<vmem>>, vector<32x64xf32>,
    %cst_5 = arith.constant dense<0.000000e+00> : vector<64xf32>
    %4 = vector.multi_reduction <add>, %2, %cst_5 [0] : vector<32x64xf32> to vector<64xf32>
    %5 = vector.shape_cast %4 : vector<64xf32> to vector<1x64xf32>
    %6 = arith.mulf %2, %2 : vector<32x64xf32>
    %cst_6 = arith.constant dense<0.000000e+00> : vector<64xf32>
    %7 = vector.multi_reduction <add>, %6, %cst_6 [0] : vector<32x64xf32> to vector<64xf32>
    %8 = vector.shape_cast %7 : vector<64xf32> to vector<1x64xf32>
    %9 = tpu.concatenate %5, %8 in 0 : vector<1x64xf32>, vector<1x64xf32> -> vector<2x64xf32>
    %10 = vector.shape_cast %9 : vector<2x64xf32> to vector<1x2x64xf32>
    %c0_7 = arith.constant 0 : index
    %c0_8 = arith.constant 0 : index
    %c0_9 = arith.constant 0 : index
    %11 = vector.load %arg4[%c0_7, %c0_8, %c0_9] : memref<1x2x64xf32, #tpu.memory_space<vmem>>, vector<1x2x64xf32>
    tpu.vector_store %arg4[%c0_7, %c0_8, %c0_9], %10 {strides = array<i32>} : memref<1x2x64xf32, #tpu.memory_space<vmem>>, vector<1x2x64xf32>,
    return
  }
  func.func @transform_0(%arg0: i32) -> (i32, i32) {
    %c0_i32 = arith.constant 0 : i32
    %c0_i32_0 = arith.constant 0 : i32
    return %arg0, %c0_i32 : i32, i32
  }
  func.func @transform_1(%arg0: i32) -> (i32, i32) {
    %c0_i32 = arith.constant 0 : i32
    %c0_i32_0 = arith.constant 0 : i32
    %c0_i32_1 = arith.constant 0 : i32
    return %c0_i32, %c0_i32_0 : i32, i32
  }
  func.func @transform_2(%arg0: i32) -> (i32, i32) {
    %c0_i32 = arith.constant 0 : i32
    %c0_i32_0 = arith.constant 0 : i32
    return %arg0, %c0_i32 : i32, i32
  }
  func.func @transform_3(%arg0: i32) -> (i32, i32, i32) {
    %c0_i32 = arith.constant 0 : i32
    %c0_i32_0 = arith.constant 0 : i32
    %c0_i32_1 = arith.constant 0 : i32
    return %arg0, %c0_i32, %c0_i32_0 : i32, i32, i32
  }
}

module attributes {stable_mosaic.version = 11 : i64} {
  func.func @_bn_lrelu_kernel(%arg0: i32, %arg1: memref<32x64xf32, #tpu.memory_space<vmem>>, %arg2: memref<1x64xf32, #tpu.memory_space<vmem>>, %arg3: memref<1x64xf32, #tpu.memory_space<vmem>>, %arg4: memref<32x64xbf16, #tpu.memory_space<vmem>>) attributes {dimension_semantics = [#tpu.dimension_semantics<parallel>], iteration_bounds = array<i64: 1>, scalar_prefetch = 0 : i64, scratch_operands = 0 : i64, tpu.core_type = #tpu.core_type<tc>, window_params = [{transform_indices = @transform_0, window_bounds = array<i64: 32, 64>}, {pipeline_mode = #tpu.pipeline_mode<synchronous>, transform_indices = @transform_1, window_bounds = array<i64: 1, 64>}, {pipeline_mode = #tpu.pipeline_mode<synchronous>, transform_indices = @transform_2, window_bounds = array<i64: 1, 64>}, {transform_indices = @transform_3, window_bounds = array<i64: 32, 64>}]} {
    %c0 = arith.constant 0 : index
    %c0_0 = arith.constant 0 : index
    %0 = vector.load %arg1[%c0, %c0_0] : memref<32x64xf32, #tpu.memory_space<vmem>>, vector<32x64xf32>
    %c0_1 = arith.constant 0 : index
    %c0_2 = arith.constant 0 : index
    %1 = vector.load %arg2[%c0_1, %c0_2] : memref<1x64xf32, #tpu.memory_space<vmem>>, vector<1x64xf32>
    %2 = vector.broadcast %1 : vector<1x64xf32> to vector<32x64xf32>
    %3 = arith.mulf %0, %2 : vector<32x64xf32>
    %c0_3 = arith.constant 0 : index
    %c0_4 = arith.constant 0 : index
    %4 = vector.load %arg3[%c0_3, %c0_4] : memref<1x64xf32, #tpu.memory_space<vmem>>, vector<1x64xf32>
    %5 = vector.broadcast %4 : vector<1x64xf32> to vector<32x64xf32>
    %6 = arith.addf %3, %5 : vector<32x64xf32>
    %cst = arith.constant 0.000000e+00 : f32
    %7 = vector.broadcast %cst : f32 to vector<32x64xf32>
    %8 = arith.cmpf ogt, %6, %7 : vector<32x64xf32>
    %cst_5 = arith.constant 2.000000e-01 : f32
    %9 = vector.broadcast %cst_5 : f32 to vector<32x64xf32>
    %10 = arith.mulf %9, %6 : vector<32x64xf32>
    %11 = arith.select %8, %6, %10 : vector<32x64xi1>, vector<32x64xf32>
    %12 = arith.truncf %11 : vector<32x64xf32> to vector<32x64xbf16>
    %c0_6 = arith.constant 0 : index
    %c0_7 = arith.constant 0 : index
    %13 = vector.load %arg4[%c0_6, %c0_7] : memref<32x64xbf16, #tpu.memory_space<vmem>>, vector<32x64xbf16>
    tpu.vector_store %arg4[%c0_6, %c0_7], %12 {strides = array<i32>} : memref<32x64xbf16, #tpu.memory_space<vmem>>, vector<32x64xbf16>,
    return
  }
  func.func @transform_0(%arg0: i32) -> (i32, i32) {
    %c0_i32 = arith.constant 0 : i32
    %c0_i32_0 = arith.constant 0 : i32
    return %arg0, %c0_i32 : i32, i32
  }
  func.func @transform_1(%arg0: i32) -> (i32, i32) {
    %c0_i32 = arith.constant 0 : i32
    %c0_i32_0 = arith.constant 0 : i32
    %c0_i32_1 = arith.constant 0 : i32
    return %c0_i32, %c0_i32_0 : i32, i32
  }
  func.func @transform_2(%arg0: i32) -> (i32, i32) {
    %c0_i32 = arith.constant 0 : i32
    %c0_i32_0 = arith.constant 0 : i32
    %c0_i32_1 = arith.constant 0 : i32
    return %c0_i32, %c0_i32_0 : i32, i32
  }
  func.func @transform_3(%arg0: i32) -> (i32, i32) {
    %c0_i32 = arith.constant 0 : i32
    %c0_i32_0 = arith.constant 0 : i32
    return %arg0, %c0_i32 : i32, i32
  }
}

</mosaic_0001>

<bundles_post_ra>
// kernel: discriminator_forward.7
= control target key start
LH: loop header
LB: loop body
LE: loop exit
PB: predicated region body
PF: predicated region fallthrough
CT: control target
= control target key end

     0   :  { %vm932_vm0 = vcmask 392192   ;;  %vm4166_vm3 = vcmask 60416   ;;  %s7291_s1 = inlined_call_operand.vmem [shape: bf16[48,8], index: 1, kind: input, shape index: {}]   ;;  %s7292_s0 = inlined_call_operand.vmem [shape: bf16[2048,48], index: 0, kind: input, shape index: {}]   ;;  %s7293_s2 = inlined_call_operand.vmem [shape: bf16[2048,8], index: 2, kind: output, shape index: {}]  }
   0x1   :  { %v5597_v0 = vld [vmem:[%s7291_s1] sm:$0xff]   ;;  %v5598_v1 = vld [vmem:[%s7291_s1 + $0x8] sm:$0xff]   ;;  %v5599_v2 = vld [vmem:[%s7291_s1 + $0x10] sm:$0xff]  }
   0x2   :  { %5329 = vmatprep.subr.bf16.mxu0 %v5597_v0  ;;  %5591 = vmatprep.subr.bf16.mxu1 %v5597_v0  ;;  %v5600_v3 = vld [vmem:[%s7292_s0] sm:$0xff]   ;;  %v5602_v5 = vld [vmem:[%s7292_s0 + $0x8] sm:$0xff]   ;;  %v5604_v7 = vld [vmem:[%s7292_s0 + $0x10] sm:$0xff]  }
   0x3   :  { %5330 = vmatpush3.bf16.msra.mxu0 %v5597_v0  ;;  %5594 = vmatpush3.bf16.msra.mxu1 %v5597_v0  ;;  %v5601_v4 = vld [vmem:[%s7292_s0 + $0x200] sm:$0xff]   ;;  %v5603_v6 = vld [vmem:[%s7292_s0 + $0x208] sm:$0xff]   ;;  %v5605_v8 = vld [vmem:[%s7292_s0 + $0x210] sm:$0xff]  }
   0x4   :  { %5331 = vmatprep.subr.bf16.mxu0 %v5598_v1  ;;  %5592 = vmatprep.subr.bf16.mxu1 %v5598_v1  ;;  %v5606_v9 = vld [vmem:[%s7292_s0 + $0x18] sm:$0xff]   ;;  %v5608_v11 = vld [vmem:[%s7292_s0 + $0x20] sm:$0xff]   ;;  %v5610_v13 = vld [vmem:[%s7292_s0 + $0x28] sm:$0xff]  }
   0x5   :  { %5335 = vmatprep.mubr.msk.bf16.mxu0 %vm932_vm0, %v5600_v3  ;;  %5463 = vmatprep.mubr.msk.bf16.mxu1 %vm932_vm0, %v5601_v4  ;;  %v5607_v10 = vld [vmem:[%s7292_s0 + $0x218] sm:$0xff]   ;;  %v5609_v12 = vld [vmem:[%s7292_s0 + $0x220] sm:$0xff]   ;;  %v5611_v14 = vld [vmem:[%s7292_s0 + $0x228] sm:$0xff]  }
   0x6   :  { %v5612_v15 = vld [vmem:[%s7292_s0 + $0x30] sm:$0xff]   ;;  %v5614_v17 = vld [vmem:[%s7292_s0 + $0x38] sm:$0xff]   ;;  %v5616_v19 = vld [vmem:[%s7292_s0 + $0x40] sm:$0xff]  }
   0x7   :  { %5332 = vmatpush3.bf16.msra.mxu0 %v5598_v1  ;;  %5595 = vmatpush3.bf16.msra.mxu1 %v5598_v1  ;;  %v5613_v16 = vld [vmem:[%s7292_s0 + $0x230] sm:$0xff]   ;;  %v5615_v18 = vld [vmem:[%s7292_s0 + $0x238] sm:$0xff]   ;;  %v5617_v20 = vld [vmem:[%s7292_s0 + $0x240] sm:$0xff]  }
   0x8   :  { %5333 = vmatprep.subr.bf16.mxu0 %v5599_v2  ;;  %5593 = vmatprep.subr.bf16.mxu1 %v5599_v2  ;;  %v5618_v21 = vld [vmem:[%s7292_s0 + $0x48] sm:$0xff]   ;;  %v5620_v23 = vld [vmem:[%s7292_s0 + $0x50] sm:$0xff]   ;;  %v5622_v25 = vld [vmem:[%s7292_s0 + $0x58] sm:$0xff]  }
   0x9   :  { %v5619_v22 = vld [vmem:[%s7292_s0 + $0x248] sm:$0xff]   ;;  %v5621_v24 = vld [vmem:[%s7292_s0 + $0x250] sm:$0xff]   ;;  %v5623_v26 = vld [vmem:[%s7292_s0 + $0x258] sm:$0xff]  }
   0xa   :  { %v5624_v27 = vld [vmem:[%s7292_s0 + $0x60] sm:$0xff]   ;;  %v5626_v29 = vld [vmem:[%s7292_s0 + $0x68] sm:$0xff]   ;;  %v5628_v31 = vld [vmem:[%s7292_s0 + $0x70] sm:$0xff]  }
   0xb   :  { %5334 = vmatpush3.bf16.msra.mxu0 %v5599_v2  ;;  %5596 = vmatpush3.bf16.msra.mxu1 %v5599_v2  ;;  %v5625_v28 = vld [vmem:[%s7292_s0 + $0x260] sm:$0xff]   ;;  %v5627_v30 = vld [vmem:[%s7292_s0 + $0x268] sm:$0xff]   ;;  %v5629_v32 = vld [vmem:[%s7292_s0 + $0x270] sm:$0xff]  }
   0xc   :  { %v5630_v33 = vld [vmem:[%s7292_s0 + $0x78] sm:$0xff]   ;;  %v5632_v35 = vld [vmem:[%s7292_s0 + $0x80] sm:$0xff]   ;;  %v5634_v37 = vld [vmem:[%s7292_s0 + $0x88] sm:$0xff]  }
   0xd   :  { %v5631_v34 = vld [vmem:[%s7292_s0 + $0x278] sm:$0xff]   ;;  %v5633_v36 = vld [vmem:[%s7292_s0 + $0x280] sm:$0xff]   ;;  %v5635_v38 = vld [vmem:[%s7292_s0 + $0x288] sm:$0xff]  }
   0xe   :  { %5336 = vmatmul.mubr.msk.bf16.vlgmr.msra.gmra.mrb[0].mxu0 %vm932_vm0, %v5602_v5  ;;  %5464 = vmatmul.mubr.msk.bf16.vlgmr.msra.gmra.mrb[0].mxu1 %vm932_vm0, %v5603_v6  ;;  %v5636_v39 = vld [vmem:[%s7292_s0 + $0x90] sm:$0xff]   ;;  %v5638_v41 = vld [vmem:[%s7292_s0 + $0x98] sm:$0xff]   ;;  %v5640_v43 = vld [vmem:[%s7292_s0 + $0xa0] sm:$0xff]  }
   0xf   :  { %5339 = vmatprep.mubr.msk.bf16.mxu0 %vm932_vm0, %v5604_v7  ;;  %5467 = vmatprep.mubr.msk.bf16.mxu1 %vm932_vm0, %v5605_v8  ;;  %v5637_v40 = vld [vmem:[%s7292_s0 + $0x290] sm:$0xff]   ;;  %v5639_v42 = vld [vmem:[%s7292_s0 + $0x298] sm:$0xff]   ;;  %v5641_v44 = vld [vmem:[%s7292_s0 + $0x2a0] sm:$0xff]  }
  0x10   :  { %v5642_v45 = vld [vmem:[%s7292_s0 + $0xa8] sm:$0xff]   ;;  %v5644_v47 = vld [vmem:[%s7292_s0 + $0xb0] sm:$0xff]   ;;  %v5646_v49 = vld [vmem:[%s7292_s0 + $0xb8] sm:$0xff]  }
  0x11   :  { %v5643_v46 = vld [vmem:[%s7292_s0 + $0x2a8] sm:$0xff]   ;;  %v5645_v48 = vld [vmem:[%s7292_s0 + $0x2b0] sm:$0xff]   ;;  %v5647_v50 = vld [vmem:[%s7292_s0 + $0x2b8] sm:$0xff]  }
  0x12   :  { %v5648_v51 = vld [vmem:[%s7292_s0 + $0xc0] sm:$0xff]   ;;  %v5650_v53 = vld [vmem:[%s7292_s0 + $0xc8] sm:$0xff]   ;;  %v5652_v55 = vld [vmem:[%s7292_s0 + $0xd0] sm:$0xff]  }
  0x13   :  { %v5649_v52 = vld [vmem:[%s7292_s0 + $0x2c0] sm:$0xff]   ;;  %v5651_v54 = vld [vmem:[%s7292_s0 + $0x2c8] sm:$0xff]   ;;  %v5653_v56 = vld [vmem:[%s7292_s0 + $0x2d0] sm:$0xff]  }
  0x14   :  { %v5654_v57 = vld [vmem:[%s7292_s0 + $0xd8] sm:$0xff]   ;;  %v5656_v59 = vld [vmem:[%s7292_s0 + $0xe0] sm:$0xff]   ;;  %v5658_v61 = vld [vmem:[%s7292_s0 + $0xe8] sm:$0xff]  }
  0x15   :  { %v5655_v58 = vld [vmem:[%s7292_s0 + $0x2d8] sm:$0xff]   ;;  %v5657_v60 = vld [vmem:[%s7292_s0 + $0x2e0] sm:$0xff]   ;;  %v5659_v62 = vld [vmem:[%s7292_s0 + $0x2e8] sm:$0xff]  }
  0x16   :  { %5340 = vmatmul.mubr.msk.bf16.gmra.mrb[4].mxu0 %vm932_vm0, %v5606_v9  ;;  %5468 = vmatmul.mubr.msk.bf16.gmra.mrb[4].mxu1 %vm932_vm0, %v5607_v10  ;;  %v5660_v63 = vld [vmem:[%s7292_s0 + $0xf0] sm:$0xff]   ;;  %v5662_v1 = vld [vmem:[%s7292_s0 + $0xf8] sm:$0xff]   ;;  %v5664_v3 = vld [vmem:[%s7292_s0 + $0x100] sm:$0xff]  }
  0x17   :  { %5343 = vmatprep.mubr.msk.bf16.mxu0 %vm932_vm0, %v5608_v11  ;;  %5471 = vmatprep.mubr.msk.bf16.mxu1 %vm932_vm0, %v5609_v12  ;;  %v5661_v0 = vld [vmem:[%s7292_s0 + $0x2f0] sm:$0xff]   ;;  %v5663_v2 = vld [vmem:[%s7292_s0 + $0x2f8] sm:$0xff]   ;;  %v5665_v4 = vld [vmem:[%s7292_s0 + $0x300] sm:$0xff]  }
  0x18   :  { %v5666_v5 = vld [vmem:[%s7292_s0 + $0x108] sm:$0xff]   ;;  %v5668_v7 = vld [vmem:[%s7292_s0 + $0x110] sm:$0xff]   ;;  %v5670_v9 = vld [vmem:[%s7292_s0 + $0x118] sm:$0xff]  }
  0x19   :  { %v5667_v6 = vld [vmem:[%s7292_s0 + $0x308] sm:$0xff]   ;;  %v5669_v8 = vld [vmem:[%s7292_s0 + $0x310] sm:$0xff]   ;;  %v5671_v10 = vld [vmem:[%s7292_s0 + $0x318] sm:$0xff]  }
  0x1a   :  { %v5672_v11 = vld [vmem:[%s7292_s0 + $0x120] sm:$0xff]  }
  0x1b   :  { %v5673_v12 = vld [vmem:[%s7292_s0 + $0x320] sm:$0xff]  }
  0x1e   :  { %5344 = vmatmul.mubr.msk.bf16.gmra.mrb[8].mxu0 %vm932_vm0, %v5610_v13  ;;  %5472 = vmatmul.mubr.msk.bf16.gmra.mrb[8].mxu1 %vm932_vm0, %v5611_v14  ;;  %v5674_v13 = vld [vmem:[%s7292_s0 + $0x128] sm:$0xff]  }
  0x1f   :  { %5347 = vmatprep.mubr.msk.bf16.mxu0 %vm932_vm0, %v5612_v15  ;;  %5475 = vmatprep.mubr.msk.bf16.mxu1 %vm932_vm0, %v5613_v16  ;;  %v5675_v14 = vld [vmem:[%s7292_s0 + $0x328] sm:$0xff]   ;;  %v5676_v15 = vld [vmem:[%s7292_s0 + $0x130] sm:$0xff]  }
  0x20   :  { %v5677_v16 = vld [vmem:[%s7292_s0 + $0x330] sm:$0xff]  }
  0x26   :  { %5348 = vmatmul.mubr.msk.bf16.gmra.mrb[12].mxu0 %vm932_vm0, %v5614_v17  ;;  %5476 = vmatmul.mubr.msk.bf16.gmra.mrb[12].mxu1 %vm932_vm0, %v5615_v18  ;;  %v5678_v17 = vld [vmem:[%s7292_s0 + $0x138] sm:$0xff]  }
  0x27   :  { %5351 = vmatprep.mubr.msk.bf16.mxu0 %vm932_vm0, %v5616_v19  ;;  %5479 = vmatprep.mubr.msk.bf16.mxu1 %vm932_vm0, %v5617_v20  ;;  %v5679_v18 = vld [vmem:[%s7292_s0 + $0x338] sm:$0xff]   ;;  %v5680_v19 = vld [vmem:[%s7292_s0 + $0x140] sm:$0xff]  }
  0x28   :  { %v5681_v20 = vld [vmem:[%s7292_s0 + $0x340] sm:$0xff]  }
  0x2e   :  { %5352 = vmatmul.mubr.msk.bf16.gmra.mrb[16].mxu0 %vm932_vm0, %v5618_v21  ;;  %5480 = vmatmul.mubr.msk.bf16.gmra.mrb[16].mxu1 %vm932_vm0, %v5619_v22  ;;  %v5682_v21 = vld [vmem:[%s7292_s0 + $0x148] sm:$0xff]  }
  0x2f   :  { %5355 = vmatprep.mubr.msk.bf16.mxu0 %vm932_vm0, %v5620_v23  ;;  %5483 = vmatprep.mubr.msk.bf16.mxu1 %vm932_vm0, %v5621_v24  ;;  %v5683_v22 = vld [vmem:[%s7292_s0 + $0x348] sm:$0xff]   ;;  %v5684_v23 = vld [vmem:[%s7292_s0 + $0x150] sm:$0xff]  }
  0x30   :  { %v5685_v24 = vld [vmem:[%s7292_s0 + $0x350] sm:$0xff]  }
  0x36   :  { %5356 = vmatmul.mubr.msk.bf16.gmra.mrb[20].mxu0 %vm932_vm0, %v5622_v25  ;;  %5484 = vmatmul.mubr.msk.bf16.gmra.mrb[20].mxu1 %vm932_vm0, %v5623_v26  ;;  %v5686_v25 = vld [vmem:[%s7292_s0 + $0x158] sm:$0xff]  }
  0x37   :  { %5359 = vmatprep.mubr.msk.bf16.mxu0 %vm932_vm0, %v5624_v27  ;;  %5487 = vmatprep.mubr.msk.bf16.mxu1 %vm932_vm0, %v5625_v28  ;;  %v5687_v26 = vld [vmem:[%s7292_s0 + $0x358] sm:$0xff]   ;;  %v5688_v27 = vld [vmem:[%s7292_s0 + $0x160] sm:$0xff]  }
  0x38   :  { %v5689_v28 = vld [vmem:[%s7292_s0 + $0x360] sm:$0xff]  }
  0x3e   :  { %5360 = vmatmul.mubr.msk.bf16.gmra.mrb[24].mxu0 %vm932_vm0, %v5626_v29  ;;  %5488 = vmatmul.mubr.msk.bf16.gmra.mrb[24].mxu1 %vm932_vm0, %v5627_v30  ;;  %v5690_v29 = vld [vmem:[%s7292_s0 + $0x168] sm:$0xff]  }
  0x3f   :  { %5363 = vmatprep.mubr.msk.bf16.mxu0 %vm932_vm0, %v5628_v31  ;;  %5491 = vmatprep.mubr.msk.bf16.mxu1 %vm932_vm0, %v5629_v32  ;;  %v5691_v30 = vld [vmem:[%s7292_s0 + $0x368] sm:$0xff]   ;;  %v5692_v31 = vld [vmem:[%s7292_s0 + $0x170] sm:$0xff]  }
  0x40   :  { %v5693_v32 = vld [vmem:[%s7292_s0 + $0x370] sm:$0xff]  }
  0x46   :  { %5364 = vmatmul.mubr.msk.bf16.gmra.mrb[28].mxu0 %vm932_vm0, %v5630_v33  ;;  %5492 = vmatmul.mubr.msk.bf16.gmra.mrb[28].mxu1 %vm932_vm0, %v5631_v34  ;;  %v5694_v33 = vld [vmem:[%s7292_s0 + $0x178] sm:$0xff]  }
  0x47   :  { %5367 = vmatprep.mubr.msk.bf16.mxu0 %vm932_vm0, %v5632_v35  ;;  %5495 = vmatprep.mubr.msk.bf16.mxu1 %vm932_vm0, %v5633_v36  ;;  %v5695_v34 = vld [vmem:[%s7292_s0 + $0x378] sm:$0xff]   ;;  %v5696_v35 = vld [vmem:[%s7292_s0 + $0x180] sm:$0xff]  }
  0x48   :  { %v5697_v36 = vld [vmem:[%s7292_s0 + $0x380] sm:$0xff]  }
  0x4e   :  { %5368 = vmatmul.mubr.msk.bf16.gmra.mrb[32].mxu0 %vm932_vm0, %v5634_v37  ;;  %5496 = vmatmul.mubr.msk.bf16.gmra.mrb[32].mxu1 %vm932_vm0, %v5635_v38  ;;  %v5698_v37 = vld [vmem:[%s7292_s0 + $0x188] sm:$0xff]  }
  0x4f   :  { %5371 = vmatprep.mubr.msk.bf16.mxu0 %vm932_vm0, %v5636_v39  ;;  %5499 = vmatprep.mubr.msk.bf16.mxu1 %vm932_vm0, %v5637_v40  ;;  %v5699_v38 = vld [vmem:[%s7292_s0 + $0x388] sm:$0xff]   ;;  %v5700_v39 = vld [vmem:[%s7292_s0 + $0x190] sm:$0xff]  }
  0x50   :  { %v5701_v40 = vld [vmem:[%s7292_s0 + $0x390] sm:$0xff]  }
  0x56   :  { %5372 = vmatmul.mubr.msk.bf16.gmra.mrb[36].mxu0 %vm932_vm0, %v5638_v41  ;;  %5500 = vmatmul.mubr.msk.bf16.gmra.mrb[36].mxu1 %vm932_vm0, %v5639_v42  ;;  %v5702_v41 = vld [vmem:[%s7292_s0 + $0x198] sm:$0xff]  }
  0x57   :  { %5375 = vmatprep.mubr.msk.bf16.mxu0 %vm932_vm0, %v5640_v43  ;;  %5503 = vmatprep.mubr.msk.bf16.mxu1 %vm932_vm0, %v5641_v44  ;;  %v5703_v42 = vld [vmem:[%s7292_s0 + $0x398] sm:$0xff]   ;;  %v5704_v43 = vld [vmem:[%s7292_s0 + $0x1a0] sm:$0xff]  }
  0x58   :  { %v5705_v44 = vld [vmem:[%s7292_s0 + $0x3a0] sm:$0xff]  }
  0x5e   :  { %5376 = vmatmul.mubr.msk.bf16.gmra.mrb[40].mxu0 %vm932_vm0, %v5642_v45  ;;  %5504 = vmatmul.mubr.msk.bf16.gmra.mrb[40].mxu1 %vm932_vm0, %v5643_v46  ;;  %v5706_v45 = vld [vmem:[%s7292_s0 + $0x1a8] sm:$0xff]  }
  0x5f   :  { %5379 = vmatprep.mubr.msk.bf16.mxu0 %vm932_vm0, %v5644_v47  ;;  %5507 = vmatprep.mubr.msk.bf16.mxu1 %vm932_vm0, %v5645_v48  ;;  %v5707_v46 = vld [vmem:[%s7292_s0 + $0x3a8] sm:$0xff]   ;;  %v5708_v47 = vld [vmem:[%s7292_s0 + $0x1b0] sm:$0xff]  }
  0x60   :  { %v5709_v48 = vld [vmem:[%s7292_s0 + $0x3b0] sm:$0xff]  }
  0x66   :  { %5380 = vmatmul.mubr.msk.bf16.gmra.mrb[44].mxu0 %vm932_vm0, %v5646_v49  ;;  %5508 = vmatmul.mubr.msk.bf16.gmra.mrb[44].mxu1 %vm932_vm0, %v5647_v50 }
  0x67   :  { %5383 = vmatprep.mubr.msk.bf16.mxu0 %vm932_vm0, %v5648_v51  ;;  %5511 = vmatprep.mubr.msk.bf16.mxu1 %vm932_vm0, %v5649_v52  ;;  %v5710_v51 = vld [vmem:[%s7292_s0 + $0x1b8] sm:$0xff]  }
  0x68   :  { %v5711_v52 = vld [vmem:[%s7292_s0 + $0x3b8] sm:$0xff]  }
  0x6e   :  { %5384 = vmatmul.mubr.msk.bf16.gmra.mrb[48].mxu0 %vm932_vm0, %v5650_v53  ;;  %5512 = vmatmul.mubr.msk.bf16.gmra.mrb[48].mxu1 %vm932_vm0, %v5651_v54 }
  0x6f   :  { %5387 = vmatprep.mubr.msk.bf16.mxu0 %vm932_vm0, %v5652_v55  ;;  %5515 = vmatprep.mubr.msk.bf16.mxu1 %vm932_vm0, %v5653_v56 }
  0x76   :  { %5388 = vmatmul.mubr.msk.bf16.gmra.mrb[52].mxu0 %vm932_vm0, %v5654_v57  ;;  %5516 = vmatmul.mubr.msk.bf16.gmra.mrb[52].mxu1 %vm932_vm0, %v5655_v58  ;;  %v5712_v57 = vld [vmem:[%s7292_s0 + $0x1c0] sm:$0xff]  }
  0x77   :  { %5391 = vmatprep.mubr.msk.bf16.mxu0 %vm932_vm0, %v5656_v59  ;;  %5519 = vmatprep.mubr.msk.bf16.mxu1 %vm932_vm0, %v5657_v60  ;;  %v5713_v58 = vld [vmem:[%s7292_s0 + $0x3c0] sm:$0xff]  }
  0x7e   :  { %5392 = vmatmul.mubr.msk.bf16.gmra.mrb[56].mxu0 %vm932_vm0, %v5658_v61  ;;  %5520 = vmatmul.mubr.msk.bf16.gmra.mrb[56].mxu1 %vm932_vm0, %v5659_v62 }
  0x7f   :  { %5395 = vmatprep.mubr.msk.bf16.mxu0 %vm932_vm0, %v5660_v63  ;;  %5523 = vmatprep.mubr.msk.bf16.mxu1 %vm932_vm0, %v5661_v0 }
  0x86   :  { %5396 = vmatmul.mubr.msk.bf16.gmra.mrb[60].mxu0 %vm932_vm0, %v5662_v1  ;;  %5524 = vmatmul.mubr.msk.bf16.gmra.mrb[60].mxu1 %vm932_vm0, %v5663_v2 }
  0x87   :  { %5399 = vmatprep.mubr.msk.bf16.mxu0 %vm932_vm0, %v5664_v3  ;;  %5527 = vmatprep.mubr.msk.bf16.mxu1 %vm932_vm0, %v5665_v4 }
  0x8e   :  { %5400 = vmatmul.mubr.msk.bf16.gmra.mrb[64].mxu0 %vm932_vm0, %v5666_v5  ;;  %5528 = vmatmul.mubr.msk.bf16.gmra.mrb[64].mxu1 %vm932_vm0, %v5667_v6 }
  0x8f   :  { %5403 = vmatprep.mubr.msk.bf16.mxu0 %vm932_vm0, %v5668_v7  ;;  %5531 = vmatprep.mubr.msk.bf16.mxu1 %vm932_vm0, %v5669_v8 }
  0x96   :  { %5404 = vmatmul.mubr.msk.bf16.gmra.mrb[68].mxu0 %vm932_vm0, %v5670_v9  ;;  %5532 = vmatmul.mubr.msk.bf16.gmra.mrb[68].mxu1 %vm932_vm0, %v5671_v10 }
  0x97   :  { %5407 = vmatprep.mubr.msk.bf16.mxu0 %vm932_vm0, %v5672_v11  ;;  %5535 = vmatprep.mubr.msk.bf16.mxu1 %vm932_vm0, %v5673_v12 }
  0x9e   :  { %5408 = vmatmul.mubr.msk.bf16.gmra.mrb[72].mxu0 %vm932_vm0, %v5674_v13  ;;  %5536 = vmatmul.mubr.msk.bf16.gmra.mrb[72].mxu1 %vm932_vm0, %v5675_v14 }
  0x9f   :  { %5411 = vmatprep.mubr.msk.bf16.mxu0 %vm932_vm0, %v5676_v15  ;;  %5539 = vmatprep.mubr.msk.bf16.mxu1 %vm932_vm0, %v5677_v16 }
  0xa6   :  { %5412 = vmatmul.mubr.msk.bf16.gmra.mrb[76].mxu0 %vm932_vm0, %v5678_v17  ;;  %5540 = vmatmul.mubr.msk.bf16.gmra.mrb[76].mxu1 %vm932_vm0, %v5679_v18  ;;  %v5714_v18 = vld [vmem:[%s7292_s0 + $0x1c8] sm:$0xff]  }
  0xa7   :  { %5415 = vmatprep.mubr.msk.bf16.mxu0 %vm932_vm0, %v5680_v19  ;;  %5543 = vmatprep.mubr.msk.bf16.mxu1 %vm932_vm0, %v5681_v20  ;;  %v5715_v19 = vld [vmem:[%s7292_s0 + $0x3c8] sm:$0xff]  }
  0xae   :  { %5416 = vmatmul.mubr.msk.bf16.gmra.mrb[80].mxu0 %vm932_vm0, %v5682_v21  ;;  %5544 = vmatmul.mubr.msk.bf16.gmra.mrb[80].mxu1 %vm932_vm0, %v5683_v22 }
  0xaf   :  { %5419 = vmatprep.mubr.msk.bf16.mxu0 %vm932_vm0, %v5684_v23  ;;  %5547 = vmatprep.mubr.msk.bf16.mxu1 %vm932_vm0, %v5685_v24 }
  0xb6   :  { %5420 = vmatmul.mubr.msk.bf16.gmra.mrb[84].mxu0 %vm932_vm0, %v5686_v25  ;;  %5548 = vmatmul.mubr.msk.bf16.gmra.mrb[84].mxu1 %vm932_vm0, %v5687_v26  ;;  %v5716_v25 = vld [vmem:[%s7292_s0 + $0x1d0] sm:$0xff]  }
  0xb7   :  { %5423 = vmatprep.mubr.msk.bf16.mxu0 %vm932_vm0, %v5688_v27  ;;  %5551 = vmatprep.mubr.msk.bf16.mxu1 %vm932_vm0, %v5689_v28 }
  0xbe   :  { %5424 = vmatmul.mubr.msk.bf16.gmra.mrb[88].mxu0 %vm932_vm0, %v5690_v29  ;;  %5552 = vmatmul.mubr.msk.bf16.gmra.mrb[88].mxu1 %vm932_vm0, %v5691_v30 }
  0xbf   :  { %5427 = vmatprep.mubr.msk.bf16.mxu0 %vm932_vm0, %v5692_v31  ;;  %5555 = vmatprep.mubr.msk.bf16.mxu1 %vm932_vm0, %v5693_v32  ;;  %v5717_v31 = vld [vmem:[%s7292_s0 + $0x3d0] sm:$0xff]  }
  0xc6   :  { %5428 = vmatmul.mubr.msk.bf16.gmra.mrb[92].mxu0 %vm932_vm0, %v5694_v33  ;;  %5556 = vmatmul.mubr.msk.bf16.gmra.mrb[92].mxu1 %vm932_vm0, %v5695_v34 }
  0xc7   :  { %5431 = vmatprep.mubr.msk.bf16.mxu0 %vm932_vm0, %v5696_v35  ;;  %5559 = vmatprep.mubr.msk.bf16.mxu1 %vm932_vm0, %v5697_v36 }
  0xce   :  { %5432 = vmatmul.mubr.msk.bf16.gmra.mrb[96].mxu0 %vm932_vm0, %v5698_v37  ;;  %5560 = vmatmul.mubr.msk.bf16.gmra.mrb[96].mxu1 %vm932_vm0, %v5699_v38 }
  0xcf   :  { %5435 = vmatprep.mubr.msk.bf16.mxu0 %vm932_vm0, %v5700_v39  ;;  %5563 = vmatprep.mubr.msk.bf16.mxu1 %vm932_vm0, %v5701_v40 }
  0xd6   :  { %5436 = vmatmul.mubr.msk.bf16.gmra.mrb[100].mxu0 %vm932_vm0, %v5702_v41  ;;  %5564 = vmatmul.mubr.msk.bf16.gmra.mrb[100].mxu1 %vm932_vm0, %v5703_v42 }
  0xd7   :  { %5439 = vmatprep.mubr.msk.bf16.mxu0 %vm932_vm0, %v5704_v43  ;;  %5567 = vmatprep.mubr.msk.bf16.mxu1 %vm932_vm0, %v5705_v44 }
  0xde   :  { %5440 = vmatmul.mubr.msk.bf16.gmra.mrb[104].mxu0 %vm932_vm0, %v5706_v45  ;;  %5568 = vmatmul.mubr.msk.bf16.gmra.mrb[104].mxu1 %vm932_vm0, %v5707_v46 }
  0xdf   :  { %5443 = vmatprep.mubr.msk.bf16.mxu0 %vm932_vm0, %v5708_v47  ;;  %5571 = vmatprep.mubr.msk.bf16.mxu1 %vm932_vm0, %v5709_v48 }
  0xe1   :  { %v5337_v49 = vpop.f32.mrb[0].mxu0  ;;  %v5465_v50 = vpop.f32.mrb[0].mxu1 }
  0xe2   :  { %vm2376_vm1 = vcmp.gt.f32.partialorder %v5337_v49, 0.0  ;;  %v2632_v53 = vmul.f32 0.2, %v5337_v49  ;;  %vm2504_vm2 = vcmp.gt.f32.partialorder %v5465_v50, 0.0  ;;  %v2760_v54 = vmul.f32 0.2, %v5465_v50 }
  0xe3   :  { %v1351_v55 = vpop.f32.mrb[1].mxu0  ;;  %v1863_v56 = vpop.f32.mrb[1].mxu1 }
  0xe4   :  { %v2888_v59 = vsel %vm2376_vm1, %v5337_v49, %v2632_v53  ;;  %v3016_v60 = vsel %vm2504_vm2, %v5465_v50, %v2760_v54  ;;  %vm2374_vm4 = vcmp.gt.f32.partialorder %v1351_v55, 0.0  ;;  %v2630_v61 = vmul.f32 0.2, %v1351_v55  ;;  %v5338_v62 = vpop.f32.mrb[2].mxu0  ;;  %v5466_v63 = vpop.f32.mrb[2].mxu1  ;;  %v5718_v49 = vld [vmem:[%s7292_s0 + $0x1d8] sm:$0xff]  }
  0xe5   :  { %v4944_v0 = vpack.c.bf16 %v2888_v59, %v2888_v59  ;;  %v5072_v1 = vpack.c.bf16 %v3016_v60, %v3016_v60  ;;  %vm2502_vm5 = vcmp.gt.f32.partialorder %v1863_v56, 0.0  ;;  %v2758_v2 = vmul.f32 0.2, %v1863_v56  ;;  %v1354_v3 = vpop.f32.mrb[3].mxu0  ;;  %v1866_v4 = vpop.f32.mrb[3].mxu1 }
  0xe6   :  { %v2886_v5 = vsel %vm2374_vm4, %v1351_v55, %v2630_v61  ;;  %vm2377_vm6 = vcmp.gt.f32.partialorder %v5338_v62, 0.0  ;;  %v2633_v6 = vmul.f32 0.2, %v5338_v62  ;;  %vm2505_vm7 = vcmp.gt.f32.partialorder %v5466_v63, 0.0  ;;  %5444 = vmatmul.mubr.msk.bf16.gmra.mrb[108].mxu0 %vm932_vm0, %v5710_v51  ;;  %5572 = vmatmul.mubr.msk.bf16.gmra.mrb[108].mxu1 %vm932_vm0, %v5711_v52  ;;  %v5719_v55 = vld [vmem:[%s7292_s0 + $0x3d8] sm:$0xff]   ;;  %v5720_v61 = vld [vmem:[%s7292_s0 + $0x1e0] sm:$0xff]  }
  0xe7   :  { %4169 = vst.msk [vmem:[%s7293_s2 + $0x8] sm:$0xf] %vm4166_vm3, %v4944_v0  ;;  %4297 = vst.msk [vmem:[%s7293_s2 + $0x208] sm:$0xf] %vm4166_vm3, %v5072_v1  ;;  %v4942_v7 = vpack.c.bf16 %v2886_v5, %v2886_v5  ;;  %v3014_v8 = vsel %vm2502_vm5, %v1863_v56, %v2758_v2  ;;  %v2761_v9 = vmul.f32 0.2, %v5466_v63  ;;  %5447 = vmatprep.mubr.msk.bf16.mxu0 %vm932_vm0, %v5712_v57  ;;  %5575 = vmatprep.mubr.msk.bf16.mxu1 %vm932_vm0, %v5713_v58 }
  0xe8   :  { %vm2375_vm8 = vcmp.gt.f32.partialorder %v1354_v3, 0.0  ;;  %v5070_v10 = vpack.c.bf16 %v3014_v8, %v3014_v8  ;;  %v2889_v11 = vsel %vm2377_vm6, %v5338_v62, %v2633_v6  ;;  %v2631_v12 = vmul.f32 0.2, %v1354_v3 }
  0xe9   :  { %vm2503_vm9 = vcmp.gt.f32.partialorder %v1866_v4, 0.0  ;;  %4167 = vst.msk [vmem:[%s7293_s2] sm:$0xf] %vm4166_vm3, %v4942_v7  ;;  %v4945_v13 = vpack.c.bf16 %v2889_v11, %v2889_v11  ;;  %v3017_v14 = vsel %vm2505_vm7, %v5466_v63, %v2761_v9  ;;  %v2759_v15 = vmul.f32 0.2, %v1866_v4  ;;  %v5341_v16 = vpop.f32.mrb[4].mxu0 }
  0xea   :  { %v5469_v17 = vpop.f32.mrb[4].mxu1  ;;  %4295 = vst.msk [vmem:[%s7293_s2 + $0x200] sm:$0xf] %vm4166_vm3, %v5070_v10  ;;  %v5073_v20 = vpack.c.bf16 %v3017_v14, %v3017_v14  ;;  %v2887_v21 = vsel %vm2375_vm8, %v1354_v3, %v2631_v12  ;;  %vm2380_vm10 = vcmp.gt.f32.partialorder %v5341_v16, 0.0  ;;  %v2636_v22 = vmul.f32 0.2, %v5341_v16 }
  0xeb   :  { %v1367_v23 = vpop.f32.mrb[5].mxu0  ;;  %v1879_v24 = vpop.f32.mrb[5].mxu1  ;;  %4170 = vst.msk [vmem:[%s7293_s2 + $0xc] sm:$0xf] %vm4166_vm3, %v4945_v13  ;;  %v4943_v26 = vpack.c.bf16 %v2887_v21, %v2887_v21  ;;  %v3015_v27 = vsel %vm2503_vm9, %v1866_v4, %v2759_v15  ;;  %vm2508_vm11 = vcmp.gt.f32.partialorder %v5469_v17, 0.0  ;;  %v5721_v3 = vld [vmem:[%s7292_s0 + $0x3e0] sm:$0xff]  }
  0xec   :  { %v2764_v28 = vmul.f32 0.2, %v5469_v17  ;;  %v5342_v29 = vpop.f32.mrb[6].mxu0  ;;  %v5470_v30 = vpop.f32.mrb[6].mxu1  ;;  %4298 = vst.msk [vmem:[%s7293_s2 + $0x20c] sm:$0xf] %vm4166_vm3, %v5073_v20  ;;  %v5071_v32 = vpack.c.bf16 %v3015_v27, %v3015_v27  ;;  %v2892_v33 = vsel %vm2380_vm10, %v5341_v16, %v2636_v22 }
  0xed   :  { %vm2378_vm12 = vcmp.gt.f32.partialorder %v1367_v23, 0.0  ;;  %v2634_v34 = vmul.f32 0.2, %v1367_v23  ;;  %v1370_v35 = vpop.f32.mrb[7].mxu0  ;;  %v1882_v36 = vpop.f32.mrb[7].mxu1  ;;  %v4948_v37 = vpack.c.bf16 %v2892_v33, %v2892_v33  ;;  %vm2506_vm13 = vcmp.gt.f32.partialorder %v1879_v24, 0.0 }
  0xee   :  { %4168 = vst.msk [vmem:[%s7293_s2 + $0x4] sm:$0xf] %vm4166_vm3, %v4943_v26  ;;  %v3020_v38 = vsel %vm2508_vm11, %v5469_v17, %v2764_v28  ;;  %v2762_v39 = vmul.f32 0.2, %v1879_v24  ;;  %4296 = vst.msk [vmem:[%s7293_s2 + $0x204] sm:$0xf] %vm4166_vm3, %v5071_v32  ;;  %5448 = vmatmul.mubr.msk.bf16.gmra.mrb[112].mxu0 %vm932_vm0, %v5714_v18  ;;  %5576 = vmatmul.mubr.msk.bf16.gmra.mrb[112].mxu1 %vm932_vm0, %v5715_v19 }
  0xef   :  { %v5076_v40 = vpack.c.bf16 %v3020_v38, %v3020_v38  ;;  %v2890_v41 = vsel %vm2378_vm12, %v1367_v23, %v2634_v34  ;;  %vm2381_vm14 = vcmp.gt.f32.partialorder %v5342_v29, 0.0  ;;  %v2637_v42 = vmul.f32 0.2, %v5342_v29  ;;  %4173 = vst.msk [vmem:[%s7293_s2 + $0x18] sm:$0xf] %vm4166_vm3, %v4948_v37  ;;  %5451 = vmatprep.mubr.msk.bf16.mxu0 %vm932_vm0, %v5716_v25  ;;  %5579 = vmatprep.mubr.msk.bf16.mxu1 %vm932_vm0, %v5717_v31  ;;  %v5722_v21 = vld [vmem:[%s7292_s0 + $0x1e8] sm:$0xff]  }
  0xf0   :  { %v4946_v43 = vpack.c.bf16 %v2890_v41, %v2890_v41  ;;  %v3018_v44 = vsel %vm2506_vm13, %v1879_v24, %v2762_v39  ;;  %vm2509_vm15 = vcmp.gt.f32.partialorder %v5470_v30, 0.0  ;;  %v2765_v45 = vmul.f32 0.2, %v5470_v30  ;;  %v5723_v27 = vld [vmem:[%s7292_s0 + $0x3e8] sm:$0xff]   ;;  %v5724_v33 = vld [vmem:[%s7292_s0 + $0x1f0] sm:$0xff]  }
  0xf1   :  { %4301 = vst.msk [vmem:[%s7293_s2 + $0x218] sm:$0xf] %vm4166_vm3, %v5076_v40  ;;  %v5074_v46 = vpack.c.bf16 %v3018_v44, %v3018_v44  ;;  %v2893_v47 = vsel %vm2381_vm14, %v5342_v29, %v2637_v42  ;;  %vm2379_vm1 = vcmp.gt.f32.partialorder %v1370_v35, 0.0  ;;  %v2635_v48 = vmul.f32 0.2, %v1370_v35  ;;  %v5345_v53 = vpop.f32.mrb[8].mxu0 }
  0xf2   :  { %4171 = vst.msk [vmem:[%s7293_s2 + $0x10] sm:$0xf] %vm4166_vm3, %v4946_v43  ;;  %v4949_v50 = vpack.c.bf16 %v2893_v47, %v2893_v47  ;;  %v3021_v51 = vsel %vm2509_vm15, %v5470_v30, %v2765_v45  ;;  %vm2507_vm2 = vcmp.gt.f32.partialorder %v1882_v36, 0.0  ;;  %v2763_v52 = vmul.f32 0.2, %v1882_v36  ;;  %v5473_v54 = vpop.f32.mrb[8].mxu1 }
  0xf3   :  { %4299 = vst.msk [vmem:[%s7293_s2 + $0x210] sm:$0xf] %vm4166_vm3, %v5074_v46  ;;  %v5077_v56 = vpack.c.bf16 %v3021_v51, %v3021_v51  ;;  %v2891_v57 = vsel %vm2379_vm1, %v1370_v35, %v2635_v48  ;;  %vm2384_vm4 = vcmp.gt.f32.partialorder %v5345_v53, 0.0  ;;  %v2640_v58 = vmul.f32 0.2, %v5345_v53  ;;  %v1383_v59 = vpop.f32.mrb[9].mxu0 }
  0xf4   :  { %v1895_v60 = vpop.f32.mrb[9].mxu1  ;;  %4174 = vst.msk [vmem:[%s7293_s2 + $0x1c] sm:$0xf] %vm4166_vm3, %v4949_v50  ;;  %v4947_v62 = vpack.c.bf16 %v2891_v57, %v2891_v57  ;;  %v3019_v63 = vsel %vm2507_vm2, %v1882_v36, %v2763_v52  ;;  %vm2512_vm5 = vcmp.gt.f32.partialorder %v5473_v54, 0.0  ;;  %v2768_v0 = vmul.f32 0.2, %v5473_v54 }
  0xf5   :  { %v5346_v1 = vpop.f32.mrb[10].mxu0  ;;  %v5474_v2 = vpop.f32.mrb[10].mxu1  ;;  %4302 = vst.msk [vmem:[%s7293_s2 + $0x21c] sm:$0xf] %vm4166_vm3, %v5077_v56  ;;  %v5075_v4 = vpack.c.bf16 %v3019_v63, %v3019_v63  ;;  %v2896_v5 = vsel %vm2384_vm4, %v5345_v53, %v2640_v58  ;;  %vm2382_vm6 = vcmp.gt.f32.partialorder %v1383_v59, 0.0  ;;  %vm2510_vm7 = vcmp.gt.f32.partialorder %v1895_v60, 0.0 }
  0xf6   :  { %v2638_v6 = vmul.f32 0.2, %v1383_v59  ;;  %v1386_v7 = vpop.f32.mrb[11].mxu0  ;;  %v1898_v8 = vpop.f32.mrb[11].mxu1  ;;  %4172 = vst.msk [vmem:[%s7293_s2 + $0x14] sm:$0xf] %vm4166_vm3, %v4947_v62  ;;  %v4952_v9 = vpack.c.bf16 %v2896_v5, %v2896_v5  ;;  %v3024_v10 = vsel %vm2512_vm5, %v5473_v54, %v2768_v0  ;;  %5452 = vmatmul.mubr.msk.bf16.gmra.mrb[116].mxu0 %vm932_vm0, %v5718_v49  ;;  %5580 = vmatmul.mubr.msk.bf16.gmra.mrb[116].mxu1 %vm932_vm0, %v5719_v55 }
  0xf7   :  { %v2766_v11 = vmul.f32 0.2, %v1895_v60  ;;  %4300 = vst.msk [vmem:[%s7293_s2 + $0x214] sm:$0xf] %vm4166_vm3, %v5075_v4  ;;  %v5080_v12 = vpack.c.bf16 %v3024_v10, %v3024_v10  ;;  %vm2385_vm8 = vcmp.gt.f32.partialorder %v5346_v1, 0.0  ;;  %vm2513_vm9 = vcmp.gt.f32.partialorder %v5474_v2, 0.0  ;;  %5455 = vmatprep.mubr.msk.bf16.mxu0 %vm932_vm0, %v5720_v61  ;;  %5583 = vmatprep.mubr.msk.bf16.mxu1 %vm932_vm0, %v5721_v3 }
  0xf8   :  { %v2894_v13 = vsel %vm2382_vm6, %v1383_v59, %v2638_v6  ;;  %v2641_v14 = vmul.f32 0.2, %v5346_v1  ;;  %4177 = vst.msk [vmem:[%s7293_s2 + $0x28] sm:$0xf] %vm4166_vm3, %v4952_v9  ;;  %v2769_v17 = vmul.f32 0.2, %v5474_v2 }
  0xf9   :  { %v4950_v15 = vpack.c.bf16 %v2894_v13, %v2894_v13  ;;  %v3022_v16 = vsel %vm2510_vm7, %v1895_v60, %v2766_v11  ;;  %4305 = vst.msk [vmem:[%s7293_s2 + $0x228] sm:$0xf] %vm4166_vm3, %v5080_v12  ;;  %vm2383_vm10 = vcmp.gt.f32.partialorder %v1386_v7, 0.0  ;;  %v2639_v20 = vmul.f32 0.2, %v1386_v7  ;;  %v5349_v25 = vpop.f32.mrb[12].mxu0 }
  0xfa   :  { %v5078_v18 = vpack.c.bf16 %v3022_v16, %v3022_v16  ;;  %v2897_v19 = vsel %vm2385_vm8, %v5346_v1, %v2641_v14  ;;  %v3025_v23 = vsel %vm2513_vm9, %v5474_v2, %v2769_v17  ;;  %vm2511_vm11 = vcmp.gt.f32.partialorder %v1898_v8, 0.0  ;;  %v5477_v26 = vpop.f32.mrb[12].mxu1  ;;  %v1399_v31 = vpop.f32.mrb[13].mxu0  ;;  %v5725_v39 = vld [vmem:[%s7292_s0 + $0x3f0] sm:$0xff]   ;;  %v5726_v62 = vld [vmem:[%s7292_s0 + $0x1f8] sm:$0xff]  }
  0xfb   :  { %4175 = vst.msk [vmem:[%s7293_s2 + $0x20] sm:$0xf] %vm4166_vm3, %v4950_v15  ;;  %v4953_v22 = vpack.c.bf16 %v2897_v19, %v2897_v19  ;;  %v2767_v24 = vmul.f32 0.2, %v1898_v8  ;;  %v5081_v28 = vpack.c.bf16 %v3025_v23, %v3025_v23  ;;  %v2895_v29 = vsel %vm2383_vm10, %v1386_v7, %v2639_v20  ;;  %v1911_v32 = vpop.f32.mrb[13].mxu1  ;;  %v5350_v37 = vpop.f32.mrb[14].mxu0 }
  0xfc   :  { %4303 = vst.msk [vmem:[%s7293_s2 + $0x220] sm:$0xf] %vm4166_vm3, %v5078_v18  ;;  %vm2388_vm12 = vcmp.gt.f32.partialorder %v5349_v25, 0.0  ;;  %v2644_v30 = vmul.f32 0.2, %v5349_v25  ;;  %v4951_v34 = vpack.c.bf16 %v2895_v29, %v2895_v29  ;;  %vm2516_vm13 = vcmp.gt.f32.partialorder %v5477_v26, 0.0 }
  0xfd   :  { %4178 = vst.msk [vmem:[%s7293_s2 + $0x2c] sm:$0xf] %vm4166_vm3, %v4953_v22  ;;  %v3023_v35 = vsel %vm2511_vm11, %v1898_v8, %v2767_v24  ;;  %v2772_v36 = vmul.f32 0.2, %v5477_v26  ;;  %v5478_v38 = vpop.f32.mrb[14].mxu1  ;;  %vm2386_vm14 = vcmp.gt.f32.partialorder %v1399_v31, 0.0 }
  0xfe   :  { %4306 = vst.msk [vmem:[%s7293_s2 + $0x22c] sm:$0xf] %vm4166_vm3, %v5081_v28  ;;  %v5079_v40 = vpack.c.bf16 %v3023_v35, %v3023_v35  ;;  %v2900_v41 = vsel %vm2388_vm12, %v5349_v25, %v2644_v30  ;;  %v2642_v42 = vmul.f32 0.2, %v1399_v31  ;;  %v1402_v43 = vpop.f32.mrb[15].mxu0  ;;  %v1914_v44 = vpop.f32.mrb[15].mxu1  ;;  %5456 = vmatmul.mubr.msk.bf16.gmra.mrb[120].mxu0 %vm932_vm0, %v5722_v21  ;;  %5584 = vmatmul.mubr.msk.bf16.gmra.mrb[120].mxu1 %vm932_vm0, %v5723_v27 }
  0xff   :  { %4176 = vst.msk [vmem:[%s7293_s2 + $0x24] sm:$0xf] %vm4166_vm3, %v4951_v34  ;;  %v4956_v45 = vpack.c.bf16 %v2900_v41, %v2900_v41  ;;  %v3028_v46 = vsel %vm2516_vm13, %v5477_v26, %v2772_v36  ;;  %vm2514_vm15 = vcmp.gt.f32.partialorder %v1911_v32, 0.0  ;;  %v2770_v47 = vmul.f32 0.2, %v1911_v32  ;;  %5459 = vmatprep.mubr.msk.bf16.mxu0 %vm932_vm0, %v5724_v33  ;;  %5587 = vmatprep.mubr.msk.bf16.mxu1 %vm932_vm0, %v5725_v39  ;;  %v5727_v4 = vld [vmem:[%s7292_s0 + $0x3f8] sm:$0xff]  }
 0x100   :  { %4304 = vst.msk [vmem:[%s7293_s2 + $0x224] sm:$0xf] %vm4166_vm3, %v5079_v40  ;;  %v5084_v48 = vpack.c.bf16 %v3028_v46, %v3028_v46  ;;  %v2898_v49 = vsel %vm2386_vm14, %v1399_v31, %v2642_v42  ;;  %vm2389_vm1 = vcmp.gt.f32.partialorder %v5350_v37, 0.0  ;;  %v2645_v50 = vmul.f32 0.2, %v5350_v37 }
 0x101   :  { %4181 = vst.msk [vmem:[%s7293_s2 + $0x38] sm:$0xf] %vm4166_vm3, %v4956_v45  ;;  %v4954_v51 = vpack.c.bf16 %v2898_v49, %v2898_v49  ;;  %v3026_v52 = vsel %vm2514_vm15, %v1911_v32, %v2770_v47  ;;  %vm2517_vm2 = vcmp.gt.f32.partialorder %v5478_v38, 0.0  ;;  %v2773_v53 = vmul.f32 0.2, %v5478_v38  ;;  %v5353_v60 = vpop.f32.mrb[16].mxu0 }
 0x102   :  { %4309 = vst.msk [vmem:[%s7293_s2 + $0x238] sm:$0xf] %vm4166_vm3, %v5084_v48  ;;  %v5082_v54 = vpack.c.bf16 %v3026_v52, %v3026_v52  ;;  %v2901_v55 = vsel %vm2389_vm1, %v5350_v37, %v2645_v50  ;;  %vm2387_vm4 = vcmp.gt.f32.partialorder %v1402_v43, 0.0  ;;  %v2643_v56 = vmul.f32 0.2, %v1402_v43  ;;  %v5481_v61 = vpop.f32.mrb[16].mxu1 }
 0x103   :  { %4179 = vst.msk [vmem:[%s7293_s2 + $0x30] sm:$0xf] %vm4166_vm3, %v4954_v51  ;;  %v4957_v57 = vpack.c.bf16 %v2901_v55, %v2901_v55  ;;  %v3029_v58 = vsel %vm2517_vm2, %v5478_v38, %v2773_v53  ;;  %vm2515_vm5 = vcmp.gt.f32.partialorder %v1914_v44, 0.0  ;;  %v2771_v59 = vmul.f32 0.2, %v1914_v44  ;;  %v1415_v2 = vpop.f32.mrb[17].mxu0 }
 0x104   :  { %4307 = vst.msk [vmem:[%s7293_s2 + $0x230] sm:$0xf] %vm4166_vm3, %v5082_v54  ;;  %v5085_v63 = vpack.c.bf16 %v3029_v58, %v3029_v58  ;;  %v2899_v0 = vsel %vm2387_vm4, %v1402_v43, %v2643_v56  ;;  %vm2392_vm6 = vcmp.gt.f32.partialorder %v5353_v60, 0.0  ;;  %v2648_v1 = vmul.f32 0.2, %v5353_v60  ;;  %v1927_v3 = vpop.f32.mrb[17].mxu1 }
 0x105   :  { %4182 = vst.msk [vmem:[%s7293_s2 + $0x3c] sm:$0xf] %vm4166_vm3, %v4957_v57  ;;  %v4955_v5 = vpack.c.bf16 %v2899_v0, %v2899_v0  ;;  %v3027_v6 = vsel %vm2515_vm5, %v1914_v44, %v2771_v59  ;;  %vm2520_vm7 = vcmp.gt.f32.partialorder %v5481_v61, 0.0  ;;  %v2776_v7 = vmul.f32 0.2, %v5481_v61  ;;  %v5354_v8 = vpop.f32.mrb[18].mxu0 }
 0x106   :  { %v5482_v9 = vpop.f32.mrb[18].mxu1  ;;  %4310 = vst.msk [vmem:[%s7293_s2 + $0x23c] sm:$0xf] %vm4166_vm3, %v5085_v63  ;;  %v5083_v10 = vpack.c.bf16 %v3027_v6, %v3027_v6  ;;  %v2904_v11 = vsel %vm2392_vm6, %v5353_v60, %v2648_v1  ;;  %vm2390_vm8 = vcmp.gt.f32.partialorder %v1415_v2, 0.0  ;;  %v2646_v12 = vmul.f32 0.2, %v1415_v2  ;;  %5460 = vmatmul.mubr.msk.bf16.gmra.mrb[124].mxu0 %vm932_vm0, %v5726_v62  ;;  %5588 = vmatmul.mubr.msk.bf16.gmra.mrb[124].mxu1 %vm932_vm0, %v5727_v4 }
 0x107   :  { %v1418_v13 = vpop.f32.mrb[19].mxu0  ;;  %v1930_v14 = vpop.f32.mrb[19].mxu1  ;;  %4180 = vst.msk [vmem:[%s7293_s2 + $0x34] sm:$0xf] %vm4166_vm3, %v4955_v5  ;;  %v4960_v15 = vpack.c.bf16 %v2904_v11, %v2904_v11  ;;  %v3032_v16 = vsel %vm2520_vm7, %v5481_v61, %v2776_v7  ;;  %vm2518_vm9 = vcmp.gt.f32.partialorder %v1927_v3, 0.0  ;;  %vm2393_vm10 = vcmp.gt.f32.partialorder %v5354_v8, 0.0 }
 0x108   :  { %v2774_v17 = vmul.f32 0.2, %v1927_v3  ;;  %4308 = vst.msk [vmem:[%s7293_s2 + $0x234] sm:$0xf] %vm4166_vm3, %v5083_v10  ;;  %v5088_v18 = vpack.c.bf16 %v3032_v16, %v3032_v16  ;;  %v2902_v19 = vsel %vm2390_vm8, %v1415_v2, %v2646_v12  ;;  %v2649_v20 = vmul.f32 0.2, %v5354_v8 }
 0x109   :  { %4185 = vst.msk [vmem:[%s7293_s2 + $0x48] sm:$0xf] %vm4166_vm3, %v4960_v15  ;;  %v4958_v21 = vpack.c.bf16 %v2902_v19, %v2902_v19  ;;  %vm2521_vm11 = vcmp.gt.f32.partialorder %v5482_v9, 0.0  ;;  %v2777_v23 = vmul.f32 0.2, %v5482_v9  ;;  %vm2391_vm12 = vcmp.gt.f32.partialorder %v1418_v13, 0.0 }
 0x10a   :  { %v3030_v22 = vsel %vm2518_vm9, %v1927_v3, %v2774_v17  ;;  %4313 = vst.msk [vmem:[%s7293_s2 + $0x248] sm:$0xf] %vm4166_vm3, %v5088_v18  ;;  %v2905_v25 = vsel %vm2393_vm10, %v5354_v8, %v2649_v20  ;;  %v2647_v26 = vmul.f32 0.2, %v1418_v13  ;;  %vm2519_vm0 = vcmp.gt.f32.partialorder %v1930_v14, 0.0  ;;  %v5357_v30 = vpop.f32.mrb[20].mxu0 }
 0x10b   :  { %v5086_v24 = vpack.c.bf16 %v3030_v22, %v3030_v22  ;;  %4183 = vst.msk [vmem:[%s7293_s2 + $0x40] sm:$0xf] %vm4166_vm3, %v4958_v21  ;;  %v4961_v27 = vpack.c.bf16 %v2905_v25, %v2905_v25  ;;  %v3033_v28 = vsel %vm2521_vm11, %v5482_v9, %v2777_v23  ;;  %v2775_v29 = vmul.f32 0.2, %v1930_v14  ;;  %v5485_v31 = vpop.f32.mrb[20].mxu1  ;;  %v1431_v35 = vpop.f32.mrb[21].mxu0 }
 0x10c   :  { %v5089_v32 = vpack.c.bf16 %v3033_v28, %v3033_v28  ;;  %v2903_v33 = vsel %vm2391_vm12, %v1418_v13, %v2647_v26  ;;  %vm2396_vm13 = vcmp.gt.f32.partialorder %v5357_v30, 0.0  ;;  %v2652_v34 = vmul.f32 0.2, %v5357_v30  ;;  %v1943_v36 = vpop.f32.mrb[21].mxu1  ;;  %v5358_v40 = vpop.f32.mrb[22].mxu0 }
 0x10d   :  { %4311 = vst.msk [vmem:[%s7293_s2 + $0x240] sm:$0xf] %vm4166_vm3, %v5086_v24  ;;  %4186 = vst.msk [vmem:[%s7293_s2 + $0x4c] sm:$0xf] %vm4166_vm3, %v4961_v27  ;;  %v4959_v37 = vpack.c.bf16 %v2903_v33, %v2903_v33  ;;  %v3031_v38 = vsel %vm2519_vm0, %v1930_v14, %v2775_v29  ;;  %vm2524_vm14 = vcmp.gt.f32.partialorder %v5485_v31, 0.0  ;;  %v5486_v41 = vpop.f32.mrb[22].mxu1 }
 0x10e   :  { %v2780_v39 = vmul.f32 0.2, %v5485_v31  ;;  %4314 = vst.msk [vmem:[%s7293_s2 + $0x24c] sm:$0xf] %vm4166_vm3, %v5089_v32  ;;  %v5087_v42 = vpack.c.bf16 %v3031_v38, %v3031_v38  ;;  %v2908_v43 = vsel %vm2396_vm13, %v5357_v30, %v2652_v34  ;;  %vm2394_vm15 = vcmp.gt.f32.partialorder %v1431_v35, 0.0  ;;  %v1434_v45 = vpop.f32.mrb[23].mxu0 }
 0x10f   :  { %v2650_v44 = vmul.f32 0.2, %v1431_v35  ;;  %v1946_v46 = vpop.f32.mrb[23].mxu1  ;;  %4184 = vst.msk [vmem:[%s7293_s2 + $0x44] sm:$0xf] %vm4166_vm3, %v4959_v37  ;;  %v4964_v47 = vpack.c.bf16 %v2908_v43, %v2908_v43  ;;  %vm2522_vm1 = vcmp.gt.f32.partialorder %v1943_v36, 0.0 }
 0x110   :  { %v3036_v48 = vsel %vm2524_vm14, %v5485_v31, %v2780_v39  ;;  %v2778_v49 = vmul.f32 0.2, %v1943_v36  ;;  %4312 = vst.msk [vmem:[%s7293_s2 + $0x244] sm:$0xf] %vm4166_vm3, %v5087_v42  ;;  %vm2397_vm2 = vcmp.gt.f32.partialorder %v5358_v40, 0.0  ;;  %vm2525_vm4 = vcmp.gt.f32.partialorder %v5486_v41, 0.0 }
 0x111   :  { %v5092_v50 = vpack.c.bf16 %v3036_v48, %v3036_v48  ;;  %v2906_v51 = vsel %vm2394_vm15, %v1431_v35, %v2650_v44  ;;  %v2653_v52 = vmul.f32 0.2, %v5358_v40  ;;  %4189 = vst.msk [vmem:[%s7293_s2 + $0x58] sm:$0xf] %vm4166_vm3, %v4964_v47  ;;  %v2781_v55 = vmul.f32 0.2, %v5486_v41 }
 0x112   :  { %v4962_v53 = vpack.c.bf16 %v2906_v51, %v2906_v51  ;;  %v3034_v54 = vsel %vm2522_vm1, %v1943_v36, %v2778_v49  ;;  %vm2395_vm5 = vcmp.gt.f32.partialorder %v1434_v45, 0.0  ;;  %v2651_v58 = vmul.f32 0.2, %v1434_v45  ;;  %v5361_v62 = vpop.f32.mrb[24].mxu0  ;;  %v5489_v63 = vpop.f32.mrb[24].mxu1 }
 0x113   :  { %4317 = vst.msk [vmem:[%s7293_s2 + $0x258] sm:$0xf] %vm4166_vm3, %v5092_v50  ;;  %v5090_v56 = vpack.c.bf16 %v3034_v54, %v3034_v54  ;;  %v2909_v57 = vsel %vm2397_vm2, %v5358_v40, %v2653_v52  ;;  %v3037_v60 = vsel %vm2525_vm4, %v5486_v41, %v2781_v55  ;;  %vm2523_vm6 = vcmp.gt.f32.partialorder %v1946_v46, 0.0  ;;  %v1447_v3 = vpop.f32.mrb[25].mxu0  ;;  %v1959_v4 = vpop.f32.mrb[25].mxu1 }
 0x114   :  { %4187 = vst.msk [vmem:[%s7293_s2 + $0x50] sm:$0xf] %vm4166_vm3, %v4962_v53  ;;  %v4965_v59 = vpack.c.bf16 %v2909_v57, %v2909_v57  ;;  %v2779_v61 = vmul.f32 0.2, %v1946_v46  ;;  %v5093_v0 = vpack.c.bf16 %v3037_v60, %v3037_v60  ;;  %v2907_v1 = vsel %vm2395_vm5, %v1434_v45, %v2651_v58  ;;  %v5362_v8 = vpop.f32.mrb[26].mxu0  ;;  %v5490_v9 = vpop.f32.mrb[26].mxu1 }
 0x115   :  { %4315 = vst.msk [vmem:[%s7293_s2 + $0x250] sm:$0xf] %vm4166_vm3, %v5090_v56  ;;  %vm2400_vm7 = vcmp.gt.f32.partialorder %v5361_v62, 0.0  ;;  %v2656_v2 = vmul.f32 0.2, %v5361_v62  ;;  %v4963_v5 = vpack.c.bf16 %v2907_v1, %v2907_v1  ;;  %vm2528_vm8 = vcmp.gt.f32.partialorder %v5489_v63, 0.0 }
 0x116   :  { %4190 = vst.msk [vmem:[%s7293_s2 + $0x5c] sm:$0xf] %vm4166_vm3, %v4965_v59  ;;  %v3035_v6 = vsel %vm2523_vm6, %v1946_v46, %v2779_v61  ;;  %v2784_v7 = vmul.f32 0.2, %v5489_v63  ;;  %4318 = vst.msk [vmem:[%s7293_s2 + $0x25c] sm:$0xf] %vm4166_vm3, %v5093_v0 }
 0x117   :  { %v5091_v10 = vpack.c.bf16 %v3035_v6, %v3035_v6  ;;  %v2912_v11 = vsel %vm2400_vm7, %v5361_v62, %v2656_v2  ;;  %vm2398_vm9 = vcmp.gt.f32.partialorder %v1447_v3, 0.0  ;;  %v2654_v12 = vmul.f32 0.2, %v1447_v3  ;;  %v1450_v13 = vpop.f32.mrb[27].mxu0  ;;  %v1962_v14 = vpop.f32.mrb[27].mxu1 }
 0x118   :  { %4188 = vst.msk [vmem:[%s7293_s2 + $0x54] sm:$0xf] %vm4166_vm3, %v4963_v5  ;;  %v4968_v15 = vpack.c.bf16 %v2912_v11, %v2912_v11  ;;  %v3040_v16 = vsel %vm2528_vm8, %v5489_v63, %v2784_v7  ;;  %vm2526_vm10 = vcmp.gt.f32.partialorder %v1959_v4, 0.0  ;;  %v2782_v17 = vmul.f32 0.2, %v1959_v4 }
 0x119   :  { %4316 = vst.msk [vmem:[%s7293_s2 + $0x254] sm:$0xf] %vm4166_vm3, %v5091_v10  ;;  %v5096_v18 = vpack.c.bf16 %v3040_v16, %v3040_v16  ;;  %v2910_v19 = vsel %vm2398_vm9, %v1447_v3, %v2654_v12  ;;  %vm2401_vm11 = vcmp.gt.f32.partialorder %v5362_v8, 0.0  ;;  %v2657_v20 = vmul.f32 0.2, %v5362_v8  ;;  %v5365_v30 = vpop.f32.mrb[28].mxu0 }
 0x11a   :  { %4193 = vst.msk [vmem:[%s7293_s2 + $0x68] sm:$0xf] %vm4166_vm3, %v4968_v15  ;;  %v4966_v21 = vpack.c.bf16 %v2910_v19, %v2910_v19  ;;  %v3038_v22 = vsel %vm2526_vm10, %v1959_v4, %v2782_v17  ;;  %vm2529_vm12 = vcmp.gt.f32.partialorder %v5490_v9, 0.0  ;;  %v2785_v23 = vmul.f32 0.2, %v5490_v9  ;;  %v5493_v31 = vpop.f32.mrb[28].mxu1 }
 0x11b   :  { %4321 = vst.msk [vmem:[%s7293_s2 + $0x268] sm:$0xf] %vm4166_vm3, %v5096_v18  ;;  %v5094_v24 = vpack.c.bf16 %v3038_v22, %v3038_v22  ;;  %v2913_v25 = vsel %vm2401_vm11, %v5362_v8, %v2657_v20  ;;  %vm2399_vm0 = vcmp.gt.f32.partialorder %v1450_v13, 0.0  ;;  %v2655_v26 = vmul.f32 0.2, %v1450_v13  ;;  %v1463_v35 = vpop.f32.mrb[29].mxu0 }
 0x11c   :  { %4191 = vst.msk [vmem:[%s7293_s2 + $0x60] sm:$0xf] %vm4166_vm3, %v4966_v21  ;;  %v4969_v27 = vpack.c.bf16 %v2913_v25, %v2913_v25  ;;  %v3041_v28 = vsel %vm2529_vm12, %v5490_v9, %v2785_v23  ;;  %vm2527_vm13 = vcmp.gt.f32.partialorder %v1962_v14, 0.0  ;;  %v2783_v29 = vmul.f32 0.2, %v1962_v14  ;;  %v1975_v36 = vpop.f32.mrb[29].mxu1 }
 0x11d   :  { %4319 = vst.msk [vmem:[%s7293_s2 + $0x260] sm:$0xf] %vm4166_vm3, %v5094_v24  ;;  %v5097_v32 = vpack.c.bf16 %v3041_v28, %v3041_v28  ;;  %v2911_v33 = vsel %vm2399_vm0, %v1450_v13, %v2655_v26  ;;  %vm2404_vm14 = vcmp.gt.f32.partialorder %v5365_v30, 0.0  ;;  %v2660_v34 = vmul.f32 0.2, %v5365_v30  ;;  %v5366_v40 = vpop.f32.mrb[30].mxu0 }
 0x11e   :  { %4194 = vst.msk [vmem:[%s7293_s2 + $0x6c] sm:$0xf] %vm4166_vm3, %v4969_v27  ;;  %v4967_v37 = vpack.c.bf16 %v2911_v33, %v2911_v33  ;;  %v3039_v38 = vsel %vm2527_vm13, %v1962_v14, %v2783_v29  ;;  %vm2532_vm15 = vcmp.gt.f32.partialorder %v5493_v31, 0.0  ;;  %v2788_v39 = vmul.f32 0.2, %v5493_v31  ;;  %v5494_v41 = vpop.f32.mrb[30].mxu1 }
 0x11f   :  { %4322 = vst.msk [vmem:[%s7293_s2 + $0x26c] sm:$0xf] %vm4166_vm3, %v5097_v32  ;;  %v5095_v42 = vpack.c.bf16 %v3039_v38, %v3039_v38  ;;  %v2916_v43 = vsel %vm2404_vm14, %v5365_v30, %v2660_v34  ;;  %vm2402_vm1 = vcmp.gt.f32.partialorder %v1463_v35, 0.0  ;;  %v2658_v44 = vmul.f32 0.2, %v1463_v35  ;;  %v1466_v45 = vpop.f32.mrb[31].mxu0 }
 0x120   :  { %v1978_v46 = vpop.f32.mrb[31].mxu1  ;;  %4192 = vst.msk [vmem:[%s7293_s2 + $0x64] sm:$0xf] %vm4166_vm3, %v4967_v37  ;;  %v4972_v47 = vpack.c.bf16 %v2916_v43, %v2916_v43  ;;  %v3044_v48 = vsel %vm2532_vm15, %v5493_v31, %v2788_v39  ;;  %vm2530_vm2 = vcmp.gt.f32.partialorder %v1975_v36, 0.0  ;;  %v2786_v49 = vmul.f32 0.2, %v1975_v36 }
 0x121   :  { %4320 = vst.msk [vmem:[%s7293_s2 + $0x264] sm:$0xf] %vm4166_vm3, %v5095_v42  ;;  %v5100_v50 = vpack.c.bf16 %v3044_v48, %v3044_v48  ;;  %v2914_v51 = vsel %vm2402_vm1, %v1463_v35, %v2658_v44  ;;  %vm2405_vm4 = vcmp.gt.f32.partialorder %v5366_v40, 0.0  ;;  %v2661_v52 = vmul.f32 0.2, %v5366_v40  ;;  %v5369_v62 = vpop.f32.mrb[32].mxu0 }
 0x122   :  { %4197 = vst.msk [vmem:[%s7293_s2 + $0x78] sm:$0xf] %vm4166_vm3, %v4972_v47  ;;  %v4970_v53 = vpack.c.bf16 %v2914_v51, %v2914_v51  ;;  %v3042_v54 = vsel %vm2530_vm2, %v1975_v36, %v2786_v49  ;;  %vm2533_vm5 = vcmp.gt.f32.partialorder %v5494_v41, 0.0  ;;  %v2789_v55 = vmul.f32 0.2, %v5494_v41  ;;  %v5497_v63 = vpop.f32.mrb[32].mxu1 }
 0x123   :  { %4325 = vst.msk [vmem:[%s7293_s2 + $0x278] sm:$0xf] %vm4166_vm3, %v5100_v50  ;;  %v5098_v56 = vpack.c.bf16 %v3042_v54, %v3042_v54  ;;  %v2917_v57 = vsel %vm2405_vm4, %v5366_v40, %v2661_v52  ;;  %vm2403_vm6 = vcmp.gt.f32.partialorder %v1466_v45, 0.0  ;;  %v2659_v58 = vmul.f32 0.2, %v1466_v45  ;;  %v1479_v3 = vpop.f32.mrb[33].mxu0 }
 0x124   :  { %4195 = vst.msk [vmem:[%s7293_s2 + $0x70] sm:$0xf] %vm4166_vm3, %v4970_v53  ;;  %v4973_v59 = vpack.c.bf16 %v2917_v57, %v2917_v57  ;;  %v3045_v60 = vsel %vm2533_vm5, %v5494_v41, %v2789_v55  ;;  %vm2531_vm7 = vcmp.gt.f32.partialorder %v1978_v46, 0.0  ;;  %v2787_v61 = vmul.f32 0.2, %v1978_v46  ;;  %v1991_v4 = vpop.f32.mrb[33].mxu1 }
 0x125   :  { %4323 = vst.msk [vmem:[%s7293_s2 + $0x270] sm:$0xf] %vm4166_vm3, %v5098_v56  ;;  %v5101_v0 = vpack.c.bf16 %v3045_v60, %v3045_v60  ;;  %v2915_v1 = vsel %vm2403_vm6, %v1466_v45, %v2659_v58  ;;  %vm2408_vm8 = vcmp.gt.f32.partialorder %v5369_v62, 0.0  ;;  %v2664_v2 = vmul.f32 0.2, %v5369_v62  ;;  %v5370_v8 = vpop.f32.mrb[34].mxu0 }
 0x126   :  { %4198 = vst.msk [vmem:[%s7293_s2 + $0x7c] sm:$0xf] %vm4166_vm3, %v4973_v59  ;;  %v4971_v5 = vpack.c.bf16 %v2915_v1, %v2915_v1  ;;  %v3043_v6 = vsel %vm2531_vm7, %v1978_v46, %v2787_v61  ;;  %vm2536_vm9 = vcmp.gt.f32.partialorder %v5497_v63, 0.0  ;;  %v2792_v7 = vmul.f32 0.2, %v5497_v63  ;;  %v5498_v9 = vpop.f32.mrb[34].mxu1 }
 0x127   :  { %4326 = vst.msk [vmem:[%s7293_s2 + $0x27c] sm:$0xf] %vm4166_vm3, %v5101_v0  ;;  %v5099_v10 = vpack.c.bf16 %v3043_v6, %v3043_v6  ;;  %v2920_v11 = vsel %vm2408_vm8, %v5369_v62, %v2664_v2  ;;  %vm2406_vm10 = vcmp.gt.f32.partialorder %v1479_v3, 0.0  ;;  %v2662_v12 = vmul.f32 0.2, %v1479_v3  ;;  %v1482_v13 = vpop.f32.mrb[35].mxu0 }
 0x128   :  { %v1994_v14 = vpop.f32.mrb[35].mxu1  ;;  %4196 = vst.msk [vmem:[%s7293_s2 + $0x74] sm:$0xf] %vm4166_vm3, %v4971_v5  ;;  %v4976_v15 = vpack.c.bf16 %v2920_v11, %v2920_v11  ;;  %v3048_v16 = vsel %vm2536_vm9, %v5497_v63, %v2792_v7  ;;  %vm2534_vm11 = vcmp.gt.f32.partialorder %v1991_v4, 0.0  ;;  %v2790_v17 = vmul.f32 0.2, %v1991_v4 }
 0x129   :  { %4324 = vst.msk [vmem:[%s7293_s2 + $0x274] sm:$0xf] %vm4166_vm3, %v5099_v10  ;;  %v5104_v18 = vpack.c.bf16 %v3048_v16, %v3048_v16  ;;  %v2918_v19 = vsel %vm2406_vm10, %v1479_v3, %v2662_v12  ;;  %vm2409_vm12 = vcmp.gt.f32.partialorder %v5370_v8, 0.0  ;;  %v2665_v20 = vmul.f32 0.2, %v5370_v8  ;;  %v5373_v30 = vpop.f32.mrb[36].mxu0 }
 0x12a   :  { %4201 = vst.msk [vmem:[%s7293_s2 + $0x88] sm:$0xf] %vm4166_vm3, %v4976_v15  ;;  %v4974_v21 = vpack.c.bf16 %v2918_v19, %v2918_v19  ;;  %v3046_v22 = vsel %vm2534_vm11, %v1991_v4, %v2790_v17  ;;  %vm2537_vm0 = vcmp.gt.f32.partialorder %v5498_v9, 0.0  ;;  %v2793_v23 = vmul.f32 0.2, %v5498_v9  ;;  %v5501_v31 = vpop.f32.mrb[36].mxu1 }
 0x12b   :  { %4329 = vst.msk [vmem:[%s7293_s2 + $0x288] sm:$0xf] %vm4166_vm3, %v5104_v18  ;;  %v5102_v24 = vpack.c.bf16 %v3046_v22, %v3046_v22  ;;  %v2921_v25 = vsel %vm2409_vm12, %v5370_v8, %v2665_v20  ;;  %vm2407_vm13 = vcmp.gt.f32.partialorder %v1482_v13, 0.0  ;;  %v2663_v26 = vmul.f32 0.2, %v1482_v13  ;;  %v1495_v35 = vpop.f32.mrb[37].mxu0 }
 0x12c   :  { %4199 = vst.msk [vmem:[%s7293_s2 + $0x80] sm:$0xf] %vm4166_vm3, %v4974_v21  ;;  %v4977_v27 = vpack.c.bf16 %v2921_v25, %v2921_v25  ;;  %v3049_v28 = vsel %vm2537_vm0, %v5498_v9, %v2793_v23  ;;  %vm2535_vm14 = vcmp.gt.f32.partialorder %v1994_v14, 0.0  ;;  %v2791_v29 = vmul.f32 0.2, %v1994_v14  ;;  %v2007_v36 = vpop.f32.mrb[37].mxu1 }
 0x12d   :  { %4327 = vst.msk [vmem:[%s7293_s2 + $0x280] sm:$0xf] %vm4166_vm3, %v5102_v24  ;;  %v5105_v32 = vpack.c.bf16 %v3049_v28, %v3049_v28  ;;  %v2919_v33 = vsel %vm2407_vm13, %v1482_v13, %v2663_v26  ;;  %vm2412_vm15 = vcmp.gt.f32.partialorder %v5373_v30, 0.0  ;;  %v2668_v34 = vmul.f32 0.2, %v5373_v30  ;;  %v5374_v40 = vpop.f32.mrb[38].mxu0 }
 0x12e   :  { %4202 = vst.msk [vmem:[%s7293_s2 + $0x8c] sm:$0xf] %vm4166_vm3, %v4977_v27  ;;  %v4975_v37 = vpack.c.bf16 %v2919_v33, %v2919_v33  ;;  %v3047_v38 = vsel %vm2535_vm14, %v1994_v14, %v2791_v29  ;;  %vm2540_vm1 = vcmp.gt.f32.partialorder %v5501_v31, 0.0  ;;  %v2796_v39 = vmul.f32 0.2, %v5501_v31  ;;  %v5502_v41 = vpop.f32.mrb[38].mxu1 }
 0x12f   :  { %4330 = vst.msk [vmem:[%s7293_s2 + $0x28c] sm:$0xf] %vm4166_vm3, %v5105_v32  ;;  %v5103_v42 = vpack.c.bf16 %v3047_v38, %v3047_v38  ;;  %v2924_v43 = vsel %vm2412_vm15, %v5373_v30, %v2668_v34  ;;  %vm2410_vm2 = vcmp.gt.f32.partialorder %v1495_v35, 0.0  ;;  %v2666_v44 = vmul.f32 0.2, %v1495_v35  ;;  %v1498_v45 = vpop.f32.mrb[39].mxu0 }
 0x130   :  { %v2010_v46 = vpop.f32.mrb[39].mxu1  ;;  %4200 = vst.msk [vmem:[%s7293_s2 + $0x84] sm:$0xf] %vm4166_vm3, %v4975_v37  ;;  %v4980_v47 = vpack.c.bf16 %v2924_v43, %v2924_v43  ;;  %v3052_v48 = vsel %vm2540_vm1, %v5501_v31, %v2796_v39  ;;  %vm2538_vm4 = vcmp.gt.f32.partialorder %v2007_v36, 0.0  ;;  %v2794_v49 = vmul.f32 0.2, %v2007_v36 }
 0x131   :  { %4328 = vst.msk [vmem:[%s7293_s2 + $0x284] sm:$0xf] %vm4166_vm3, %v5103_v42  ;;  %v5108_v50 = vpack.c.bf16 %v3052_v48, %v3052_v48  ;;  %v2922_v51 = vsel %vm2410_vm2, %v1495_v35, %v2666_v44  ;;  %vm2413_vm5 = vcmp.gt.f32.partialorder %v5374_v40, 0.0  ;;  %v2669_v52 = vmul.f32 0.2, %v5374_v40  ;;  %v5377_v62 = vpop.f32.mrb[40].mxu0 }
 0x132   :  { %4205 = vst.msk [vmem:[%s7293_s2 + $0x98] sm:$0xf] %vm4166_vm3, %v4980_v47  ;;  %v4978_v53 = vpack.c.bf16 %v2922_v51, %v2922_v51  ;;  %v3050_v54 = vsel %vm2538_vm4, %v2007_v36, %v2794_v49  ;;  %vm2541_vm6 = vcmp.gt.f32.partialorder %v5502_v41, 0.0  ;;  %v2797_v55 = vmul.f32 0.2, %v5502_v41  ;;  %v5505_v63 = vpop.f32.mrb[40].mxu1 }
 0x133   :  { %4333 = vst.msk [vmem:[%s7293_s2 + $0x298] sm:$0xf] %vm4166_vm3, %v5108_v50  ;;  %v5106_v56 = vpack.c.bf16 %v3050_v54, %v3050_v54  ;;  %v2925_v57 = vsel %vm2413_vm5, %v5374_v40, %v2669_v52  ;;  %vm2411_vm7 = vcmp.gt.f32.partialorder %v1498_v45, 0.0  ;;  %v2667_v58 = vmul.f32 0.2, %v1498_v45  ;;  %v1511_v3 = vpop.f32.mrb[41].mxu0 }
 0x134   :  { %4203 = vst.msk [vmem:[%s7293_s2 + $0x90] sm:$0xf] %vm4166_vm3, %v4978_v53  ;;  %v4981_v59 = vpack.c.bf16 %v2925_v57, %v2925_v57  ;;  %v3053_v60 = vsel %vm2541_vm6, %v5502_v41, %v2797_v55  ;;  %vm2539_vm8 = vcmp.gt.f32.partialorder %v2010_v46, 0.0  ;;  %v2795_v61 = vmul.f32 0.2, %v2010_v46  ;;  %v2023_v4 = vpop.f32.mrb[41].mxu1 }
 0x135   :  { %4331 = vst.msk [vmem:[%s7293_s2 + $0x290] sm:$0xf] %vm4166_vm3, %v5106_v56  ;;  %v5109_v0 = vpack.c.bf16 %v3053_v60, %v3053_v60  ;;  %v2923_v1 = vsel %vm2411_vm7, %v1498_v45, %v2667_v58  ;;  %vm2416_vm9 = vcmp.gt.f32.partialorder %v5377_v62, 0.0  ;;  %v2672_v2 = vmul.f32 0.2, %v5377_v62  ;;  %v5378_v8 = vpop.f32.mrb[42].mxu0 }
 0x136   :  { %4206 = vst.msk [vmem:[%s7293_s2 + $0x9c] sm:$0xf] %vm4166_vm3, %v4981_v59  ;;  %v4979_v5 = vpack.c.bf16 %v2923_v1, %v2923_v1  ;;  %v3051_v6 = vsel %vm2539_vm8, %v2010_v46, %v2795_v61  ;;  %vm2544_vm10 = vcmp.gt.f32.partialorder %v5505_v63, 0.0  ;;  %v2800_v7 = vmul.f32 0.2, %v5505_v63  ;;  %v5506_v9 = vpop.f32.mrb[42].mxu1 }
 0x137   :  { %4334 = vst.msk [vmem:[%s7293_s2 + $0x29c] sm:$0xf] %vm4166_vm3, %v5109_v0  ;;  %v5107_v10 = vpack.c.bf16 %v3051_v6, %v3051_v6  ;;  %v2928_v11 = vsel %vm2416_vm9, %v5377_v62, %v2672_v2  ;;  %vm2414_vm11 = vcmp.gt.f32.partialorder %v1511_v3, 0.0  ;;  %v2670_v12 = vmul.f32 0.2, %v1511_v3  ;;  %v1514_v13 = vpop.f32.mrb[43].mxu0 }
 0x138   :  { %v2026_v14 = vpop.f32.mrb[43].mxu1  ;;  %4204 = vst.msk [vmem:[%s7293_s2 + $0x94] sm:$0xf] %vm4166_vm3, %v4979_v5  ;;  %v4984_v15 = vpack.c.bf16 %v2928_v11, %v2928_v11  ;;  %v3056_v16 = vsel %vm2544_vm10, %v5505_v63, %v2800_v7  ;;  %vm2542_vm12 = vcmp.gt.f32.partialorder %v2023_v4, 0.0  ;;  %v2798_v17 = vmul.f32 0.2, %v2023_v4 }
 0x139   :  { %4332 = vst.msk [vmem:[%s7293_s2 + $0x294] sm:$0xf] %vm4166_vm3, %v5107_v10  ;;  %v5112_v18 = vpack.c.bf16 %v3056_v16, %v3056_v16  ;;  %v2926_v19 = vsel %vm2414_vm11, %v1511_v3, %v2670_v12  ;;  %vm2417_vm0 = vcmp.gt.f32.partialorder %v5378_v8, 0.0  ;;  %v2673_v20 = vmul.f32 0.2, %v5378_v8  ;;  %v5381_v30 = vpop.f32.mrb[44].mxu0 }
 0x13a   :  { %4209 = vst.msk [vmem:[%s7293_s2 + $0xa8] sm:$0xf] %vm4166_vm3, %v4984_v15  ;;  %v4982_v21 = vpack.c.bf16 %v2926_v19, %v2926_v19  ;;  %v3054_v22 = vsel %vm2542_vm12, %v2023_v4, %v2798_v17  ;;  %vm2545_vm13 = vcmp.gt.f32.partialorder %v5506_v9, 0.0  ;;  %v2801_v23 = vmul.f32 0.2, %v5506_v9  ;;  %v5509_v31 = vpop.f32.mrb[44].mxu1 }
 0x13b   :  { %4337 = vst.msk [vmem:[%s7293_s2 + $0x2a8] sm:$0xf] %vm4166_vm3, %v5112_v18  ;;  %v5110_v24 = vpack.c.bf16 %v3054_v22, %v3054_v22  ;;  %v2929_v25 = vsel %vm2417_vm0, %v5378_v8, %v2673_v20  ;;  %vm2415_vm14 = vcmp.gt.f32.partialorder %v1514_v13, 0.0  ;;  %v2671_v26 = vmul.f32 0.2, %v1514_v13  ;;  %v1527_v35 = vpop.f32.mrb[45].mxu0 }
 0x13c   :  { %4207 = vst.msk [vmem:[%s7293_s2 + $0xa0] sm:$0xf] %vm4166_vm3, %v4982_v21  ;;  %v4985_v27 = vpack.c.bf16 %v2929_v25, %v2929_v25  ;;  %v3057_v28 = vsel %vm2545_vm13, %v5506_v9, %v2801_v23  ;;  %vm2543_vm15 = vcmp.gt.f32.partialorder %v2026_v14, 0.0  ;;  %v2799_v29 = vmul.f32 0.2, %v2026_v14  ;;  %v2039_v36 = vpop.f32.mrb[45].mxu1 }
 0x13d   :  { %4335 = vst.msk [vmem:[%s7293_s2 + $0x2a0] sm:$0xf] %vm4166_vm3, %v5110_v24  ;;  %v5113_v32 = vpack.c.bf16 %v3057_v28, %v3057_v28  ;;  %v2927_v33 = vsel %vm2415_vm14, %v1514_v13, %v2671_v26  ;;  %vm2420_vm1 = vcmp.gt.f32.partialorder %v5381_v30, 0.0  ;;  %v2676_v34 = vmul.f32 0.2, %v5381_v30  ;;  %v5382_v40 = vpop.f32.mrb[46].mxu0 }
 0x13e   :  { %4210 = vst.msk [vmem:[%s7293_s2 + $0xac] sm:$0xf] %vm4166_vm3, %v4985_v27  ;;  %v4983_v37 = vpack.c.bf16 %v2927_v33, %v2927_v33  ;;  %v3055_v38 = vsel %vm2543_vm15, %v2026_v14, %v2799_v29  ;;  %vm2548_vm2 = vcmp.gt.f32.partialorder %v5509_v31, 0.0  ;;  %v2804_v39 = vmul.f32 0.2, %v5509_v31  ;;  %v5510_v41 = vpop.f32.mrb[46].mxu1 }
 0x13f   :  { %4338 = vst.msk [vmem:[%s7293_s2 + $0x2ac] sm:$0xf] %vm4166_vm3, %v5113_v32  ;;  %v5111_v42 = vpack.c.bf16 %v3055_v38, %v3055_v38  ;;  %v2932_v43 = vsel %vm2420_vm1, %v5381_v30, %v2676_v34  ;;  %vm2418_vm4 = vcmp.gt.f32.partialorder %v1527_v35, 0.0  ;;  %v2674_v44 = vmul.f32 0.2, %v1527_v35  ;;  %v1530_v45 = vpop.f32.mrb[47].mxu0 }
 0x140   :  { %v2042_v46 = vpop.f32.mrb[47].mxu1  ;;  %4208 = vst.msk [vmem:[%s7293_s2 + $0xa4] sm:$0xf] %vm4166_vm3, %v4983_v37  ;;  %v4988_v47 = vpack.c.bf16 %v2932_v43, %v2932_v43  ;;  %v3060_v48 = vsel %vm2548_vm2, %v5509_v31, %v2804_v39  ;;  %vm2546_vm5 = vcmp.gt.f32.partialorder %v2039_v36, 0.0  ;;  %v2802_v49 = vmul.f32 0.2, %v2039_v36 }
 0x141   :  { %4336 = vst.msk [vmem:[%s7293_s2 + $0x2a4] sm:$0xf] %vm4166_vm3, %v5111_v42  ;;  %v5116_v50 = vpack.c.bf16 %v3060_v48, %v3060_v48  ;;  %v2930_v51 = vsel %vm2418_vm4, %v1527_v35, %v2674_v44  ;;  %vm2421_vm6 = vcmp.gt.f32.partialorder %v5382_v40, 0.0  ;;  %v2677_v52 = vmul.f32 0.2, %v5382_v40  ;;  %v5385_v62 = vpop.f32.mrb[48].mxu0 }
 0x142   :  { %4213 = vst.msk [vmem:[%s7293_s2 + $0xb8] sm:$0xf] %vm4166_vm3, %v4988_v47  ;;  %v4986_v53 = vpack.c.bf16 %v2930_v51, %v2930_v51  ;;  %v3058_v54 = vsel %vm2546_vm5, %v2039_v36, %v2802_v49  ;;  %vm2549_vm7 = vcmp.gt.f32.partialorder %v5510_v41, 0.0  ;;  %v2805_v55 = vmul.f32 0.2, %v5510_v41  ;;  %v5513_v63 = vpop.f32.mrb[48].mxu1 }
 0x143   :  { %4341 = vst.msk [vmem:[%s7293_s2 + $0x2b8] sm:$0xf] %vm4166_vm3, %v5116_v50  ;;  %v5114_v56 = vpack.c.bf16 %v3058_v54, %v3058_v54  ;;  %v2933_v57 = vsel %vm2421_vm6, %v5382_v40, %v2677_v52  ;;  %vm2419_vm8 = vcmp.gt.f32.partialorder %v1530_v45, 0.0  ;;  %v2675_v58 = vmul.f32 0.2, %v1530_v45  ;;  %v1543_v3 = vpop.f32.mrb[49].mxu0 }
 0x144   :  { %4211 = vst.msk [vmem:[%s7293_s2 + $0xb0] sm:$0xf] %vm4166_vm3, %v4986_v53  ;;  %v4989_v59 = vpack.c.bf16 %v2933_v57, %v2933_v57  ;;  %v3061_v60 = vsel %vm2549_vm7, %v5510_v41, %v2805_v55  ;;  %vm2547_vm9 = vcmp.gt.f32.partialorder %v2042_v46, 0.0  ;;  %v2803_v61 = vmul.f32 0.2, %v2042_v46  ;;  %v2055_v4 = vpop.f32.mrb[49].mxu1 }
 0x145   :  { %4339 = vst.msk [vmem:[%s7293_s2 + $0x2b0] sm:$0xf] %vm4166_vm3, %v5114_v56  ;;  %v5117_v0 = vpack.c.bf16 %v3061_v60, %v3061_v60  ;;  %v2931_v1 = vsel %vm2419_vm8, %v1530_v45, %v2675_v58  ;;  %vm2424_vm10 = vcmp.gt.f32.partialorder %v5385_v62, 0.0  ;;  %v2680_v2 = vmul.f32 0.2, %v5385_v62  ;;  %v5386_v8 = vpop.f32.mrb[50].mxu0 }
 0x146   :  { %4214 = vst.msk [vmem:[%s7293_s2 + $0xbc] sm:$0xf] %vm4166_vm3, %v4989_v59  ;;  %v4987_v5 = vpack.c.bf16 %v2931_v1, %v2931_v1  ;;  %v3059_v6 = vsel %vm2547_vm9, %v2042_v46, %v2803_v61  ;;  %vm2552_vm11 = vcmp.gt.f32.partialorder %v5513_v63, 0.0  ;;  %v2808_v7 = vmul.f32 0.2, %v5513_v63  ;;  %v5514_v9 = vpop.f32.mrb[50].mxu1 }
 0x147   :  { %4342 = vst.msk [vmem:[%s7293_s2 + $0x2bc] sm:$0xf] %vm4166_vm3, %v5117_v0  ;;  %v5115_v10 = vpack.c.bf16 %v3059_v6, %v3059_v6  ;;  %v2936_v11 = vsel %vm2424_vm10, %v5385_v62, %v2680_v2  ;;  %vm2422_vm12 = vcmp.gt.f32.partialorder %v1543_v3, 0.0  ;;  %v2678_v12 = vmul.f32 0.2, %v1543_v3  ;;  %v1546_v13 = vpop.f32.mrb[51].mxu0 }
 0x148   :  { %v2058_v14 = vpop.f32.mrb[51].mxu1  ;;  %4212 = vst.msk [vmem:[%s7293_s2 + $0xb4] sm:$0xf] %vm4166_vm3, %v4987_v5  ;;  %v4992_v15 = vpack.c.bf16 %v2936_v11, %v2936_v11  ;;  %v3064_v16 = vsel %vm2552_vm11, %v5513_v63, %v2808_v7  ;;  %vm2550_vm0 = vcmp.gt.f32.partialorder %v2055_v4, 0.0  ;;  %v2806_v17 = vmul.f32 0.2, %v2055_v4 }
 0x149   :  { %4340 = vst.msk [vmem:[%s7293_s2 + $0x2b4] sm:$0xf] %vm4166_vm3, %v5115_v10  ;;  %v5120_v18 = vpack.c.bf16 %v3064_v16, %v3064_v16  ;;  %v2934_v19 = vsel %vm2422_vm12, %v1543_v3, %v2678_v12  ;;  %vm2425_vm13 = vcmp.gt.f32.partialorder %v5386_v8, 0.0  ;;  %v2681_v20 = vmul.f32 0.2, %v5386_v8  ;;  %v5389_v30 = vpop.f32.mrb[52].mxu0 }
 0x14a   :  { %4217 = vst.msk [vmem:[%s7293_s2 + $0xc8] sm:$0xf] %vm4166_vm3, %v4992_v15  ;;  %v4990_v21 = vpack.c.bf16 %v2934_v19, %v2934_v19  ;;  %v3062_v22 = vsel %vm2550_vm0, %v2055_v4, %v2806_v17  ;;  %vm2553_vm14 = vcmp.gt.f32.partialorder %v5514_v9, 0.0  ;;  %v2809_v23 = vmul.f32 0.2, %v5514_v9  ;;  %v5517_v31 = vpop.f32.mrb[52].mxu1 }
 0x14b   :  { %4345 = vst.msk [vmem:[%s7293_s2 + $0x2c8] sm:$0xf] %vm4166_vm3, %v5120_v18  ;;  %v5118_v24 = vpack.c.bf16 %v3062_v22, %v3062_v22  ;;  %v2937_v25 = vsel %vm2425_vm13, %v5386_v8, %v2681_v20  ;;  %vm2423_vm15 = vcmp.gt.f32.partialorder %v1546_v13, 0.0  ;;  %v2679_v26 = vmul.f32 0.2, %v1546_v13  ;;  %v1559_v35 = vpop.f32.mrb[53].mxu0 }
 0x14c   :  { %4215 = vst.msk [vmem:[%s7293_s2 + $0xc0] sm:$0xf] %vm4166_vm3, %v4990_v21  ;;  %v4993_v27 = vpack.c.bf16 %v2937_v25, %v2937_v25  ;;  %v3065_v28 = vsel %vm2553_vm14, %v5514_v9, %v2809_v23  ;;  %vm2551_vm1 = vcmp.gt.f32.partialorder %v2058_v14, 0.0  ;;  %v2807_v29 = vmul.f32 0.2, %v2058_v14  ;;  %v2071_v36 = vpop.f32.mrb[53].mxu1 }
 0x14d   :  { %4343 = vst.msk [vmem:[%s7293_s2 + $0x2c0] sm:$0xf] %vm4166_vm3, %v5118_v24  ;;  %v5121_v32 = vpack.c.bf16 %v3065_v28, %v3065_v28  ;;  %v2935_v33 = vsel %vm2423_vm15, %v1546_v13, %v2679_v26  ;;  %vm2428_vm2 = vcmp.gt.f32.partialorder %v5389_v30, 0.0  ;;  %v2684_v34 = vmul.f32 0.2, %v5389_v30  ;;  %v5390_v40 = vpop.f32.mrb[54].mxu0 }
 0x14e   :  { %4218 = vst.msk [vmem:[%s7293_s2 + $0xcc] sm:$0xf] %vm4166_vm3, %v4993_v27  ;;  %v4991_v37 = vpack.c.bf16 %v2935_v33, %v2935_v33  ;;  %v3063_v38 = vsel %vm2551_vm1, %v2058_v14, %v2807_v29  ;;  %vm2556_vm4 = vcmp.gt.f32.partialorder %v5517_v31, 0.0  ;;  %v2812_v39 = vmul.f32 0.2, %v5517_v31  ;;  %v5518_v41 = vpop.f32.mrb[54].mxu1 }
 0x14f   :  { %4346 = vst.msk [vmem:[%s7293_s2 + $0x2cc] sm:$0xf] %vm4166_vm3, %v5121_v32  ;;  %v5119_v42 = vpack.c.bf16 %v3063_v38, %v3063_v38  ;;  %v2940_v43 = vsel %vm2428_vm2, %v5389_v30, %v2684_v34  ;;  %vm2426_vm5 = vcmp.gt.f32.partialorder %v1559_v35, 0.0  ;;  %v2682_v44 = vmul.f32 0.2, %v1559_v35  ;;  %v1562_v45 = vpop.f32.mrb[55].mxu0 }
 0x150   :  { %v2074_v46 = vpop.f32.mrb[55].mxu1  ;;  %4216 = vst.msk [vmem:[%s7293_s2 + $0xc4] sm:$0xf] %vm4166_vm3, %v4991_v37  ;;  %v4996_v47 = vpack.c.bf16 %v2940_v43, %v2940_v43  ;;  %v3068_v48 = vsel %vm2556_vm4, %v5517_v31, %v2812_v39  ;;  %vm2554_vm6 = vcmp.gt.f32.partialorder %v2071_v36, 0.0  ;;  %v2810_v49 = vmul.f32 0.2, %v2071_v36 }
 0x151   :  { %4344 = vst.msk [vmem:[%s7293_s2 + $0x2c4] sm:$0xf] %vm4166_vm3, %v5119_v42  ;;  %v5124_v50 = vpack.c.bf16 %v3068_v48, %v3068_v48  ;;  %v2938_v51 = vsel %vm2426_vm5, %v1559_v35, %v2682_v44  ;;  %vm2429_vm7 = vcmp.gt.f32.partialorder %v5390_v40, 0.0  ;;  %v2685_v52 = vmul.f32 0.2, %v5390_v40  ;;  %v5393_v62 = vpop.f32.mrb[56].mxu0 }
 0x152   :  { %4221 = vst.msk [vmem:[%s7293_s2 + $0xd8] sm:$0xf] %vm4166_vm3, %v4996_v47  ;;  %v4994_v53 = vpack.c.bf16 %v2938_v51, %v2938_v51  ;;  %v3066_v54 = vsel %vm2554_vm6, %v2071_v36, %v2810_v49  ;;  %vm2557_vm8 = vcmp.gt.f32.partialorder %v5518_v41, 0.0  ;;  %v2813_v55 = vmul.f32 0.2, %v5518_v41  ;;  %v5521_v63 = vpop.f32.mrb[56].mxu1 }
 0x153   :  { %4349 = vst.msk [vmem:[%s7293_s2 + $0x2d8] sm:$0xf] %vm4166_vm3, %v5124_v50  ;;  %v5122_v56 = vpack.c.bf16 %v3066_v54, %v3066_v54  ;;  %v2941_v57 = vsel %vm2429_vm7, %v5390_v40, %v2685_v52  ;;  %vm2427_vm9 = vcmp.gt.f32.partialorder %v1562_v45, 0.0  ;;  %v2683_v58 = vmul.f32 0.2, %v1562_v45  ;;  %v1575_v3 = vpop.f32.mrb[57].mxu0 }
 0x154   :  { %4219 = vst.msk [vmem:[%s7293_s2 + $0xd0] sm:$0xf] %vm4166_vm3, %v4994_v53  ;;  %v4997_v59 = vpack.c.bf16 %v2941_v57, %v2941_v57  ;;  %v3069_v60 = vsel %vm2557_vm8, %v5518_v41, %v2813_v55  ;;  %vm2555_vm10 = vcmp.gt.f32.partialorder %v2074_v46, 0.0  ;;  %v2811_v61 = vmul.f32 0.2, %v2074_v46  ;;  %v2087_v4 = vpop.f32.mrb[57].mxu1 }
 0x155   :  { %4347 = vst.msk [vmem:[%s7293_s2 + $0x2d0] sm:$0xf] %vm4166_vm3, %v5122_v56  ;;  %v5125_v0 = vpack.c.bf16 %v3069_v60, %v3069_v60  ;;  %v2939_v1 = vsel %vm2427_vm9, %v1562_v45, %v2683_v58  ;;  %vm2432_vm11 = vcmp.gt.f32.partialorder %v5393_v62, 0.0  ;;  %v2688_v2 = vmul.f32 0.2, %v5393_v62  ;;  %v5394_v8 = vpop.f32.mrb[58].mxu0 }
 0x156   :  { %4222 = vst.msk [vmem:[%s7293_s2 + $0xdc] sm:$0xf] %vm4166_vm3, %v4997_v59  ;;  %v4995_v5 = vpack.c.bf16 %v2939_v1, %v2939_v1  ;;  %v3067_v6 = vsel %vm2555_vm10, %v2074_v46, %v2811_v61  ;;  %vm2560_vm12 = vcmp.gt.f32.partialorder %v5521_v63, 0.0  ;;  %v2816_v7 = vmul.f32 0.2, %v5521_v63  ;;  %v5522_v9 = vpop.f32.mrb[58].mxu1 }
 0x157   :  { %4350 = vst.msk [vmem:[%s7293_s2 + $0x2dc] sm:$0xf] %vm4166_vm3, %v5125_v0  ;;  %v5123_v10 = vpack.c.bf16 %v3067_v6, %v3067_v6  ;;  %v2944_v11 = vsel %vm2432_vm11, %v5393_v62, %v2688_v2  ;;  %vm2430_vm0 = vcmp.gt.f32.partialorder %v1575_v3, 0.0  ;;  %v2686_v12 = vmul.f32 0.2, %v1575_v3  ;;  %v1578_v13 = vpop.f32.mrb[59].mxu0 }
 0x158   :  { %v2090_v14 = vpop.f32.mrb[59].mxu1  ;;  %4220 = vst.msk [vmem:[%s7293_s2 + $0xd4] sm:$0xf] %vm4166_vm3, %v4995_v5  ;;  %v5000_v15 = vpack.c.bf16 %v2944_v11, %v2944_v11  ;;  %v3072_v16 = vsel %vm2560_vm12, %v5521_v63, %v2816_v7  ;;  %vm2558_vm13 = vcmp.gt.f32.partialorder %v2087_v4, 0.0  ;;  %v2814_v17 = vmul.f32 0.2, %v2087_v4 }
 0x159   :  { %4348 = vst.msk [vmem:[%s7293_s2 + $0x2d4] sm:$0xf] %vm4166_vm3, %v5123_v10  ;;  %v5128_v18 = vpack.c.bf16 %v3072_v16, %v3072_v16  ;;  %v2942_v19 = vsel %vm2430_vm0, %v1575_v3, %v2686_v12  ;;  %vm2433_vm14 = vcmp.gt.f32.partialorder %v5394_v8, 0.0  ;;  %v2689_v20 = vmul.f32 0.2, %v5394_v8  ;;  %v5397_v30 = vpop.f32.mrb[60].mxu0 }
 0x15a   :  { %4225 = vst.msk [vmem:[%s7293_s2 + $0xe8] sm:$0xf] %vm4166_vm3, %v5000_v15  ;;  %v4998_v21 = vpack.c.bf16 %v2942_v19, %v2942_v19  ;;  %v3070_v22 = vsel %vm2558_vm13, %v2087_v4, %v2814_v17  ;;  %vm2561_vm15 = vcmp.gt.f32.partialorder %v5522_v9, 0.0  ;;  %v2817_v23 = vmul.f32 0.2, %v5522_v9  ;;  %v5525_v31 = vpop.f32.mrb[60].mxu1 }
 0x15b   :  { %4353 = vst.msk [vmem:[%s7293_s2 + $0x2e8] sm:$0xf] %vm4166_vm3, %v5128_v18  ;;  %v5126_v24 = vpack.c.bf16 %v3070_v22, %v3070_v22  ;;  %v2945_v25 = vsel %vm2433_vm14, %v5394_v8, %v2689_v20  ;;  %vm2431_vm1 = vcmp.gt.f32.partialorder %v1578_v13, 0.0  ;;  %v2687_v26 = vmul.f32 0.2, %v1578_v13  ;;  %v1591_v35 = vpop.f32.mrb[61].mxu0 }
 0x15c   :  { %4223 = vst.msk [vmem:[%s7293_s2 + $0xe0] sm:$0xf] %vm4166_vm3, %v4998_v21  ;;  %v5001_v27 = vpack.c.bf16 %v2945_v25, %v2945_v25  ;;  %v3073_v28 = vsel %vm2561_vm15, %v5522_v9, %v2817_v23  ;;  %vm2559_vm2 = vcmp.gt.f32.partialorder %v2090_v14, 0.0  ;;  %v2815_v29 = vmul.f32 0.2, %v2090_v14  ;;  %v2103_v36 = vpop.f32.mrb[61].mxu1 }
 0x15d   :  { %4351 = vst.msk [vmem:[%s7293_s2 + $0x2e0] sm:$0xf] %vm4166_vm3, %v5126_v24  ;;  %v5129_v32 = vpack.c.bf16 %v3073_v28, %v3073_v28  ;;  %v2943_v33 = vsel %vm2431_vm1, %v1578_v13, %v2687_v26  ;;  %vm2436_vm4 = vcmp.gt.f32.partialorder %v5397_v30, 0.0  ;;  %v2692_v34 = vmul.f32 0.2, %v5397_v30  ;;  %v5398_v40 = vpop.f32.mrb[62].mxu0 }
 0x15e   :  { %4226 = vst.msk [vmem:[%s7293_s2 + $0xec] sm:$0xf] %vm4166_vm3, %v5001_v27  ;;  %v4999_v37 = vpack.c.bf16 %v2943_v33, %v2943_v33  ;;  %v3071_v38 = vsel %vm2559_vm2, %v2090_v14, %v2815_v29  ;;  %vm2564_vm5 = vcmp.gt.f32.partialorder %v5525_v31, 0.0  ;;  %v2820_v39 = vmul.f32 0.2, %v5525_v31  ;;  %v5526_v41 = vpop.f32.mrb[62].mxu1 }
 0x15f   :  { %4354 = vst.msk [vmem:[%s7293_s2 + $0x2ec] sm:$0xf] %vm4166_vm3, %v5129_v32  ;;  %v5127_v42 = vpack.c.bf16 %v3071_v38, %v3071_v38  ;;  %v2948_v43 = vsel %vm2436_vm4, %v5397_v30, %v2692_v34  ;;  %vm2434_vm6 = vcmp.gt.f32.partialorder %v1591_v35, 0.0  ;;  %v2690_v44 = vmul.f32 0.2, %v1591_v35  ;;  %v1594_v45 = vpop.f32.mrb[63].mxu0 }
 0x160   :  { %v2106_v46 = vpop.f32.mrb[63].mxu1  ;;  %4224 = vst.msk [vmem:[%s7293_s2 + $0xe4] sm:$0xf] %vm4166_vm3, %v4999_v37  ;;  %v5004_v47 = vpack.c.bf16 %v2948_v43, %v2948_v43  ;;  %v3076_v48 = vsel %vm2564_vm5, %v5525_v31, %v2820_v39  ;;  %vm2562_vm7 = vcmp.gt.f32.partialorder %v2103_v36, 0.0  ;;  %v2818_v49 = vmul.f32 0.2, %v2103_v36 }
 0x161   :  { %4352 = vst.msk [vmem:[%s7293_s2 + $0x2e4] sm:$0xf] %vm4166_vm3, %v5127_v42  ;;  %v5132_v50 = vpack.c.bf16 %v3076_v48, %v3076_v48  ;;  %v2946_v51 = vsel %vm2434_vm6, %v1591_v35, %v2690_v44  ;;  %vm2437_vm8 = vcmp.gt.f32.partialorder %v5398_v40, 0.0  ;;  %v2693_v52 = vmul.f32 0.2, %v5398_v40  ;;  %v5401_v62 = vpop.f32.mrb[64].mxu0 }
 0x162   :  { %4229 = vst.msk [vmem:[%s7293_s2 + $0xf8] sm:$0xf] %vm4166_vm3, %v5004_v47  ;;  %v5002_v53 = vpack.c.bf16 %v2946_v51, %v2946_v51  ;;  %v3074_v54 = vsel %vm2562_vm7, %v2103_v36, %v2818_v49  ;;  %vm2565_vm9 = vcmp.gt.f32.partialorder %v5526_v41, 0.0  ;;  %v2821_v55 = vmul.f32 0.2, %v5526_v41  ;;  %v5529_v63 = vpop.f32.mrb[64].mxu1 }
 0x163   :  { %4357 = vst.msk [vmem:[%s7293_s2 + $0x2f8] sm:$0xf] %vm4166_vm3, %v5132_v50  ;;  %v5130_v56 = vpack.c.bf16 %v3074_v54, %v3074_v54  ;;  %v2949_v57 = vsel %vm2437_vm8, %v5398_v40, %v2693_v52  ;;  %vm2435_vm10 = vcmp.gt.f32.partialorder %v1594_v45, 0.0  ;;  %v2691_v58 = vmul.f32 0.2, %v1594_v45  ;;  %v1607_v3 = vpop.f32.mrb[65].mxu0 }
 0x164   :  { %4227 = vst.msk [vmem:[%s7293_s2 + $0xf0] sm:$0xf] %vm4166_vm3, %v5002_v53  ;;  %v5005_v59 = vpack.c.bf16 %v2949_v57, %v2949_v57  ;;  %v3077_v60 = vsel %vm2565_vm9, %v5526_v41, %v2821_v55  ;;  %vm2563_vm11 = vcmp.gt.f32.partialorder %v2106_v46, 0.0  ;;  %v2819_v61 = vmul.f32 0.2, %v2106_v46  ;;  %v2119_v4 = vpop.f32.mrb[65].mxu1 }
 0x165   :  { %4355 = vst.msk [vmem:[%s7293_s2 + $0x2f0] sm:$0xf] %vm4166_vm3, %v5130_v56  ;;  %v5133_v0 = vpack.c.bf16 %v3077_v60, %v3077_v60  ;;  %v2947_v1 = vsel %vm2435_vm10, %v1594_v45, %v2691_v58  ;;  %vm2440_vm12 = vcmp.gt.f32.partialorder %v5401_v62, 0.0  ;;  %v2696_v2 = vmul.f32 0.2, %v5401_v62  ;;  %v5402_v8 = vpop.f32.mrb[66].mxu0 }
 0x166   :  { %4230 = vst.msk [vmem:[%s7293_s2 + $0xfc] sm:$0xf] %vm4166_vm3, %v5005_v59  ;;  %v5003_v5 = vpack.c.bf16 %v2947_v1, %v2947_v1  ;;  %v3075_v6 = vsel %vm2563_vm11, %v2106_v46, %v2819_v61  ;;  %vm2568_vm0 = vcmp.gt.f32.partialorder %v5529_v63, 0.0  ;;  %v2824_v7 = vmul.f32 0.2, %v5529_v63  ;;  %v5530_v9 = vpop.f32.mrb[66].mxu1 }
 0x167   :  { %4358 = vst.msk [vmem:[%s7293_s2 + $0x2fc] sm:$0xf] %vm4166_vm3, %v5133_v0  ;;  %v5131_v10 = vpack.c.bf16 %v3075_v6, %v3075_v6  ;;  %v2952_v11 = vsel %vm2440_vm12, %v5401_v62, %v2696_v2  ;;  %vm2438_vm13 = vcmp.gt.f32.partialorder %v1607_v3, 0.0  ;;  %v2694_v12 = vmul.f32 0.2, %v1607_v3  ;;  %v1610_v13 = vpop.f32.mrb[67].mxu0 }
 0x168   :  { %v2122_v14 = vpop.f32.mrb[67].mxu1  ;;  %4228 = vst.msk [vmem:[%s7293_s2 + $0xf4] sm:$0xf] %vm4166_vm3, %v5003_v5  ;;  %v5008_v15 = vpack.c.bf16 %v2952_v11, %v2952_v11  ;;  %v3080_v16 = vsel %vm2568_vm0, %v5529_v63, %v2824_v7  ;;  %vm2566_vm14 = vcmp.gt.f32.partialorder %v2119_v4, 0.0  ;;  %v2822_v17 = vmul.f32 0.2, %v2119_v4 }
 0x169   :  { %4356 = vst.msk [vmem:[%s7293_s2 + $0x2f4] sm:$0xf] %vm4166_vm3, %v5131_v10  ;;  %v5136_v18 = vpack.c.bf16 %v3080_v16, %v3080_v16  ;;  %v2950_v19 = vsel %vm2438_vm13, %v1607_v3, %v2694_v12  ;;  %vm2441_vm15 = vcmp.gt.f32.partialorder %v5402_v8, 0.0  ;;  %v2697_v20 = vmul.f32 0.2, %v5402_v8  ;;  %v5405_v30 = vpop.f32.mrb[68].mxu0 }
 0x16a   :  { %4233 = vst.msk [vmem:[%s7293_s2 + $0x108] sm:$0xf] %vm4166_vm3, %v5008_v15  ;;  %v5006_v21 = vpack.c.bf16 %v2950_v19, %v2950_v19  ;;  %v3078_v22 = vsel %vm2566_vm14, %v2119_v4, %v2822_v17  ;;  %vm2569_vm1 = vcmp.gt.f32.partialorder %v5530_v9, 0.0  ;;  %v2825_v23 = vmul.f32 0.2, %v5530_v9  ;;  %v5533_v31 = vpop.f32.mrb[68].mxu1 }
 0x16b   :  { %4361 = vst.msk [vmem:[%s7293_s2 + $0x308] sm:$0xf] %vm4166_vm3, %v5136_v18  ;;  %v5134_v24 = vpack.c.bf16 %v3078_v22, %v3078_v22  ;;  %v2953_v25 = vsel %vm2441_vm15, %v5402_v8, %v2697_v20  ;;  %vm2439_vm2 = vcmp.gt.f32.partialorder %v1610_v13, 0.0  ;;  %v2695_v26 = vmul.f32 0.2, %v1610_v13  ;;  %v1623_v35 = vpop.f32.mrb[69].mxu0 }
 0x16c   :  { %4231 = vst.msk [vmem:[%s7293_s2 + $0x100] sm:$0xf] %vm4166_vm3, %v5006_v21  ;;  %v5009_v27 = vpack.c.bf16 %v2953_v25, %v2953_v25  ;;  %v3081_v28 = vsel %vm2569_vm1, %v5530_v9, %v2825_v23  ;;  %vm2567_vm4 = vcmp.gt.f32.partialorder %v2122_v14, 0.0  ;;  %v2823_v29 = vmul.f32 0.2, %v2122_v14  ;;  %v2135_v36 = vpop.f32.mrb[69].mxu1 }
 0x16d   :  { %4359 = vst.msk [vmem:[%s7293_s2 + $0x300] sm:$0xf] %vm4166_vm3, %v5134_v24  ;;  %v5137_v32 = vpack.c.bf16 %v3081_v28, %v3081_v28  ;;  %v2951_v33 = vsel %vm2439_vm2, %v1610_v13, %v2695_v26  ;;  %vm2444_vm5 = vcmp.gt.f32.partialorder %v5405_v30, 0.0  ;;  %v2700_v34 = vmul.f32 0.2, %v5405_v30  ;;  %v5406_v40 = vpop.f32.mrb[70].mxu0 }
 0x16e   :  { %4234 = vst.msk [vmem:[%s7293_s2 + $0x10c] sm:$0xf] %vm4166_vm3, %v5009_v27  ;;  %v5007_v37 = vpack.c.bf16 %v2951_v33, %v2951_v33  ;;  %v3079_v38 = vsel %vm2567_vm4, %v2122_v14, %v2823_v29  ;;  %vm2572_vm6 = vcmp.gt.f32.partialorder %v5533_v31, 0.0  ;;  %v2828_v39 = vmul.f32 0.2, %v5533_v31  ;;  %v5534_v41 = vpop.f32.mrb[70].mxu1 }
 0x16f   :  { %4362 = vst.msk [vmem:[%s7293_s2 + $0x30c] sm:$0xf] %vm4166_vm3, %v5137_v32  ;;  %v5135_v42 = vpack.c.bf16 %v3079_v38, %v3079_v38  ;;  %v2956_v43 = vsel %vm2444_vm5, %v5405_v30, %v2700_v34  ;;  %vm2442_vm7 = vcmp.gt.f32.partialorder %v1623_v35, 0.0  ;;  %v2698_v44 = vmul.f32 0.2, %v1623_v35  ;;  %v1626_v45 = vpop.f32.mrb[71].mxu0 }
 0x170   :  { %v2138_v46 = vpop.f32.mrb[71].mxu1  ;;  %4232 = vst.msk [vmem:[%s7293_s2 + $0x104] sm:$0xf] %vm4166_vm3, %v5007_v37  ;;  %v5012_v47 = vpack.c.bf16 %v2956_v43, %v2956_v43  ;;  %v3084_v48 = vsel %vm2572_vm6, %v5533_v31, %v2828_v39  ;;  %vm2570_vm8 = vcmp.gt.f32.partialorder %v2135_v36, 0.0  ;;  %v2826_v49 = vmul.f32 0.2, %v2135_v36 }
 0x171   :  { %4360 = vst.msk [vmem:[%s7293_s2 + $0x304] sm:$0xf] %vm4166_vm3, %v5135_v42  ;;  %v5140_v50 = vpack.c.bf16 %v3084_v48, %v3084_v48  ;;  %v2954_v51 = vsel %vm2442_vm7, %v1623_v35, %v2698_v44  ;;  %vm2445_vm9 = vcmp.gt.f32.partialorder %v5406_v40, 0.0  ;;  %v2701_v52 = vmul.f32 0.2, %v5406_v40  ;;  %v5409_v62 = vpop.f32.mrb[72].mxu0 }
 0x172   :  { %4237 = vst.msk [vmem:[%s7293_s2 + $0x118] sm:$0xf] %vm4166_vm3, %v5012_v47  ;;  %v5010_v53 = vpack.c.bf16 %v2954_v51, %v2954_v51  ;;  %v3082_v54 = vsel %vm2570_vm8, %v2135_v36, %v2826_v49  ;;  %vm2573_vm10 = vcmp.gt.f32.partialorder %v5534_v41, 0.0  ;;  %v2829_v55 = vmul.f32 0.2, %v5534_v41  ;;  %v5537_v63 = vpop.f32.mrb[72].mxu1 }
 0x173   :  { %4365 = vst.msk [vmem:[%s7293_s2 + $0x318] sm:$0xf] %vm4166_vm3, %v5140_v50  ;;  %v5138_v56 = vpack.c.bf16 %v3082_v54, %v3082_v54  ;;  %v2957_v57 = vsel %vm2445_vm9, %v5406_v40, %v2701_v52  ;;  %vm2443_vm11 = vcmp.gt.f32.partialorder %v1626_v45, 0.0  ;;  %v2699_v58 = vmul.f32 0.2, %v1626_v45  ;;  %v1639_v3 = vpop.f32.mrb[73].mxu0 }
 0x174   :  { %4235 = vst.msk [vmem:[%s7293_s2 + $0x110] sm:$0xf] %vm4166_vm3, %v5010_v53  ;;  %v5013_v59 = vpack.c.bf16 %v2957_v57, %v2957_v57  ;;  %v3085_v60 = vsel %vm2573_vm10, %v5534_v41, %v2829_v55  ;;  %vm2571_vm12 = vcmp.gt.f32.partialorder %v2138_v46, 0.0  ;;  %v2827_v61 = vmul.f32 0.2, %v2138_v46  ;;  %v2151_v4 = vpop.f32.mrb[73].mxu1 }
 0x175   :  { %4363 = vst.msk [vmem:[%s7293_s2 + $0x310] sm:$0xf] %vm4166_vm3, %v5138_v56  ;;  %v5141_v0 = vpack.c.bf16 %v3085_v60, %v3085_v60  ;;  %v2955_v1 = vsel %vm2443_vm11, %v1626_v45, %v2699_v58  ;;  %vm2448_vm0 = vcmp.gt.f32.partialorder %v5409_v62, 0.0  ;;  %v2704_v2 = vmul.f32 0.2, %v5409_v62  ;;  %v5410_v8 = vpop.f32.mrb[74].mxu0 }
 0x176   :  { %4238 = vst.msk [vmem:[%s7293_s2 + $0x11c] sm:$0xf] %vm4166_vm3, %v5013_v59  ;;  %v5011_v5 = vpack.c.bf16 %v2955_v1, %v2955_v1  ;;  %v3083_v6 = vsel %vm2571_vm12, %v2138_v46, %v2827_v61  ;;  %vm2576_vm13 = vcmp.gt.f32.partialorder %v5537_v63, 0.0  ;;  %v2832_v7 = vmul.f32 0.2, %v5537_v63  ;;  %v5538_v9 = vpop.f32.mrb[74].mxu1 }
 0x177   :  { %4366 = vst.msk [vmem:[%s7293_s2 + $0x31c] sm:$0xf] %vm4166_vm3, %v5141_v0  ;;  %v5139_v10 = vpack.c.bf16 %v3083_v6, %v3083_v6  ;;  %v2960_v11 = vsel %vm2448_vm0, %v5409_v62, %v2704_v2  ;;  %vm2446_vm14 = vcmp.gt.f32.partialorder %v1639_v3, 0.0  ;;  %v2702_v12 = vmul.f32 0.2, %v1639_v3  ;;  %v1642_v13 = vpop.f32.mrb[75].mxu0 }
 0x178   :  { %v2154_v14 = vpop.f32.mrb[75].mxu1  ;;  %4236 = vst.msk [vmem:[%s7293_s2 + $0x114] sm:$0xf] %vm4166_vm3, %v5011_v5  ;;  %v5016_v15 = vpack.c.bf16 %v2960_v11, %v2960_v11  ;;  %v3088_v16 = vsel %vm2576_vm13, %v5537_v63, %v2832_v7  ;;  %vm2574_vm15 = vcmp.gt.f32.partialorder %v2151_v4, 0.0  ;;  %v2830_v17 = vmul.f32 0.2, %v2151_v4 }
 0x179   :  { %4364 = vst.msk [vmem:[%s7293_s2 + $0x314] sm:$0xf] %vm4166_vm3, %v5139_v10  ;;  %v5144_v18 = vpack.c.bf16 %v3088_v16, %v3088_v16  ;;  %v2958_v19 = vsel %vm2446_vm14, %v1639_v3, %v2702_v12  ;;  %vm2449_vm1 = vcmp.gt.f32.partialorder %v5410_v8, 0.0  ;;  %v2705_v20 = vmul.f32 0.2, %v5410_v8  ;;  %v5413_v30 = vpop.f32.mrb[76].mxu0 }
 0x17a   :  { %4241 = vst.msk [vmem:[%s7293_s2 + $0x128] sm:$0xf] %vm4166_vm3, %v5016_v15  ;;  %v5014_v21 = vpack.c.bf16 %v2958_v19, %v2958_v19  ;;  %v3086_v22 = vsel %vm2574_vm15, %v2151_v4, %v2830_v17  ;;  %vm2577_vm2 = vcmp.gt.f32.partialorder %v5538_v9, 0.0  ;;  %v2833_v23 = vmul.f32 0.2, %v5538_v9  ;;  %v5541_v31 = vpop.f32.mrb[76].mxu1 }
 0x17b   :  { %4369 = vst.msk [vmem:[%s7293_s2 + $0x328] sm:$0xf] %vm4166_vm3, %v5144_v18  ;;  %v5142_v24 = vpack.c.bf16 %v3086_v22, %v3086_v22  ;;  %v2961_v25 = vsel %vm2449_vm1, %v5410_v8, %v2705_v20  ;;  %vm2447_vm4 = vcmp.gt.f32.partialorder %v1642_v13, 0.0  ;;  %v2703_v26 = vmul.f32 0.2, %v1642_v13  ;;  %v1655_v35 = vpop.f32.mrb[77].mxu0 }
 0x17c   :  { %4239 = vst.msk [vmem:[%s7293_s2 + $0x120] sm:$0xf] %vm4166_vm3, %v5014_v21  ;;  %v5017_v27 = vpack.c.bf16 %v2961_v25, %v2961_v25  ;;  %v3089_v28 = vsel %vm2577_vm2, %v5538_v9, %v2833_v23  ;;  %vm2575_vm5 = vcmp.gt.f32.partialorder %v2154_v14, 0.0  ;;  %v2831_v29 = vmul.f32 0.2, %v2154_v14  ;;  %v2167_v36 = vpop.f32.mrb[77].mxu1 }
 0x17d   :  { %4367 = vst.msk [vmem:[%s7293_s2 + $0x320] sm:$0xf] %vm4166_vm3, %v5142_v24  ;;  %v5145_v32 = vpack.c.bf16 %v3089_v28, %v3089_v28  ;;  %v2959_v33 = vsel %vm2447_vm4, %v1642_v13, %v2703_v26  ;;  %vm2452_vm6 = vcmp.gt.f32.partialorder %v5413_v30, 0.0  ;;  %v2708_v34 = vmul.f32 0.2, %v5413_v30  ;;  %v5414_v40 = vpop.f32.mrb[78].mxu0 }
 0x17e   :  { %4242 = vst.msk [vmem:[%s7293_s2 + $0x12c] sm:$0xf] %vm4166_vm3, %v5017_v27  ;;  %v5015_v37 = vpack.c.bf16 %v2959_v33, %v2959_v33  ;;  %v3087_v38 = vsel %vm2575_vm5, %v2154_v14, %v2831_v29  ;;  %vm2580_vm7 = vcmp.gt.f32.partialorder %v5541_v31, 0.0  ;;  %v2836_v39 = vmul.f32 0.2, %v5541_v31  ;;  %v5542_v41 = vpop.f32.mrb[78].mxu1 }
 0x17f   :  { %4370 = vst.msk [vmem:[%s7293_s2 + $0x32c] sm:$0xf] %vm4166_vm3, %v5145_v32  ;;  %v5143_v42 = vpack.c.bf16 %v3087_v38, %v3087_v38  ;;  %v2964_v43 = vsel %vm2452_vm6, %v5413_v30, %v2708_v34  ;;  %vm2450_vm8 = vcmp.gt.f32.partialorder %v1655_v35, 0.0  ;;  %v2706_v44 = vmul.f32 0.2, %v1655_v35  ;;  %v1658_v45 = vpop.f32.mrb[79].mxu0 }
 0x180   :  { %v2170_v46 = vpop.f32.mrb[79].mxu1  ;;  %4240 = vst.msk [vmem:[%s7293_s2 + $0x124] sm:$0xf] %vm4166_vm3, %v5015_v37  ;;  %v5020_v47 = vpack.c.bf16 %v2964_v43, %v2964_v43  ;;  %v3092_v48 = vsel %vm2580_vm7, %v5541_v31, %v2836_v39  ;;  %vm2578_vm9 = vcmp.gt.f32.partialorder %v2167_v36, 0.0  ;;  %v2834_v49 = vmul.f32 0.2, %v2167_v36 }
 0x181   :  { %4368 = vst.msk [vmem:[%s7293_s2 + $0x324] sm:$0xf] %vm4166_vm3, %v5143_v42  ;;  %v5148_v50 = vpack.c.bf16 %v3092_v48, %v3092_v48  ;;  %v2962_v51 = vsel %vm2450_vm8, %v1655_v35, %v2706_v44  ;;  %vm2453_vm10 = vcmp.gt.f32.partialorder %v5414_v40, 0.0  ;;  %v2709_v52 = vmul.f32 0.2, %v5414_v40  ;;  %v5417_v62 = vpop.f32.mrb[80].mxu0 }
 0x182   :  { %4245 = vst.msk [vmem:[%s7293_s2 + $0x138] sm:$0xf] %vm4166_vm3, %v5020_v47  ;;  %v5018_v53 = vpack.c.bf16 %v2962_v51, %v2962_v51  ;;  %v3090_v54 = vsel %vm2578_vm9, %v2167_v36, %v2834_v49  ;;  %vm2581_vm11 = vcmp.gt.f32.partialorder %v5542_v41, 0.0  ;;  %v2837_v55 = vmul.f32 0.2, %v5542_v41  ;;  %v5545_v63 = vpop.f32.mrb[80].mxu1 }
 0x183   :  { %4373 = vst.msk [vmem:[%s7293_s2 + $0x338] sm:$0xf] %vm4166_vm3, %v5148_v50  ;;  %v5146_v56 = vpack.c.bf16 %v3090_v54, %v3090_v54  ;;  %v2965_v57 = vsel %vm2453_vm10, %v5414_v40, %v2709_v52  ;;  %vm2451_vm12 = vcmp.gt.f32.partialorder %v1658_v45, 0.0  ;;  %v2707_v58 = vmul.f32 0.2, %v1658_v45  ;;  %v1671_v3 = vpop.f32.mrb[81].mxu0 }
 0x184   :  { %4243 = vst.msk [vmem:[%s7293_s2 + $0x130] sm:$0xf] %vm4166_vm3, %v5018_v53  ;;  %v5021_v59 = vpack.c.bf16 %v2965_v57, %v2965_v57  ;;  %v3093_v60 = vsel %vm2581_vm11, %v5542_v41, %v2837_v55  ;;  %vm2579_vm0 = vcmp.gt.f32.partialorder %v2170_v46, 0.0  ;;  %v2835_v61 = vmul.f32 0.2, %v2170_v46  ;;  %v2183_v4 = vpop.f32.mrb[81].mxu1 }
 0x185   :  { %4371 = vst.msk [vmem:[%s7293_s2 + $0x330] sm:$0xf] %vm4166_vm3, %v5146_v56  ;;  %v5149_v0 = vpack.c.bf16 %v3093_v60, %v3093_v60  ;;  %v2963_v1 = vsel %vm2451_vm12, %v1658_v45, %v2707_v58  ;;  %vm2456_vm13 = vcmp.gt.f32.partialorder %v5417_v62, 0.0  ;;  %v2712_v2 = vmul.f32 0.2, %v5417_v62  ;;  %v5418_v8 = vpop.f32.mrb[82].mxu0 }
 0x186   :  { %4246 = vst.msk [vmem:[%s7293_s2 + $0x13c] sm:$0xf] %vm4166_vm3, %v5021_v59  ;;  %v5019_v5 = vpack.c.bf16 %v2963_v1, %v2963_v1  ;;  %v3091_v6 = vsel %vm2579_vm0, %v2170_v46, %v2835_v61  ;;  %vm2584_vm14 = vcmp.gt.f32.partialorder %v5545_v63, 0.0  ;;  %v2840_v7 = vmul.f32 0.2, %v5545_v63  ;;  %v5546_v9 = vpop.f32.mrb[82].mxu1 }
 0x187   :  { %4374 = vst.msk [vmem:[%s7293_s2 + $0x33c] sm:$0xf] %vm4166_vm3, %v5149_v0  ;;  %v5147_v10 = vpack.c.bf16 %v3091_v6, %v3091_v6  ;;  %v2968_v11 = vsel %vm2456_vm13, %v5417_v62, %v2712_v2  ;;  %vm2454_vm15 = vcmp.gt.f32.partialorder %v1671_v3, 0.0  ;;  %v2710_v12 = vmul.f32 0.2, %v1671_v3  ;;  %v1674_v13 = vpop.f32.mrb[83].mxu0 }
 0x188   :  { %v2186_v14 = vpop.f32.mrb[83].mxu1  ;;  %4244 = vst.msk [vmem:[%s7293_s2 + $0x134] sm:$0xf] %vm4166_vm3, %v5019_v5  ;;  %v5024_v15 = vpack.c.bf16 %v2968_v11, %v2968_v11  ;;  %v3096_v16 = vsel %vm2584_vm14, %v5545_v63, %v2840_v7  ;;  %vm2582_vm1 = vcmp.gt.f32.partialorder %v2183_v4, 0.0  ;;  %v2838_v17 = vmul.f32 0.2, %v2183_v4 }
 0x189   :  { %4372 = vst.msk [vmem:[%s7293_s2 + $0x334] sm:$0xf] %vm4166_vm3, %v5147_v10  ;;  %v5152_v18 = vpack.c.bf16 %v3096_v16, %v3096_v16  ;;  %v2966_v19 = vsel %vm2454_vm15, %v1671_v3, %v2710_v12  ;;  %vm2457_vm2 = vcmp.gt.f32.partialorder %v5418_v8, 0.0  ;;  %v2713_v20 = vmul.f32 0.2, %v5418_v8  ;;  %v5421_v30 = vpop.f32.mrb[84].mxu0 }
 0x18a   :  { %4249 = vst.msk [vmem:[%s7293_s2 + $0x148] sm:$0xf] %vm4166_vm3, %v5024_v15  ;;  %v5022_v21 = vpack.c.bf16 %v2966_v19, %v2966_v19  ;;  %v3094_v22 = vsel %vm2582_vm1, %v2183_v4, %v2838_v17  ;;  %vm2585_vm4 = vcmp.gt.f32.partialorder %v5546_v9, 0.0  ;;  %v2841_v23 = vmul.f32 0.2, %v5546_v9  ;;  %v5549_v31 = vpop.f32.mrb[84].mxu1 }
 0x18b   :  { %4377 = vst.msk [vmem:[%s7293_s2 + $0x348] sm:$0xf] %vm4166_vm3, %v5152_v18  ;;  %v5150_v24 = vpack.c.bf16 %v3094_v22, %v3094_v22  ;;  %v2969_v25 = vsel %vm2457_vm2, %v5418_v8, %v2713_v20  ;;  %vm2455_vm5 = vcmp.gt.f32.partialorder %v1674_v13, 0.0  ;;  %v2711_v26 = vmul.f32 0.2, %v1674_v13  ;;  %v1687_v35 = vpop.f32.mrb[85].mxu0 }
 0x18c   :  { %4247 = vst.msk [vmem:[%s7293_s2 + $0x140] sm:$0xf] %vm4166_vm3, %v5022_v21  ;;  %v5025_v27 = vpack.c.bf16 %v2969_v25, %v2969_v25  ;;  %v3097_v28 = vsel %vm2585_vm4, %v5546_v9, %v2841_v23  ;;  %vm2583_vm6 = vcmp.gt.f32.partialorder %v2186_v14, 0.0  ;;  %v2839_v29 = vmul.f32 0.2, %v2186_v14  ;;  %v2199_v36 = vpop.f32.mrb[85].mxu1 }
 0x18d   :  { %4375 = vst.msk [vmem:[%s7293_s2 + $0x340] sm:$0xf] %vm4166_vm3, %v5150_v24  ;;  %v5153_v32 = vpack.c.bf16 %v3097_v28, %v3097_v28  ;;  %v2967_v33 = vsel %vm2455_vm5, %v1674_v13, %v2711_v26  ;;  %vm2460_vm7 = vcmp.gt.f32.partialorder %v5421_v30, 0.0  ;;  %v2716_v34 = vmul.f32 0.2, %v5421_v30  ;;  %v5422_v40 = vpop.f32.mrb[86].mxu0 }
 0x18e   :  { %4250 = vst.msk [vmem:[%s7293_s2 + $0x14c] sm:$0xf] %vm4166_vm3, %v5025_v27  ;;  %v5023_v37 = vpack.c.bf16 %v2967_v33, %v2967_v33  ;;  %v3095_v38 = vsel %vm2583_vm6, %v2186_v14, %v2839_v29  ;;  %vm2588_vm8 = vcmp.gt.f32.partialorder %v5549_v31, 0.0  ;;  %v2844_v39 = vmul.f32 0.2, %v5549_v31  ;;  %v5550_v41 = vpop.f32.mrb[86].mxu1 }
 0x18f   :  { %4378 = vst.msk [vmem:[%s7293_s2 + $0x34c] sm:$0xf] %vm4166_vm3, %v5153_v32  ;;  %v5151_v42 = vpack.c.bf16 %v3095_v38, %v3095_v38  ;;  %v2972_v43 = vsel %vm2460_vm7, %v5421_v30, %v2716_v34  ;;  %vm2458_vm9 = vcmp.gt.f32.partialorder %v1687_v35, 0.0  ;;  %v2714_v44 = vmul.f32 0.2, %v1687_v35  ;;  %v1690_v45 = vpop.f32.mrb[87].mxu0 }
 0x190   :  { %v2202_v46 = vpop.f32.mrb[87].mxu1  ;;  %4248 = vst.msk [vmem:[%s7293_s2 + $0x144] sm:$0xf] %vm4166_vm3, %v5023_v37  ;;  %v5028_v47 = vpack.c.bf16 %v2972_v43, %v2972_v43  ;;  %v3100_v48 = vsel %vm2588_vm8, %v5549_v31, %v2844_v39  ;;  %vm2586_vm10 = vcmp.gt.f32.partialorder %v2199_v36, 0.0  ;;  %v2842_v49 = vmul.f32 0.2, %v2199_v36 }
 0x191   :  { %4376 = vst.msk [vmem:[%s7293_s2 + $0x344] sm:$0xf] %vm4166_vm3, %v5151_v42  ;;  %v5156_v50 = vpack.c.bf16 %v3100_v48, %v3100_v48  ;;  %v2970_v51 = vsel %vm2458_vm9, %v1687_v35, %v2714_v44  ;;  %vm2461_vm11 = vcmp.gt.f32.partialorder %v5422_v40, 0.0  ;;  %v2717_v52 = vmul.f32 0.2, %v5422_v40  ;;  %v5425_v62 = vpop.f32.mrb[88].mxu0 }
 0x192   :  { %4253 = vst.msk [vmem:[%s7293_s2 + $0x158] sm:$0xf] %vm4166_vm3, %v5028_v47  ;;  %v5026_v53 = vpack.c.bf16 %v2970_v51, %v2970_v51  ;;  %v3098_v54 = vsel %vm2586_vm10, %v2199_v36, %v2842_v49  ;;  %vm2589_vm12 = vcmp.gt.f32.partialorder %v5550_v41, 0.0  ;;  %v2845_v55 = vmul.f32 0.2, %v5550_v41  ;;  %v5553_v63 = vpop.f32.mrb[88].mxu1 }
 0x193   :  { %4381 = vst.msk [vmem:[%s7293_s2 + $0x358] sm:$0xf] %vm4166_vm3, %v5156_v50  ;;  %v5154_v56 = vpack.c.bf16 %v3098_v54, %v3098_v54  ;;  %v2973_v57 = vsel %vm2461_vm11, %v5422_v40, %v2717_v52  ;;  %vm2459_vm0 = vcmp.gt.f32.partialorder %v1690_v45, 0.0  ;;  %v2715_v58 = vmul.f32 0.2, %v1690_v45  ;;  %v1703_v3 = vpop.f32.mrb[89].mxu0 }
 0x194   :  { %4251 = vst.msk [vmem:[%s7293_s2 + $0x150] sm:$0xf] %vm4166_vm3, %v5026_v53  ;;  %v5029_v59 = vpack.c.bf16 %v2973_v57, %v2973_v57  ;;  %v3101_v60 = vsel %vm2589_vm12, %v5550_v41, %v2845_v55  ;;  %vm2587_vm13 = vcmp.gt.f32.partialorder %v2202_v46, 0.0  ;;  %v2843_v61 = vmul.f32 0.2, %v2202_v46  ;;  %v2215_v4 = vpop.f32.mrb[89].mxu1 }
 0x195   :  { %4379 = vst.msk [vmem:[%s7293_s2 + $0x350] sm:$0xf] %vm4166_vm3, %v5154_v56  ;;  %v5157_v0 = vpack.c.bf16 %v3101_v60, %v3101_v60  ;;  %v2971_v1 = vsel %vm2459_vm0, %v1690_v45, %v2715_v58  ;;  %vm2464_vm14 = vcmp.gt.f32.partialorder %v5425_v62, 0.0  ;;  %v2720_v2 = vmul.f32 0.2, %v5425_v62  ;;  %v5426_v8 = vpop.f32.mrb[90].mxu0 }
 0x196   :  { %4254 = vst.msk [vmem:[%s7293_s2 + $0x15c] sm:$0xf] %vm4166_vm3, %v5029_v59  ;;  %v5027_v5 = vpack.c.bf16 %v2971_v1, %v2971_v1  ;;  %v3099_v6 = vsel %vm2587_vm13, %v2202_v46, %v2843_v61  ;;  %vm2592_vm15 = vcmp.gt.f32.partialorder %v5553_v63, 0.0  ;;  %v2848_v7 = vmul.f32 0.2, %v5553_v63  ;;  %v5554_v9 = vpop.f32.mrb[90].mxu1 }
 0x197   :  { %4382 = vst.msk [vmem:[%s7293_s2 + $0x35c] sm:$0xf] %vm4166_vm3, %v5157_v0  ;;  %v5155_v10 = vpack.c.bf16 %v3099_v6, %v3099_v6  ;;  %v2976_v11 = vsel %vm2464_vm14, %v5425_v62, %v2720_v2  ;;  %vm2462_vm1 = vcmp.gt.f32.partialorder %v1703_v3, 0.0  ;;  %v2718_v12 = vmul.f32 0.2, %v1703_v3  ;;  %v1706_v13 = vpop.f32.mrb[91].mxu0 }
 0x198   :  { %v2218_v14 = vpop.f32.mrb[91].mxu1  ;;  %4252 = vst.msk [vmem:[%s7293_s2 + $0x154] sm:$0xf] %vm4166_vm3, %v5027_v5  ;;  %v5032_v15 = vpack.c.bf16 %v2976_v11, %v2976_v11  ;;  %v3104_v16 = vsel %vm2592_vm15, %v5553_v63, %v2848_v7  ;;  %vm2590_vm2 = vcmp.gt.f32.partialorder %v2215_v4, 0.0  ;;  %v2846_v17 = vmul.f32 0.2, %v2215_v4 }
 0x199   :  { %4380 = vst.msk [vmem:[%s7293_s2 + $0x354] sm:$0xf] %vm4166_vm3, %v5155_v10  ;;  %v5160_v18 = vpack.c.bf16 %v3104_v16, %v3104_v16  ;;  %v2974_v19 = vsel %vm2462_vm1, %v1703_v3, %v2718_v12  ;;  %vm2465_vm4 = vcmp.gt.f32.partialorder %v5426_v8, 0.0  ;;  %v2721_v20 = vmul.f32 0.2, %v5426_v8  ;;  %v5429_v30 = vpop.f32.mrb[92].mxu0 }
 0x19a   :  { %4257 = vst.msk [vmem:[%s7293_s2 + $0x168] sm:$0xf] %vm4166_vm3, %v5032_v15  ;;  %v5030_v21 = vpack.c.bf16 %v2974_v19, %v2974_v19  ;;  %v3102_v22 = vsel %vm2590_vm2, %v2215_v4, %v2846_v17  ;;  %vm2593_vm5 = vcmp.gt.f32.partialorder %v5554_v9, 0.0  ;;  %v2849_v23 = vmul.f32 0.2, %v5554_v9  ;;  %v5557_v31 = vpop.f32.mrb[92].mxu1 }
 0x19b   :  { %4385 = vst.msk [vmem:[%s7293_s2 + $0x368] sm:$0xf] %vm4166_vm3, %v5160_v18  ;;  %v5158_v24 = vpack.c.bf16 %v3102_v22, %v3102_v22  ;;  %v2977_v25 = vsel %vm2465_vm4, %v5426_v8, %v2721_v20  ;;  %vm2463_vm6 = vcmp.gt.f32.partialorder %v1706_v13, 0.0  ;;  %v2719_v26 = vmul.f32 0.2, %v1706_v13  ;;  %v1719_v35 = vpop.f32.mrb[93].mxu0 }
 0x19c   :  { %4255 = vst.msk [vmem:[%s7293_s2 + $0x160] sm:$0xf] %vm4166_vm3, %v5030_v21  ;;  %v5033_v27 = vpack.c.bf16 %v2977_v25, %v2977_v25  ;;  %v3105_v28 = vsel %vm2593_vm5, %v5554_v9, %v2849_v23  ;;  %vm2591_vm7 = vcmp.gt.f32.partialorder %v2218_v14, 0.0  ;;  %v2847_v29 = vmul.f32 0.2, %v2218_v14  ;;  %v2231_v36 = vpop.f32.mrb[93].mxu1 }
 0x19d   :  { %4383 = vst.msk [vmem:[%s7293_s2 + $0x360] sm:$0xf] %vm4166_vm3, %v5158_v24  ;;  %v5161_v32 = vpack.c.bf16 %v3105_v28, %v3105_v28  ;;  %v2975_v33 = vsel %vm2463_vm6, %v1706_v13, %v2719_v26  ;;  %vm2468_vm8 = vcmp.gt.f32.partialorder %v5429_v30, 0.0  ;;  %v2724_v34 = vmul.f32 0.2, %v5429_v30  ;;  %v5430_v40 = vpop.f32.mrb[94].mxu0 }
 0x19e   :  { %4258 = vst.msk [vmem:[%s7293_s2 + $0x16c] sm:$0xf] %vm4166_vm3, %v5033_v27  ;;  %v5031_v37 = vpack.c.bf16 %v2975_v33, %v2975_v33  ;;  %v3103_v38 = vsel %vm2591_vm7, %v2218_v14, %v2847_v29  ;;  %vm2596_vm9 = vcmp.gt.f32.partialorder %v5557_v31, 0.0  ;;  %v2852_v39 = vmul.f32 0.2, %v5557_v31  ;;  %v5558_v41 = vpop.f32.mrb[94].mxu1 }
 0x19f   :  { %4386 = vst.msk [vmem:[%s7293_s2 + $0x36c] sm:$0xf] %vm4166_vm3, %v5161_v32  ;;  %v5159_v42 = vpack.c.bf16 %v3103_v38, %v3103_v38  ;;  %v2980_v43 = vsel %vm2468_vm8, %v5429_v30, %v2724_v34  ;;  %vm2466_vm10 = vcmp.gt.f32.partialorder %v1719_v35, 0.0  ;;  %v2722_v44 = vmul.f32 0.2, %v1719_v35  ;;  %v1722_v45 = vpop.f32.mrb[95].mxu0 }
 0x1a0   :  { %v2234_v46 = vpop.f32.mrb[95].mxu1  ;;  %4256 = vst.msk [vmem:[%s7293_s2 + $0x164] sm:$0xf] %vm4166_vm3, %v5031_v37  ;;  %v5036_v47 = vpack.c.bf16 %v2980_v43, %v2980_v43  ;;  %v3108_v48 = vsel %vm2596_vm9, %v5557_v31, %v2852_v39  ;;  %vm2594_vm11 = vcmp.gt.f32.partialorder %v2231_v36, 0.0  ;;  %v2850_v49 = vmul.f32 0.2, %v2231_v36 }
 0x1a1   :  { %4384 = vst.msk [vmem:[%s7293_s2 + $0x364] sm:$0xf] %vm4166_vm3, %v5159_v42  ;;  %v5164_v50 = vpack.c.bf16 %v3108_v48, %v3108_v48  ;;  %v2978_v51 = vsel %vm2466_vm10, %v1719_v35, %v2722_v44  ;;  %vm2469_vm12 = vcmp.gt.f32.partialorder %v5430_v40, 0.0  ;;  %v2725_v52 = vmul.f32 0.2, %v5430_v40  ;;  %v5433_v62 = vpop.f32.mrb[96].mxu0 }
 0x1a2   :  { %4261 = vst.msk [vmem:[%s7293_s2 + $0x178] sm:$0xf] %vm4166_vm3, %v5036_v47  ;;  %v5034_v53 = vpack.c.bf16 %v2978_v51, %v2978_v51  ;;  %v3106_v54 = vsel %vm2594_vm11, %v2231_v36, %v2850_v49  ;;  %vm2597_vm0 = vcmp.gt.f32.partialorder %v5558_v41, 0.0  ;;  %v2853_v55 = vmul.f32 0.2, %v5558_v41  ;;  %v5561_v63 = vpop.f32.mrb[96].mxu1 }
 0x1a3   :  { %4389 = vst.msk [vmem:[%s7293_s2 + $0x378] sm:$0xf] %vm4166_vm3, %v5164_v50  ;;  %v5162_v56 = vpack.c.bf16 %v3106_v54, %v3106_v54  ;;  %v2981_v57 = vsel %vm2469_vm12, %v5430_v40, %v2725_v52  ;;  %vm2467_vm13 = vcmp.gt.f32.partialorder %v1722_v45, 0.0  ;;  %v2723_v58 = vmul.f32 0.2, %v1722_v45  ;;  %v1735_v3 = vpop.f32.mrb[97].mxu0 }
 0x1a4   :  { %4259 = vst.msk [vmem:[%s7293_s2 + $0x170] sm:$0xf] %vm4166_vm3, %v5034_v53  ;;  %v5037_v59 = vpack.c.bf16 %v2981_v57, %v2981_v57  ;;  %v3109_v60 = vsel %vm2597_vm0, %v5558_v41, %v2853_v55  ;;  %vm2595_vm14 = vcmp.gt.f32.partialorder %v2234_v46, 0.0  ;;  %v2851_v61 = vmul.f32 0.2, %v2234_v46  ;;  %v2247_v4 = vpop.f32.mrb[97].mxu1 }
 0x1a5   :  { %4387 = vst.msk [vmem:[%s7293_s2 + $0x370] sm:$0xf] %vm4166_vm3, %v5162_v56  ;;  %v5165_v0 = vpack.c.bf16 %v3109_v60, %v3109_v60  ;;  %v2979_v1 = vsel %vm2467_vm13, %v1722_v45, %v2723_v58  ;;  %vm2472_vm15 = vcmp.gt.f32.partialorder %v5433_v62, 0.0  ;;  %v2728_v2 = vmul.f32 0.2, %v5433_v62  ;;  %v5434_v8 = vpop.f32.mrb[98].mxu0 }
 0x1a6   :  { %4262 = vst.msk [vmem:[%s7293_s2 + $0x17c] sm:$0xf] %vm4166_vm3, %v5037_v59  ;;  %v5035_v5 = vpack.c.bf16 %v2979_v1, %v2979_v1  ;;  %v3107_v6 = vsel %vm2595_vm14, %v2234_v46, %v2851_v61  ;;  %vm2600_vm1 = vcmp.gt.f32.partialorder %v5561_v63, 0.0  ;;  %v2856_v7 = vmul.f32 0.2, %v5561_v63  ;;  %v5562_v9 = vpop.f32.mrb[98].mxu1 }
 0x1a7   :  { %4390 = vst.msk [vmem:[%s7293_s2 + $0x37c] sm:$0xf] %vm4166_vm3, %v5165_v0  ;;  %v5163_v10 = vpack.c.bf16 %v3107_v6, %v3107_v6  ;;  %v2984_v11 = vsel %vm2472_vm15, %v5433_v62, %v2728_v2  ;;  %vm2470_vm2 = vcmp.gt.f32.partialorder %v1735_v3, 0.0  ;;  %v2726_v12 = vmul.f32 0.2, %v1735_v3  ;;  %v1738_v13 = vpop.f32.mrb[99].mxu0 }
 0x1a8   :  { %v2250_v14 = vpop.f32.mrb[99].mxu1  ;;  %4260 = vst.msk [vmem:[%s7293_s2 + $0x174] sm:$0xf] %vm4166_vm3, %v5035_v5  ;;  %v5040_v15 = vpack.c.bf16 %v2984_v11, %v2984_v11  ;;  %v3112_v16 = vsel %vm2600_vm1, %v5561_v63, %v2856_v7  ;;  %vm2598_vm4 = vcmp.gt.f32.partialorder %v2247_v4, 0.0  ;;  %v2854_v17 = vmul.f32 0.2, %v2247_v4 }
 0x1a9   :  { %4388 = vst.msk [vmem:[%s7293_s2 + $0x374] sm:$0xf] %vm4166_vm3, %v5163_v10  ;;  %v5168_v18 = vpack.c.bf16 %v3112_v16, %v3112_v16  ;;  %v2982_v19 = vsel %vm2470_vm2, %v1735_v3, %v2726_v12  ;;  %vm2473_vm5 = vcmp.gt.f32.partialorder %v5434_v8, 0.0  ;;  %v2729_v20 = vmul.f32 0.2, %v5434_v8  ;;  %v5437_v30 = vpop.f32.mrb[100].mxu0 }
 0x1aa   :  { %4265 = vst.msk [vmem:[%s7293_s2 + $0x188] sm:$0xf] %vm4166_vm3, %v5040_v15  ;;  %v5038_v21 = vpack.c.bf16 %v2982_v19, %v2982_v19  ;;  %v3110_v22 = vsel %vm2598_vm4, %v2247_v4, %v2854_v17  ;;  %vm2601_vm6 = vcmp.gt.f32.partialorder %v5562_v9, 0.0  ;;  %v2857_v23 = vmul.f32 0.2, %v5562_v9  ;;  %v5565_v31 = vpop.f32.mrb[100].mxu1 }
 0x1ab   :  { %4393 = vst.msk [vmem:[%s7293_s2 + $0x388] sm:$0xf] %vm4166_vm3, %v5168_v18  ;;  %v5166_v24 = vpack.c.bf16 %v3110_v22, %v3110_v22  ;;  %v2985_v25 = vsel %vm2473_vm5, %v5434_v8, %v2729_v20  ;;  %vm2471_vm7 = vcmp.gt.f32.partialorder %v1738_v13, 0.0  ;;  %v2727_v26 = vmul.f32 0.2, %v1738_v13  ;;  %v1751_v35 = vpop.f32.mrb[101].mxu0 }
 0x1ac   :  { %4263 = vst.msk [vmem:[%s7293_s2 + $0x180] sm:$0xf] %vm4166_vm3, %v5038_v21  ;;  %v5041_v27 = vpack.c.bf16 %v2985_v25, %v2985_v25  ;;  %v3113_v28 = vsel %vm2601_vm6, %v5562_v9, %v2857_v23  ;;  %vm2599_vm8 = vcmp.gt.f32.partialorder %v2250_v14, 0.0  ;;  %v2855_v29 = vmul.f32 0.2, %v2250_v14  ;;  %v2263_v36 = vpop.f32.mrb[101].mxu1 }
 0x1ad   :  { %4391 = vst.msk [vmem:[%s7293_s2 + $0x380] sm:$0xf] %vm4166_vm3, %v5166_v24  ;;  %v5169_v32 = vpack.c.bf16 %v3113_v28, %v3113_v28  ;;  %v2983_v33 = vsel %vm2471_vm7, %v1738_v13, %v2727_v26  ;;  %vm2476_vm9 = vcmp.gt.f32.partialorder %v5437_v30, 0.0  ;;  %v2732_v34 = vmul.f32 0.2, %v5437_v30  ;;  %v5438_v40 = vpop.f32.mrb[102].mxu0 }
 0x1ae   :  { %4266 = vst.msk [vmem:[%s7293_s2 + $0x18c] sm:$0xf] %vm4166_vm3, %v5041_v27  ;;  %v5039_v37 = vpack.c.bf16 %v2983_v33, %v2983_v33  ;;  %v3111_v38 = vsel %vm2599_vm8, %v2250_v14, %v2855_v29  ;;  %vm2604_vm10 = vcmp.gt.f32.partialorder %v5565_v31, 0.0  ;;  %v2860_v39 = vmul.f32 0.2, %v5565_v31  ;;  %v5566_v41 = vpop.f32.mrb[102].mxu1 }
 0x1af   :  { %4394 = vst.msk [vmem:[%s7293_s2 + $0x38c] sm:$0xf] %vm4166_vm3, %v5169_v32  ;;  %v5167_v42 = vpack.c.bf16 %v3111_v38, %v3111_v38  ;;  %v2988_v43 = vsel %vm2476_vm9, %v5437_v30, %v2732_v34  ;;  %vm2474_vm11 = vcmp.gt.f32.partialorder %v1751_v35, 0.0  ;;  %v2730_v44 = vmul.f32 0.2, %v1751_v35  ;;  %v1754_v45 = vpop.f32.mrb[103].mxu0 }
 0x1b0   :  { %v2266_v46 = vpop.f32.mrb[103].mxu1  ;;  %4264 = vst.msk [vmem:[%s7293_s2 + $0x184] sm:$0xf] %vm4166_vm3, %v5039_v37  ;;  %v5044_v47 = vpack.c.bf16 %v2988_v43, %v2988_v43  ;;  %v3116_v48 = vsel %vm2604_vm10, %v5565_v31, %v2860_v39  ;;  %vm2602_vm12 = vcmp.gt.f32.partialorder %v2263_v36, 0.0  ;;  %v2858_v49 = vmul.f32 0.2, %v2263_v36 }
 0x1b1   :  { %4392 = vst.msk [vmem:[%s7293_s2 + $0x384] sm:$0xf] %vm4166_vm3, %v5167_v42  ;;  %v5172_v50 = vpack.c.bf16 %v3116_v48, %v3116_v48  ;;  %v2986_v51 = vsel %vm2474_vm11, %v1751_v35, %v2730_v44  ;;  %vm2477_vm0 = vcmp.gt.f32.partialorder %v5438_v40, 0.0  ;;  %v2733_v52 = vmul.f32 0.2, %v5438_v40  ;;  %v5441_v62 = vpop.f32.mrb[104].mxu0 }
 0x1b2   :  { %4269 = vst.msk [vmem:[%s7293_s2 + $0x198] sm:$0xf] %vm4166_vm3, %v5044_v47  ;;  %v5042_v53 = vpack.c.bf16 %v2986_v51, %v2986_v51  ;;  %v3114_v54 = vsel %vm2602_vm12, %v2263_v36, %v2858_v49  ;;  %vm2605_vm13 = vcmp.gt.f32.partialorder %v5566_v41, 0.0  ;;  %v2861_v55 = vmul.f32 0.2, %v5566_v41  ;;  %v5569_v63 = vpop.f32.mrb[104].mxu1 }
 0x1b3   :  { %4397 = vst.msk [vmem:[%s7293_s2 + $0x398] sm:$0xf] %vm4166_vm3, %v5172_v50  ;;  %v5170_v56 = vpack.c.bf16 %v3114_v54, %v3114_v54  ;;  %v2989_v57 = vsel %vm2477_vm0, %v5438_v40, %v2733_v52  ;;  %vm2475_vm14 = vcmp.gt.f32.partialorder %v1754_v45, 0.0  ;;  %v2731_v58 = vmul.f32 0.2, %v1754_v45  ;;  %v1767_v3 = vpop.f32.mrb[105].mxu0 }
 0x1b4   :  { %4267 = vst.msk [vmem:[%s7293_s2 + $0x190] sm:$0xf] %vm4166_vm3, %v5042_v53  ;;  %v5045_v59 = vpack.c.bf16 %v2989_v57, %v2989_v57  ;;  %v3117_v60 = vsel %vm2605_vm13, %v5566_v41, %v2861_v55  ;;  %vm2603_vm15 = vcmp.gt.f32.partialorder %v2266_v46, 0.0  ;;  %v2859_v61 = vmul.f32 0.2, %v2266_v46  ;;  %v2279_v4 = vpop.f32.mrb[105].mxu1 }
 0x1b5   :  { %4395 = vst.msk [vmem:[%s7293_s2 + $0x390] sm:$0xf] %vm4166_vm3, %v5170_v56  ;;  %v5173_v0 = vpack.c.bf16 %v3117_v60, %v3117_v60  ;;  %v2987_v1 = vsel %vm2475_vm14, %v1754_v45, %v2731_v58  ;;  %vm2480_vm1 = vcmp.gt.f32.partialorder %v5441_v62, 0.0  ;;  %v2736_v2 = vmul.f32 0.2, %v5441_v62  ;;  %v5442_v8 = vpop.f32.mrb[106].mxu0 }
 0x1b6   :  { %4270 = vst.msk [vmem:[%s7293_s2 + $0x19c] sm:$0xf] %vm4166_vm3, %v5045_v59  ;;  %v5043_v5 = vpack.c.bf16 %v2987_v1, %v2987_v1  ;;  %v3115_v6 = vsel %vm2603_vm15, %v2266_v46, %v2859_v61  ;;  %vm2608_vm2 = vcmp.gt.f32.partialorder %v5569_v63, 0.0  ;;  %v2864_v7 = vmul.f32 0.2, %v5569_v63  ;;  %v5570_v9 = vpop.f32.mrb[106].mxu1 }
 0x1b7   :  { %4398 = vst.msk [vmem:[%s7293_s2 + $0x39c] sm:$0xf] %vm4166_vm3, %v5173_v0  ;;  %v5171_v10 = vpack.c.bf16 %v3115_v6, %v3115_v6  ;;  %v2992_v11 = vsel %vm2480_vm1, %v5441_v62, %v2736_v2  ;;  %vm2478_vm4 = vcmp.gt.f32.partialorder %v1767_v3, 0.0  ;;  %v2734_v12 = vmul.f32 0.2, %v1767_v3  ;;  %v1770_v13 = vpop.f32.mrb[107].mxu0 }
 0x1b8   :  { %v2282_v14 = vpop.f32.mrb[107].mxu1  ;;  %4268 = vst.msk [vmem:[%s7293_s2 + $0x194] sm:$0xf] %vm4166_vm3, %v5043_v5  ;;  %v5048_v15 = vpack.c.bf16 %v2992_v11, %v2992_v11  ;;  %v3120_v16 = vsel %vm2608_vm2, %v5569_v63, %v2864_v7  ;;  %vm2606_vm5 = vcmp.gt.f32.partialorder %v2279_v4, 0.0  ;;  %v2862_v17 = vmul.f32 0.2, %v2279_v4 }
 0x1b9   :  { %4396 = vst.msk [vmem:[%s7293_s2 + $0x394] sm:$0xf] %vm4166_vm3, %v5171_v10  ;;  %v5176_v18 = vpack.c.bf16 %v3120_v16, %v3120_v16  ;;  %v2990_v19 = vsel %vm2478_vm4, %v1767_v3, %v2734_v12  ;;  %vm2481_vm6 = vcmp.gt.f32.partialorder %v5442_v8, 0.0  ;;  %v2737_v20 = vmul.f32 0.2, %v5442_v8  ;;  %v5445_v30 = vpop.f32.mrb[108].mxu0 }
 0x1ba   :  { %4273 = vst.msk [vmem:[%s7293_s2 + $0x1a8] sm:$0xf] %vm4166_vm3, %v5048_v15  ;;  %v5046_v21 = vpack.c.bf16 %v2990_v19, %v2990_v19  ;;  %v3118_v22 = vsel %vm2606_vm5, %v2279_v4, %v2862_v17  ;;  %vm2609_vm7 = vcmp.gt.f32.partialorder %v5570_v9, 0.0  ;;  %v2865_v23 = vmul.f32 0.2, %v5570_v9  ;;  %v5573_v31 = vpop.f32.mrb[108].mxu1 }
 0x1bb   :  { %4401 = vst.msk [vmem:[%s7293_s2 + $0x3a8] sm:$0xf] %vm4166_vm3, %v5176_v18  ;;  %v5174_v24 = vpack.c.bf16 %v3118_v22, %v3118_v22  ;;  %v2993_v25 = vsel %vm2481_vm6, %v5442_v8, %v2737_v20  ;;  %vm2479_vm8 = vcmp.gt.f32.partialorder %v1770_v13, 0.0  ;;  %v2735_v26 = vmul.f32 0.2, %v1770_v13  ;;  %v1783_v35 = vpop.f32.mrb[109].mxu0 }
 0x1bc   :  { %4271 = vst.msk [vmem:[%s7293_s2 + $0x1a0] sm:$0xf] %vm4166_vm3, %v5046_v21  ;;  %v5049_v27 = vpack.c.bf16 %v2993_v25, %v2993_v25  ;;  %v3121_v28 = vsel %vm2609_vm7, %v5570_v9, %v2865_v23  ;;  %vm2607_vm9 = vcmp.gt.f32.partialorder %v2282_v14, 0.0  ;;  %v2863_v29 = vmul.f32 0.2, %v2282_v14  ;;  %v2295_v36 = vpop.f32.mrb[109].mxu1 }
 0x1bd   :  { %4399 = vst.msk [vmem:[%s7293_s2 + $0x3a0] sm:$0xf] %vm4166_vm3, %v5174_v24  ;;  %v5177_v32 = vpack.c.bf16 %v3121_v28, %v3121_v28  ;;  %v2991_v33 = vsel %vm2479_vm8, %v1770_v13, %v2735_v26  ;;  %vm2484_vm10 = vcmp.gt.f32.partialorder %v5445_v30, 0.0  ;;  %v2740_v34 = vmul.f32 0.2, %v5445_v30  ;;  %v5446_v40 = vpop.f32.mrb[110].mxu0 }
 0x1be   :  { %4274 = vst.msk [vmem:[%s7293_s2 + $0x1ac] sm:$0xf] %vm4166_vm3, %v5049_v27  ;;  %v5047_v37 = vpack.c.bf16 %v2991_v33, %v2991_v33  ;;  %v3119_v38 = vsel %vm2607_vm9, %v2282_v14, %v2863_v29  ;;  %vm2612_vm11 = vcmp.gt.f32.partialorder %v5573_v31, 0.0  ;;  %v2868_v39 = vmul.f32 0.2, %v5573_v31  ;;  %v5574_v41 = vpop.f32.mrb[110].mxu1 }
 0x1bf   :  { %4402 = vst.msk [vmem:[%s7293_s2 + $0x3ac] sm:$0xf] %vm4166_vm3, %v5177_v32  ;;  %v5175_v42 = vpack.c.bf16 %v3119_v38, %v3119_v38  ;;  %v2996_v43 = vsel %vm2484_vm10, %v5445_v30, %v2740_v34  ;;  %vm2482_vm12 = vcmp.gt.f32.partialorder %v1783_v35, 0.0  ;;  %v2738_v44 = vmul.f32 0.2, %v1783_v35  ;;  %v1786_v45 = vpop.f32.mrb[111].mxu0 }
 0x1c0   :  { %v2298_v46 = vpop.f32.mrb[111].mxu1  ;;  %4272 = vst.msk [vmem:[%s7293_s2 + $0x1a4] sm:$0xf] %vm4166_vm3, %v5047_v37  ;;  %v5052_v47 = vpack.c.bf16 %v2996_v43, %v2996_v43  ;;  %v3124_v48 = vsel %vm2612_vm11, %v5573_v31, %v2868_v39  ;;  %vm2610_vm0 = vcmp.gt.f32.partialorder %v2295_v36, 0.0  ;;  %v2866_v49 = vmul.f32 0.2, %v2295_v36 }
 0x1c1   :  { %4400 = vst.msk [vmem:[%s7293_s2 + $0x3a4] sm:$0xf] %vm4166_vm3, %v5175_v42  ;;  %v5180_v50 = vpack.c.bf16 %v3124_v48, %v3124_v48  ;;  %v2994_v51 = vsel %vm2482_vm12, %v1783_v35, %v2738_v44  ;;  %vm2485_vm13 = vcmp.gt.f32.partialorder %v5446_v40, 0.0  ;;  %v2741_v52 = vmul.f32 0.2, %v5446_v40  ;;  %v5449_v62 = vpop.f32.mrb[112].mxu0 }
 0x1c2   :  { %4277 = vst.msk [vmem:[%s7293_s2 + $0x1b8] sm:$0xf] %vm4166_vm3, %v5052_v47  ;;  %v5050_v53 = vpack.c.bf16 %v2994_v51, %v2994_v51  ;;  %v3122_v54 = vsel %vm2610_vm0, %v2295_v36, %v2866_v49  ;;  %vm2613_vm14 = vcmp.gt.f32.partialorder %v5574_v41, 0.0  ;;  %v2869_v55 = vmul.f32 0.2, %v5574_v41  ;;  %v5577_v63 = vpop.f32.mrb[112].mxu1 }
 0x1c3   :  { %4405 = vst.msk [vmem:[%s7293_s2 + $0x3b8] sm:$0xf] %vm4166_vm3, %v5180_v50  ;;  %v5178_v56 = vpack.c.bf16 %v3122_v54, %v3122_v54  ;;  %v2997_v57 = vsel %vm2485_vm13, %v5446_v40, %v2741_v52  ;;  %vm2483_vm15 = vcmp.gt.f32.partialorder %v1786_v45, 0.0  ;;  %v2739_v58 = vmul.f32 0.2, %v1786_v45  ;;  %v1799_v3 = vpop.f32.mrb[113].mxu0 }
 0x1c4   :  { %4275 = vst.msk [vmem:[%s7293_s2 + $0x1b0] sm:$0xf] %vm4166_vm3, %v5050_v53  ;;  %v5053_v59 = vpack.c.bf16 %v2997_v57, %v2997_v57  ;;  %v3125_v60 = vsel %vm2613_vm14, %v5574_v41, %v2869_v55  ;;  %vm2611_vm1 = vcmp.gt.f32.partialorder %v2298_v46, 0.0  ;;  %v2867_v61 = vmul.f32 0.2, %v2298_v46  ;;  %v2311_v4 = vpop.f32.mrb[113].mxu1 }
 0x1c5   :  { %4403 = vst.msk [vmem:[%s7293_s2 + $0x3b0] sm:$0xf] %vm4166_vm3, %v5178_v56  ;;  %v5181_v0 = vpack.c.bf16 %v3125_v60, %v3125_v60  ;;  %v2995_v1 = vsel %vm2483_vm15, %v1786_v45, %v2739_v58  ;;  %vm2488_vm2 = vcmp.gt.f32.partialorder %v5449_v62, 0.0  ;;  %v2744_v2 = vmul.f32 0.2, %v5449_v62  ;;  %v5450_v8 = vpop.f32.mrb[114].mxu0 }
 0x1c6   :  { %4278 = vst.msk [vmem:[%s7293_s2 + $0x1bc] sm:$0xf] %vm4166_vm3, %v5053_v59  ;;  %v5051_v5 = vpack.c.bf16 %v2995_v1, %v2995_v1  ;;  %v3123_v6 = vsel %vm2611_vm1, %v2298_v46, %v2867_v61  ;;  %vm2616_vm4 = vcmp.gt.f32.partialorder %v5577_v63, 0.0  ;;  %v2872_v7 = vmul.f32 0.2, %v5577_v63  ;;  %v5578_v9 = vpop.f32.mrb[114].mxu1 }
 0x1c7   :  { %4406 = vst.msk [vmem:[%s7293_s2 + $0x3bc] sm:$0xf] %vm4166_vm3, %v5181_v0  ;;  %v5179_v10 = vpack.c.bf16 %v3123_v6, %v3123_v6  ;;  %v3000_v11 = vsel %vm2488_vm2, %v5449_v62, %v2744_v2  ;;  %vm2486_vm5 = vcmp.gt.f32.partialorder %v1799_v3, 0.0  ;;  %v2742_v12 = vmul.f32 0.2, %v1799_v3  ;;  %v1802_v13 = vpop.f32.mrb[115].mxu0 }
 0x1c8   :  { %v2314_v14 = vpop.f32.mrb[115].mxu1  ;;  %4276 = vst.msk [vmem:[%s7293_s2 + $0x1b4] sm:$0xf] %vm4166_vm3, %v5051_v5  ;;  %v5056_v15 = vpack.c.bf16 %v3000_v11, %v3000_v11  ;;  %v3128_v16 = vsel %vm2616_vm4, %v5577_v63, %v2872_v7  ;;  %vm2614_vm6 = vcmp.gt.f32.partialorder %v2311_v4, 0.0  ;;  %v2870_v17 = vmul.f32 0.2, %v2311_v4 }
 0x1c9   :  { %4404 = vst.msk [vmem:[%s7293_s2 + $0x3b4] sm:$0xf] %vm4166_vm3, %v5179_v10  ;;  %v5184_v18 = vpack.c.bf16 %v3128_v16, %v3128_v16  ;;  %v2998_v19 = vsel %vm2486_vm5, %v1799_v3, %v2742_v12  ;;  %vm2489_vm7 = vcmp.gt.f32.partialorder %v5450_v8, 0.0  ;;  %v2745_v20 = vmul.f32 0.2, %v5450_v8  ;;  %v5453_v30 = vpop.f32.mrb[116].mxu0 }
 0x1ca   :  { %4281 = vst.msk [vmem:[%s7293_s2 + $0x1c8] sm:$0xf] %vm4166_vm3, %v5056_v15  ;;  %v5054_v21 = vpack.c.bf16 %v2998_v19, %v2998_v19  ;;  %v3126_v22 = vsel %vm2614_vm6, %v2311_v4, %v2870_v17  ;;  %vm2617_vm8 = vcmp.gt.f32.partialorder %v5578_v9, 0.0  ;;  %v2873_v23 = vmul.f32 0.2, %v5578_v9  ;;  %v5581_v31 = vpop.f32.mrb[116].mxu1 }
 0x1cb   :  { %4409 = vst.msk [vmem:[%s7293_s2 + $0x3c8] sm:$0xf] %vm4166_vm3, %v5184_v18  ;;  %v5182_v24 = vpack.c.bf16 %v3126_v22, %v3126_v22  ;;  %v3001_v25 = vsel %vm2489_vm7, %v5450_v8, %v2745_v20  ;;  %vm2487_vm9 = vcmp.gt.f32.partialorder %v1802_v13, 0.0  ;;  %v2743_v26 = vmul.f32 0.2, %v1802_v13  ;;  %v1815_v35 = vpop.f32.mrb[117].mxu0 }
 0x1cc   :  { %4279 = vst.msk [vmem:[%s7293_s2 + $0x1c0] sm:$0xf] %vm4166_vm3, %v5054_v21  ;;  %v5057_v27 = vpack.c.bf16 %v3001_v25, %v3001_v25  ;;  %v3129_v28 = vsel %vm2617_vm8, %v5578_v9, %v2873_v23  ;;  %vm2615_vm10 = vcmp.gt.f32.partialorder %v2314_v14, 0.0  ;;  %v2871_v29 = vmul.f32 0.2, %v2314_v14  ;;  %v2327_v36 = vpop.f32.mrb[117].mxu1 }
 0x1cd   :  { %4407 = vst.msk [vmem:[%s7293_s2 + $0x3c0] sm:$0xf] %vm4166_vm3, %v5182_v24  ;;  %v5185_v32 = vpack.c.bf16 %v3129_v28, %v3129_v28  ;;  %v2999_v33 = vsel %vm2487_vm9, %v1802_v13, %v2743_v26  ;;  %vm2492_vm11 = vcmp.gt.f32.partialorder %v5453_v30, 0.0  ;;  %v2748_v34 = vmul.f32 0.2, %v5453_v30  ;;  %v5454_v40 = vpop.f32.mrb[118].mxu0 }
 0x1ce   :  { %4282 = vst.msk [vmem:[%s7293_s2 + $0x1cc] sm:$0xf] %vm4166_vm3, %v5057_v27  ;;  %v5055_v37 = vpack.c.bf16 %v2999_v33, %v2999_v33  ;;  %v3127_v38 = vsel %vm2615_vm10, %v2314_v14, %v2871_v29  ;;  %vm2620_vm12 = vcmp.gt.f32.partialorder %v5581_v31, 0.0  ;;  %v2876_v39 = vmul.f32 0.2, %v5581_v31  ;;  %v5582_v41 = vpop.f32.mrb[118].mxu1 }
 0x1cf   :  { %4410 = vst.msk [vmem:[%s7293_s2 + $0x3cc] sm:$0xf] %vm4166_vm3, %v5185_v32  ;;  %v5183_v42 = vpack.c.bf16 %v3127_v38, %v3127_v38  ;;  %v3004_v43 = vsel %vm2492_vm11, %v5453_v30, %v2748_v34  ;;  %vm2490_vm0 = vcmp.gt.f32.partialorder %v1815_v35, 0.0  ;;  %v2746_v44 = vmul.f32 0.2, %v1815_v35  ;;  %v1818_v45 = vpop.f32.mrb[119].mxu0 }
 0x1d0   :  { %v2330_v46 = vpop.f32.mrb[119].mxu1  ;;  %4280 = vst.msk [vmem:[%s7293_s2 + $0x1c4] sm:$0xf] %vm4166_vm3, %v5055_v37  ;;  %v5060_v47 = vpack.c.bf16 %v3004_v43, %v3004_v43  ;;  %v3132_v48 = vsel %vm2620_vm12, %v5581_v31, %v2876_v39  ;;  %vm2618_vm13 = vcmp.gt.f32.partialorder %v2327_v36, 0.0  ;;  %v2874_v49 = vmul.f32 0.2, %v2327_v36 }
 0x1d1   :  { %4408 = vst.msk [vmem:[%s7293_s2 + $0x3c4] sm:$0xf] %vm4166_vm3, %v5183_v42  ;;  %v5188_v50 = vpack.c.bf16 %v3132_v48, %v3132_v48  ;;  %v3002_v51 = vsel %vm2490_vm0, %v1815_v35, %v2746_v44  ;;  %vm2493_vm14 = vcmp.gt.f32.partialorder %v5454_v40, 0.0  ;;  %v2749_v52 = vmul.f32 0.2, %v5454_v40  ;;  %v5457_v62 = vpop.f32.mrb[120].mxu0 }
 0x1d2   :  { %4285 = vst.msk [vmem:[%s7293_s2 + $0x1d8] sm:$0xf] %vm4166_vm3, %v5060_v47  ;;  %v5058_v53 = vpack.c.bf16 %v3002_v51, %v3002_v51  ;;  %v3130_v54 = vsel %vm2618_vm13, %v2327_v36, %v2874_v49  ;;  %vm2621_vm15 = vcmp.gt.f32.partialorder %v5582_v41, 0.0  ;;  %v2877_v55 = vmul.f32 0.2, %v5582_v41  ;;  %v5585_v63 = vpop.f32.mrb[120].mxu1 }
 0x1d3   :  { %4413 = vst.msk [vmem:[%s7293_s2 + $0x3d8] sm:$0xf] %vm4166_vm3, %v5188_v50  ;;  %v5186_v56 = vpack.c.bf16 %v3130_v54, %v3130_v54  ;;  %v3005_v57 = vsel %vm2493_vm14, %v5454_v40, %v2749_v52  ;;  %vm2491_vm1 = vcmp.gt.f32.partialorder %v1818_v45, 0.0  ;;  %v2747_v58 = vmul.f32 0.2, %v1818_v45  ;;  %v1831_v3 = vpop.f32.mrb[121].mxu0 }
 0x1d4   :  { %4283 = vst.msk [vmem:[%s7293_s2 + $0x1d0] sm:$0xf] %vm4166_vm3, %v5058_v53  ;;  %v5061_v59 = vpack.c.bf16 %v3005_v57, %v3005_v57  ;;  %v3133_v60 = vsel %vm2621_vm15, %v5582_v41, %v2877_v55  ;;  %vm2619_vm2 = vcmp.gt.f32.partialorder %v2330_v46, 0.0  ;;  %v2875_v61 = vmul.f32 0.2, %v2330_v46  ;;  %v2343_v4 = vpop.f32.mrb[121].mxu1 }
 0x1d5   :  { %4411 = vst.msk [vmem:[%s7293_s2 + $0x3d0] sm:$0xf] %vm4166_vm3, %v5186_v56  ;;  %v5189_v0 = vpack.c.bf16 %v3133_v60, %v3133_v60  ;;  %v3003_v1 = vsel %vm2491_vm1, %v1818_v45, %v2747_v58  ;;  %vm2496_vm4 = vcmp.gt.f32.partialorder %v5457_v62, 0.0  ;;  %v2752_v2 = vmul.f32 0.2, %v5457_v62  ;;  %v5458_v8 = vpop.f32.mrb[122].mxu0 }
 0x1d6   :  { %4286 = vst.msk [vmem:[%s7293_s2 + $0x1dc] sm:$0xf] %vm4166_vm3, %v5061_v59  ;;  %v5059_v5 = vpack.c.bf16 %v3003_v1, %v3003_v1  ;;  %v3131_v6 = vsel %vm2619_vm2, %v2330_v46, %v2875_v61  ;;  %vm2624_vm5 = vcmp.gt.f32.partialorder %v5585_v63, 0.0  ;;  %v2880_v7 = vmul.f32 0.2, %v5585_v63  ;;  %v5586_v9 = vpop.f32.mrb[122].mxu1 }
 0x1d7   :  { %4414 = vst.msk [vmem:[%s7293_s2 + $0x3dc] sm:$0xf] %vm4166_vm3, %v5189_v0  ;;  %v5187_v10 = vpack.c.bf16 %v3131_v6, %v3131_v6  ;;  %v3008_v11 = vsel %vm2496_vm4, %v5457_v62, %v2752_v2  ;;  %vm2494_vm6 = vcmp.gt.f32.partialorder %v1831_v3, 0.0  ;;  %v2750_v12 = vmul.f32 0.2, %v1831_v3  ;;  %v1834_v13 = vpop.f32.mrb[123].mxu0 }
 0x1d8   :  { %v2346_v14 = vpop.f32.mrb[123].mxu1  ;;  %4284 = vst.msk [vmem:[%s7293_s2 + $0x1d4] sm:$0xf] %vm4166_vm3, %v5059_v5  ;;  %v5064_v15 = vpack.c.bf16 %v3008_v11, %v3008_v11  ;;  %v3136_v16 = vsel %vm2624_vm5, %v5585_v63, %v2880_v7  ;;  %vm2622_vm7 = vcmp.gt.f32.partialorder %v2343_v4, 0.0  ;;  %v2878_v17 = vmul.f32 0.2, %v2343_v4 }
 0x1d9   :  { %4412 = vst.msk [vmem:[%s7293_s2 + $0x3d4] sm:$0xf] %vm4166_vm3, %v5187_v10  ;;  %v5192_v18 = vpack.c.bf16 %v3136_v16, %v3136_v16  ;;  %v3006_v19 = vsel %vm2494_vm6, %v1831_v3, %v2750_v12  ;;  %vm2497_vm8 = vcmp.gt.f32.partialorder %v5458_v8, 0.0  ;;  %v2753_v20 = vmul.f32 0.2, %v5458_v8  ;;  %v5461_v30 = vpop.f32.mrb[124].mxu0 }
 0x1da   :  { %4289 = vst.msk [vmem:[%s7293_s2 + $0x1e8] sm:$0xf] %vm4166_vm3, %v5064_v15  ;;  %v5062_v21 = vpack.c.bf16 %v3006_v19, %v3006_v19  ;;  %v3134_v22 = vsel %vm2622_vm7, %v2343_v4, %v2878_v17  ;;  %vm2625_vm9 = vcmp.gt.f32.partialorder %v5586_v9, 0.0  ;;  %v2881_v23 = vmul.f32 0.2, %v5586_v9  ;;  %v5589_v31 = vpop.f32.mrb[124].mxu1 }
 0x1db   :  { %4417 = vst.msk [vmem:[%s7293_s2 + $0x3e8] sm:$0xf] %vm4166_vm3, %v5192_v18  ;;  %v5190_v24 = vpack.c.bf16 %v3134_v22, %v3134_v22  ;;  %v3009_v25 = vsel %vm2497_vm8, %v5458_v8, %v2753_v20  ;;  %vm2495_vm10 = vcmp.gt.f32.partialorder %v1834_v13, 0.0  ;;  %v2751_v26 = vmul.f32 0.2, %v1834_v13  ;;  %v1847_v35 = vpop.f32.mrb[125].mxu0 }
 0x1dc   :  { %4287 = vst.msk [vmem:[%s7293_s2 + $0x1e0] sm:$0xf] %vm4166_vm3, %v5062_v21  ;;  %v5065_v27 = vpack.c.bf16 %v3009_v25, %v3009_v25  ;;  %v3137_v28 = vsel %vm2625_vm9, %v5586_v9, %v2881_v23  ;;  %vm2623_vm11 = vcmp.gt.f32.partialorder %v2346_v14, 0.0  ;;  %v2879_v29 = vmul.f32 0.2, %v2346_v14  ;;  %v2359_v36 = vpop.f32.mrb[125].mxu1 }
 0x1dd   :  { %4415 = vst.msk [vmem:[%s7293_s2 + $0x3e0] sm:$0xf] %vm4166_vm3, %v5190_v24  ;;  %v5193_v32 = vpack.c.bf16 %v3137_v28, %v3137_v28  ;;  %v3007_v33 = vsel %vm2495_vm10, %v1834_v13, %v2751_v26  ;;  %vm2500_vm12 = vcmp.gt.f32.partialorder %v5461_v30, 0.0  ;;  %v2756_v34 = vmul.f32 0.2, %v5461_v30  ;;  %v5462_v40 = vpop.f32.mrb[126].mxu0 }
 0x1de   :  { %4290 = vst.msk [vmem:[%s7293_s2 + $0x1ec] sm:$0xf] %vm4166_vm3, %v5065_v27  ;;  %v5063_v37 = vpack.c.bf16 %v3007_v33, %v3007_v33  ;;  %v3135_v38 = vsel %vm2623_vm11, %v2346_v14, %v2879_v29  ;;  %vm2628_vm0 = vcmp.gt.f32.partialorder %v5589_v31, 0.0  ;;  %v2884_v39 = vmul.f32 0.2, %v5589_v31  ;;  %v5590_v41 = vpop.f32.mrb[126].mxu1 }
 0x1df   :  { %4418 = vst.msk [vmem:[%s7293_s2 + $0x3ec] sm:$0xf] %vm4166_vm3, %v5193_v32  ;;  %v5191_v42 = vpack.c.bf16 %v3135_v38, %v3135_v38  ;;  %v3012_v43 = vsel %vm2500_vm12, %v5461_v30, %v2756_v34  ;;  %vm2498_vm13 = vcmp.gt.f32.partialorder %v1847_v35, 0.0  ;;  %v2754_v44 = vmul.f32 0.2, %v1847_v35  ;;  %v1850_v45 = vpop.f32.mrb[127].mxu0 }
 0x1e0   :  { %v2362_v46 = vpop.f32.mrb[127].mxu1  ;;  %4288 = vst.msk [vmem:[%s7293_s2 + $0x1e4] sm:$0xf] %vm4166_vm3, %v5063_v37  ;;  %v5068_v47 = vpack.c.bf16 %v3012_v43, %v3012_v43  ;;  %v3140_v48 = vsel %vm2628_vm0, %v5589_v31, %v2884_v39  ;;  %vm2626_vm14 = vcmp.gt.f32.partialorder %v2359_v36, 0.0  ;;  %v2882_v49 = vmul.f32 0.2, %v2359_v36 }
 0x1e1   :  { %4416 = vst.msk [vmem:[%s7293_s2 + $0x3e4] sm:$0xf] %vm4166_vm3, %v5191_v42  ;;  %v5196_v50 = vpack.c.bf16 %v3140_v48, %v3140_v48  ;;  %v3010_v51 = vsel %vm2498_vm13, %v1847_v35, %v2754_v44  ;;  %vm2501_vm15 = vcmp.gt.f32.partialorder %v5462_v40, 0.0  ;;  %v2757_v52 = vmul.f32 0.2, %v5462_v40 }
 0x1e2   :  { %4293 = vst.msk [vmem:[%s7293_s2 + $0x1f8] sm:$0xf] %vm4166_vm3, %v5068_v47  ;;  %v5066_v53 = vpack.c.bf16 %v3010_v51, %v3010_v51  ;;  %v3138_v54 = vsel %vm2626_vm14, %v2359_v36, %v2882_v49  ;;  %vm2629_vm1 = vcmp.gt.f32.partialorder %v5590_v41, 0.0  ;;  %v2885_v55 = vmul.f32 0.2, %v5590_v41 }
 0x1e3   :  { %4421 = vst.msk [vmem:[%s7293_s2 + $0x3f8] sm:$0xf] %vm4166_vm3, %v5196_v50  ;;  %v5194_v56 = vpack.c.bf16 %v3138_v54, %v3138_v54  ;;  %v3013_v57 = vsel %vm2501_vm15, %v5462_v40, %v2757_v52  ;;  %vm2499_vm2 = vcmp.gt.f32.partialorder %v1850_v45, 0.0  ;;  %v2755_v58 = vmul.f32 0.2, %v1850_v45 }
 0x1e4   :  { %4291 = vst.msk [vmem:[%s7293_s2 + $0x1f0] sm:$0xf] %vm4166_vm3, %v5066_v53  ;;  %v5069_v59 = vpack.c.bf16 %v3013_v57, %v3013_v57  ;;  %v3141_v60 = vsel %vm2629_vm1, %v5590_v41, %v2885_v55  ;;  %vm2627_vm4 = vcmp.gt.f32.partialorder %v2362_v46, 0.0  ;;  %v2883_v61 = vmul.f32 0.2, %v2362_v46 }
 0x1e5   :  { %4419 = vst.msk [vmem:[%s7293_s2 + $0x3f0] sm:$0xf] %vm4166_vm3, %v5194_v56  ;;  %v5197_v62 = vpack.c.bf16 %v3141_v60, %v3141_v60  ;;  %v3011_v63 = vsel %vm2499_vm2, %v1850_v45, %v2755_v58 }
 0x1e6   :  { %4294 = vst.msk [vmem:[%s7293_s2 + $0x1fc] sm:$0xf] %vm4166_vm3, %v5069_v59  ;;  %v5067_v0 = vpack.c.bf16 %v3011_v63, %v3011_v63  ;;  %v3139_v1 = vsel %vm2627_vm4, %v2362_v46, %v2883_v61 }
 0x1e7   :  { %4422 = vst.msk [vmem:[%s7293_s2 + $0x3fc] sm:$0xf] %vm4166_vm3, %v5197_v62  ;;  %v5195_v2 = vpack.c.bf16 %v3139_v1, %v3139_v1 }
 0x1e8   :  { %4292 = vst.msk [vmem:[%s7293_s2 + $0x1f4] sm:$0xf] %vm4166_vm3, %v5067_v0 }
 0x1e9   :  { %4420 = vst.msk [vmem:[%s7293_s2 + $0x3f4] sm:$0xf] %vm4166_vm3, %v5195_v2 }

// kernel: discriminator_forward.8
= control target key start
LH: loop header
LB: loop body
LE: loop exit
PB: predicated region body
PF: predicated region fallthrough
CT: control target
= control target key end

     0   :  { %vm623_vm0 = vcmask 130048   ;;  %vm1018_vm1 = vcmask 1040384   ;;  %vm1020_vm2 = vcmask 123904   ;;  %s1965_s1 = inlined_call_operand.vmem [shape: bf16[128,16], index: 1, kind: input, shape index: {}]   ;;  %s1966_s0 = inlined_call_operand.vmem [shape: bf16[512,128], index: 0, kind: input, shape index: {}]   ;;  %s1967_s2 = inlined_call_operand.vmem [shape: f32[512,16], index: 2, kind: output, shape index: {0}]   ;;  %s1968_s3 = inlined_call_operand.vmem [shape: f32[1,2,16], index: 3, kind: output, shape index: {1}]  }
   0x1   :  { %v1206_v0 = vld [vmem:[%s1965_s1] sm:$0xff]   ;;  %v1207_v1 = vld [vmem:[%s1965_s1 + $0x8] sm:$0xff]   ;;  %v1208_v2 = vld [vmem:[%s1965_s1 + $0x10] sm:$0xff]  }
   0x2   :  { %1110 = vmatprep.subr.bf16.mxu0 %v1206_v0  ;;  %1190 = vmatprep.subr.bf16.mxu1 %v1206_v0  ;;  %v1209_v3 = vld [vmem:[%s1965_s1 + $0x18] sm:$0xff]   ;;  %v1214_v4 = vld [vmem:[%s1966_s0] sm:$0xff]   ;;  %v1211_v6 = vld [vmem:[%s1965_s1 + $0x28] sm:$0xff]  }
   0x3   :  { %1111 = vmatpush3.bf16.msra.mxu0 %v1206_v0  ;;  %1198 = vmatpush3.bf16.msra.mxu1 %v1206_v0  ;;  %v1210_v5 = vld [vmem:[%s1965_s1 + $0x20] sm:$0xff]   ;;  %v1212_v7 = vld [vmem:[%s1965_s1 + $0x30] sm:$0xff]   ;;  %v1213_v8 = vld [vmem:[%s1965_s1 + $0x38] sm:$0xff]  }
   0x4   :  { %1112 = vmatprep.subr.bf16.mxu0 %v1207_v1  ;;  %1191 = vmatprep.subr.bf16.mxu1 %v1207_v1  ;;  %v1230_v9 = vld [vmem:[%s1966_s0 + $0x80] sm:$0xff]   ;;  %v1215_v10 = vld [vmem:[%s1966_s0 + $0x8] sm:$0xff]   ;;  %v1216_v11 = vld [vmem:[%s1966_s0 + $0x10] sm:$0xff]  }
   0x5   :  { %1126 = vmatprep.mubr.bf16.mxu0 %v1214_v4  ;;  %1158 = vmatprep.mubr.bf16.mxu1 %v1230_v9  ;;  %v1231_v12 = vld [vmem:[%s1966_s0 + $0x88] sm:$0xff]   ;;  %v1232_v13 = vld [vmem:[%s1966_s0 + $0x90] sm:$0xff]   ;;  %v1217_v14 = vld [vmem:[%s1966_s0 + $0x18] sm:$0xff]  }
   0x6   :  { %v1218_v15 = vld [vmem:[%s1966_s0 + $0x20] sm:$0xff]   ;;  %v1233_v16 = vld [vmem:[%s1966_s0 + $0x98] sm:$0xff]   ;;  %v1219_v18 = vld [vmem:[%s1966_s0 + $0x28] sm:$0xff]  }
   0x7   :  { %1113 = vmatpush3.bf16.msra.mxu0 %v1207_v1  ;;  %1199 = vmatpush3.bf16.msra.mxu1 %v1207_v1  ;;  %v1234_v17 = vld [vmem:[%s1966_s0 + $0xa0] sm:$0xff]   ;;  %v1235_v19 = vld [vmem:[%s1966_s0 + $0xa8] sm:$0xff]   ;;  %v1220_v20 = vld [vmem:[%s1966_s0 + $0x30] sm:$0xff]  }
   0x8   :  { %1114 = vmatprep.subr.bf16.mxu0 %v1208_v2  ;;  %1192 = vmatprep.subr.bf16.mxu1 %v1208_v2  ;;  %v1236_v21 = vld [vmem:[%s1966_s0 + $0xb0] sm:$0xff]   ;;  %v1221_v22 = vld [vmem:[%s1966_s0 + $0x38] sm:$0xff]   ;;  %v1222_v24 = vld [vmem:[%s1966_s0 + $0x40] sm:$0xff]  }
   0x9   :  { %v1237_v23 = vld [vmem:[%s1966_s0 + $0xb8] sm:$0xff]   ;;  %v1238_v25 = vld [vmem:[%s1966_s0 + $0xc0] sm:$0xff]   ;;  %v1223_v26 = vld [vmem:[%s1966_s0 + $0x48] sm:$0xff]  }
   0xa   :  { %v1239_v27 = vld [vmem:[%s1966_s0 + $0xc8] sm:$0xff]   ;;  %v1224_v28 = vld [vmem:[%s1966_s0 + $0x50] sm:$0xff]   ;;  %v1225_v30 = vld [vmem:[%s1966_s0 + $0x58] sm:$0xff]  }
   0xb   :  { %1115 = vmatpush3.bf16.msra.mxu0 %v1208_v2  ;;  %1200 = vmatpush3.bf16.msra.mxu1 %v1208_v2  ;;  %v1240_v29 = vld [vmem:[%s1966_s0 + $0xd0] sm:$0xff]   ;;  %v1241_v31 = vld [vmem:[%s1966_s0 + $0xd8] sm:$0xff]   ;;  %v1226_v32 = vld [vmem:[%s1966_s0 + $0x60] sm:$0xff]  }
   0xc   :  { %1116 = vmatprep.subr.bf16.mxu0 %v1209_v3  ;;  %1193 = vmatprep.subr.bf16.mxu1 %v1209_v3  ;;  %v1242_v33 = vld [vmem:[%s1966_s0 + $0xe0] sm:$0xff]   ;;  %v1227_v34 = vld [vmem:[%s1966_s0 + $0x68] sm:$0xff]   ;;  %v1228_v36 = vld [vmem:[%s1966_s0 + $0x70] sm:$0xff]  }
   0xd   :  { %v1243_v35 = vld [vmem:[%s1966_s0 + $0xe8] sm:$0xff]   ;;  %v1244_v37 = vld [vmem:[%s1966_s0 + $0xf0] sm:$0xff]   ;;  %v1229_v38 = vld [vmem:[%s1966_s0 + $0x78] sm:$0xff]  }
   0xe   :  { %v1245_v39 = vld [vmem:[%s1966_s0 + $0xf8] sm:$0xff]  }
   0xf   :  { %1117 = vmatpush3.bf16.msra.mxu0 %v1209_v3  ;;  %1201 = vmatpush3.bf16.msra.mxu1 %v1209_v3 }
  0x10   :  { %1118 = vmatprep.subr.bf16.mxu0 %v1210_v5  ;;  %1194 = vmatprep.subr.bf16.mxu1 %v1210_v5 }
  0x13   :  { %1119 = vmatpush3.bf16.msra.mxu0 %v1210_v5  ;;  %1202 = vmatpush3.bf16.msra.mxu1 %v1210_v5 }
  0x14   :  { %1120 = vmatprep.subr.bf16.mxu0 %v1211_v6  ;;  %1195 = vmatprep.subr.bf16.mxu1 %v1211_v6 }
  0x17   :  { %1121 = vmatpush3.bf16.msra.mxu0 %v1211_v6  ;;  %1203 = vmatpush3.bf16.msra.mxu1 %v1211_v6 }
  0x18   :  { %1122 = vmatprep.subr.bf16.mxu0 %v1212_v7  ;;  %1196 = vmatprep.subr.bf16.mxu1 %v1212_v7 }
  0x1b   :  { %1123 = vmatpush3.bf16.msra.mxu0 %v1212_v7  ;;  %1204 = vmatpush3.bf16.msra.mxu1 %v1212_v7 }
  0x1c   :  { %1124 = vmatprep.subr.bf16.mxu0 %v1213_v8  ;;  %1197 = vmatprep.subr.bf16.mxu1 %v1213_v8 }
  0x1f   :  { %1125 = vmatpush3.bf16.msra.mxu0 %v1213_v8  ;;  %1205 = vmatpush3.bf16.msra.mxu1 %v1213_v8 }
  0x22   :  { %1127 = vmatmul.mubr.bf16.vlgmr.msra.gmra.mrb[0].mxu0 %v1215_v10  ;;  %1159 = vmatmul.mubr.bf16.vlgmr.msra.gmra.mrb[0].mxu1 %v1231_v12 }
  0x23   :  { %1130 = vmatprep.mubr.bf16.mxu0 %v1216_v11  ;;  %1162 = vmatprep.mubr.bf16.mxu1 %v1232_v13 }
  0x2a   :  { %1131 = vmatmul.mubr.bf16.gmra.mrb[4].mxu0 %v1217_v14  ;;  %1163 = vmatmul.mubr.bf16.gmra.mrb[4].mxu1 %v1233_v16 }
  0x2b   :  { %1134 = vmatprep.mubr.bf16.mxu0 %v1218_v15  ;;  %1166 = vmatprep.mubr.bf16.mxu1 %v1234_v17 }
  0x32   :  { %1135 = vmatmul.mubr.bf16.gmra.mrb[8].mxu0 %v1219_v18  ;;  %1167 = vmatmul.mubr.bf16.gmra.mrb[8].mxu1 %v1235_v19 }
  0x33   :  { %1138 = vmatprep.mubr.bf16.mxu0 %v1220_v20  ;;  %1170 = vmatprep.mubr.bf16.mxu1 %v1236_v21 }
  0x3a   :  { %1139 = vmatmul.mubr.bf16.gmra.mrb[12].mxu0 %v1221_v22  ;;  %1171 = vmatmul.mubr.bf16.gmra.mrb[12].mxu1 %v1237_v23 }
  0x3b   :  { %1142 = vmatprep.mubr.bf16.mxu0 %v1222_v24  ;;  %1174 = vmatprep.mubr.bf16.mxu1 %v1238_v25 }
  0x42   :  { %1143 = vmatmul.mubr.bf16.gmra.mrb[16].mxu0 %v1223_v26  ;;  %1175 = vmatmul.mubr.bf16.gmra.mrb[16].mxu1 %v1239_v27 }
  0x43   :  { %1146 = vmatprep.mubr.bf16.mxu0 %v1224_v28  ;;  %1178 = vmatprep.mubr.bf16.mxu1 %v1240_v29 }
  0x4a   :  { %1147 = vmatmul.mubr.bf16.gmra.mrb[20].mxu0 %v1225_v30  ;;  %1179 = vmatmul.mubr.bf16.gmra.mrb[20].mxu1 %v1241_v31 }
  0x4b   :  { %1150 = vmatprep.mubr.bf16.mxu0 %v1226_v32  ;;  %1182 = vmatprep.mubr.bf16.mxu1 %v1242_v33 }
  0x52   :  { %1151 = vmatmul.mubr.bf16.gmra.mrb[24].mxu0 %v1227_v34  ;;  %1183 = vmatmul.mubr.bf16.gmra.mrb[24].mxu1 %v1243_v35 }
  0x53   :  { %1154 = vmatprep.mubr.bf16.mxu0 %v1228_v36  ;;  %1186 = vmatprep.mubr.bf16.mxu1 %v1244_v37 }
  0x5a   :  { %1155 = vmatmul.mubr.bf16.gmra.mrb[28].mxu0 %v1229_v38  ;;  %1187 = vmatmul.mubr.bf16.gmra.mrb[28].mxu1 %v1245_v39 }
  0xf5   :  { %v1128_v40 = vpop.f32.mrb[0].mxu0  ;;  %v1386_v41 = vpop.f32.mrb[0].mxu1 }
  0xf6   :  { %626 = vst.msk [vmem:[%s1967_s2 + $0x10] sm:$0xff] %vm623_vm0, %v1128_v40  ;;  %v368_v42 = vpop.f32.mrb[1].mxu0  ;;  %658 = vst.msk [vmem:[%s1967_s2 + $0x110] sm:$0xff] %vm623_vm0, %v1386_v41  ;;  %v1397_v43 = vpop.f32.mrb[1].mxu1  ;;  %v823_v49 = vmul.f32 %v1128_v40, %v1128_v40  ;;  %v691_v54 = vsel %vm623_vm0, %v1128_v40, 0.0 }
  0xf7   :  { %624 = vst.msk [vmem:[%s1967_s2] sm:$0xff] %vm623_vm0, %v368_v42  ;;  %v821_v44 = vmul.f32 %v368_v42, %v368_v42  ;;  %v1129_v45 = vpop.f32.mrb[2].mxu0  ;;  %656 = vst.msk [vmem:[%s1967_s2 + $0x100] sm:$0xff] %vm623_vm0, %v1397_v43  ;;  %v1408_v46 = vpop.f32.mrb[2].mxu1  ;;  %v688_v50 = vsel %vm623_vm0, %v368_v42, 0.0 }
  0xf8   :  { %627 = vst.msk [vmem:[%s1967_s2 + $0x18] sm:$0xff] %vm623_vm0, %v1129_v45  ;;  %v371_v47 = vpop.f32.mrb[3].mxu0  ;;  %659 = vst.msk [vmem:[%s1967_s2 + $0x118] sm:$0xff] %vm623_vm0, %v1408_v46  ;;  %v1419_v48 = vpop.f32.mrb[3].mxu1  ;;  %v824_v56 = vmul.f32 %v1129_v45, %v1129_v45  ;;  %v888_v60 = vsel %vm623_vm0, %v823_v49, 0.0  ;;  %v693_v61 = vsel %vm623_vm0, %v1129_v45, 0.0 }
  0xf9   :  { %625 = vst.msk [vmem:[%s1967_s2 + $0x8] sm:$0xff] %vm623_vm0, %v371_v47  ;;  %v689_v51 = vsel %vm623_vm0, %v371_v47, 0.0  ;;  %v822_v52 = vmul.f32 %v371_v47, %v371_v47  ;;  %657 = vst.msk [vmem:[%s1967_s2 + $0x108] sm:$0xff] %vm623_vm0, %v1419_v48  ;;  %v885_v55 = vsel %vm623_vm0, %v821_v44, 0.0 }
  0xfa   :  { %v690_v53 = vadd.f32 %v689_v51, %v688_v50  ;;  %v890_v4 = vsel %vm623_vm0, %v824_v56, 0.0 }
  0xfb   :  { %v886_v57 = vsel %vm623_vm0, %v822_v52, 0.0 }
  0xfc   :  { %v692_v58 = vadd.f32 %v691_v54, %v690_v53  ;;  %v887_v59 = vadd.f32 %v886_v57, %v885_v55 }
  0xfd   :  { %v1132_v62 = vpop.f32.mrb[4].mxu0  ;;  %v1437_v63 = vpop.f32.mrb[4].mxu1 }
  0xfe   :  { %v889_v0 = vadd.f32 %v888_v60, %v887_v59  ;;  %630 = vst.msk [vmem:[%s1967_s2 + $0x30] sm:$0xff] %vm623_vm0, %v1132_v62  ;;  %v384_v1 = vpop.f32.mrb[5].mxu0  ;;  %v694_v2 = vadd.f32 %v693_v61, %v692_v58  ;;  %662 = vst.msk [vmem:[%s1967_s2 + $0x130] sm:$0xff] %vm623_vm0, %v1437_v63  ;;  %v1448_v3 = vpop.f32.mrb[5].mxu1  ;;  %v827_v13 = vmul.f32 %v1132_v62, %v1132_v62  ;;  %v699_v19 = vsel %vm623_vm0, %v1132_v62, 0.0 }
  0xff   :  { %628 = vst.msk [vmem:[%s1967_s2 + $0x20] sm:$0xff] %vm623_vm0, %v384_v1  ;;  %v695_v5 = vsel %vm623_vm0, %v384_v1, 0.0  ;;  %v825_v6 = vmul.f32 %v384_v1, %v384_v1  ;;  %v1133_v7 = vpop.f32.mrb[6].mxu0  ;;  %660 = vst.msk [vmem:[%s1967_s2 + $0x120] sm:$0xff] %vm623_vm0, %v1448_v3  ;;  %v1461_v8 = vpop.f32.mrb[6].mxu1 }
 0x100   :  { %v696_v9 = vadd.f32 %v695_v5, %v694_v2  ;;  %v891_v10 = vadd.f32 %v890_v4, %v889_v0  ;;  %631 = vst.msk [vmem:[%s1967_s2 + $0x38] sm:$0xff] %vm623_vm0, %v1133_v7  ;;  %v387_v11 = vpop.f32.mrb[7].mxu0  ;;  %663 = vst.msk [vmem:[%s1967_s2 + $0x138] sm:$0xff] %vm623_vm0, %v1461_v8  ;;  %v1472_v12 = vpop.f32.mrb[7].mxu1  ;;  %v828_v20 = vmul.f32 %v1133_v7, %v1133_v7  ;;  %v896_v24 = vsel %vm623_vm0, %v827_v13, 0.0 }
 0x101   :  { %v892_v14 = vsel %vm623_vm0, %v825_v6, 0.0  ;;  %629 = vst.msk [vmem:[%s1967_s2 + $0x28] sm:$0xff] %vm623_vm0, %v387_v11  ;;  %v697_v15 = vsel %vm623_vm0, %v387_v11, 0.0  ;;  %v826_v16 = vmul.f32 %v387_v11, %v387_v11  ;;  %661 = vst.msk [vmem:[%s1967_s2 + $0x128] sm:$0xff] %vm623_vm0, %v1472_v12  ;;  %v701_v25 = vsel %vm623_vm0, %v1133_v7, 0.0 }
 0x102   :  { %v893_v17 = vadd.f32 %v892_v14, %v891_v10  ;;  %v698_v18 = vadd.f32 %v697_v15, %v696_v9  ;;  %v898_v32 = vsel %vm623_vm0, %v828_v20, 0.0 }
 0x103   :  { %v894_v21 = vsel %vm623_vm0, %v826_v16, 0.0 }
 0x104   :  { %v700_v22 = vadd.f32 %v699_v19, %v698_v18  ;;  %v895_v23 = vadd.f32 %v894_v21, %v893_v17 }
 0x105   :  { %v1136_v26 = vpop.f32.mrb[8].mxu0  ;;  %v1489_v27 = vpop.f32.mrb[8].mxu1 }
 0x106   :  { %v897_v28 = vadd.f32 %v896_v24, %v895_v23  ;;  %634 = vst.msk [vmem:[%s1967_s2 + $0x50] sm:$0xff] %vm623_vm0, %v1136_v26  ;;  %v400_v29 = vpop.f32.mrb[9].mxu0  ;;  %v702_v30 = vadd.f32 %v701_v25, %v700_v22  ;;  %666 = vst.msk [vmem:[%s1967_s2 + $0x150] sm:$0xff] %vm623_vm0, %v1489_v27  ;;  %v1500_v31 = vpop.f32.mrb[9].mxu1  ;;  %v831_v42 = vmul.f32 %v1136_v26, %v1136_v26  ;;  %v707_v51 = vsel %vm623_vm0, %v1136_v26, 0.0 }
 0x107   :  { %632 = vst.msk [vmem:[%s1967_s2 + $0x40] sm:$0xff] %vm623_vm0, %v400_v29  ;;  %v703_v33 = vsel %vm623_vm0, %v400_v29, 0.0  ;;  %v829_v34 = vmul.f32 %v400_v29, %v400_v29  ;;  %v1137_v35 = vpop.f32.mrb[10].mxu0  ;;  %664 = vst.msk [vmem:[%s1967_s2 + $0x140] sm:$0xff] %vm623_vm0, %v1500_v31  ;;  %v1513_v36 = vpop.f32.mrb[10].mxu1 }
 0x108   :  { %v704_v37 = vadd.f32 %v703_v33, %v702_v30  ;;  %v899_v38 = vadd.f32 %v898_v32, %v897_v28  ;;  %635 = vst.msk [vmem:[%s1967_s2 + $0x58] sm:$0xff] %vm623_vm0, %v1137_v35  ;;  %v403_v39 = vpop.f32.mrb[11].mxu0  ;;  %667 = vst.msk [vmem:[%s1967_s2 + $0x158] sm:$0xff] %vm623_vm0, %v1513_v36  ;;  %v1524_v40 = vpop.f32.mrb[11].mxu1  ;;  %v832_v52 = vmul.f32 %v1137_v35, %v1137_v35  ;;  %v904_v56 = vsel %vm623_vm0, %v831_v42, 0.0 }
 0x109   :  { %v900_v44 = vsel %vm623_vm0, %v829_v34, 0.0  ;;  %633 = vst.msk [vmem:[%s1967_s2 + $0x48] sm:$0xff] %vm623_vm0, %v403_v39  ;;  %v705_v45 = vsel %vm623_vm0, %v403_v39, 0.0  ;;  %v830_v47 = vmul.f32 %v403_v39, %v403_v39  ;;  %665 = vst.msk [vmem:[%s1967_s2 + $0x148] sm:$0xff] %vm623_vm0, %v1524_v40  ;;  %v709_v57 = vsel %vm623_vm0, %v1137_v35, 0.0 }
 0x10a   :  { %v901_v49 = vadd.f32 %v900_v44, %v899_v38  ;;  %v706_v50 = vadd.f32 %v705_v45, %v704_v37  ;;  %v906_v1 = vsel %vm623_vm0, %v832_v52, 0.0 }
 0x10b   :  { %v902_v53 = vsel %vm623_vm0, %v830_v47, 0.0 }
 0x10c   :  { %v708_v54 = vadd.f32 %v707_v51, %v706_v50  ;;  %v903_v55 = vadd.f32 %v902_v53, %v901_v49 }
 0x10d   :  { %v1140_v58 = vpop.f32.mrb[12].mxu0  ;;  %v1541_v59 = vpop.f32.mrb[12].mxu1 }
 0x10e   :  { %v905_v60 = vadd.f32 %v904_v56, %v903_v55  ;;  %638 = vst.msk [vmem:[%s1967_s2 + $0x70] sm:$0xff] %vm623_vm0, %v1140_v58  ;;  %v416_v61 = vpop.f32.mrb[13].mxu0  ;;  %v710_v62 = vadd.f32 %v709_v57, %v708_v54  ;;  %670 = vst.msk [vmem:[%s1967_s2 + $0x170] sm:$0xff] %vm623_vm0, %v1541_v59  ;;  %v1552_v0 = vpop.f32.mrb[13].mxu1  ;;  %v835_v13 = vmul.f32 %v1140_v58, %v1140_v58  ;;  %v715_v19 = vsel %vm623_vm0, %v1140_v58, 0.0 }
 0x10f   :  { %636 = vst.msk [vmem:[%s1967_s2 + $0x60] sm:$0xff] %vm623_vm0, %v416_v61  ;;  %v711_v2 = vsel %vm623_vm0, %v416_v61, 0.0  ;;  %v833_v4 = vmul.f32 %v416_v61, %v416_v61  ;;  %v1141_v5 = vpop.f32.mrb[14].mxu0  ;;  %668 = vst.msk [vmem:[%s1967_s2 + $0x160] sm:$0xff] %vm623_vm0, %v1552_v0  ;;  %v1565_v6 = vpop.f32.mrb[14].mxu1 }
 0x110   :  { %v712_v7 = vadd.f32 %v711_v2, %v710_v62  ;;  %v907_v9 = vadd.f32 %v906_v1, %v905_v60  ;;  %639 = vst.msk [vmem:[%s1967_s2 + $0x78] sm:$0xff] %vm623_vm0, %v1141_v5  ;;  %v419_v10 = vpop.f32.mrb[15].mxu0  ;;  %671 = vst.msk [vmem:[%s1967_s2 + $0x178] sm:$0xff] %vm623_vm0, %v1565_v6  ;;  %v1576_v11 = vpop.f32.mrb[15].mxu1  ;;  %v836_v20 = vmul.f32 %v1141_v5, %v1141_v5  ;;  %v912_v24 = vsel %vm623_vm0, %v835_v13, 0.0 }
 0x111   :  { %v908_v14 = vsel %vm623_vm0, %v833_v4, 0.0  ;;  %637 = vst.msk [vmem:[%s1967_s2 + $0x68] sm:$0xff] %vm623_vm0, %v419_v10  ;;  %v713_v15 = vsel %vm623_vm0, %v419_v10, 0.0  ;;  %v834_v16 = vmul.f32 %v419_v10, %v419_v10  ;;  %669 = vst.msk [vmem:[%s1967_s2 + $0x168] sm:$0xff] %vm623_vm0, %v1576_v11  ;;  %v717_v25 = vsel %vm623_vm0, %v1141_v5, 0.0 }
 0x112   :  { %v909_v17 = vadd.f32 %v908_v14, %v907_v9  ;;  %v714_v18 = vadd.f32 %v713_v15, %v712_v7  ;;  %v914_v34 = vsel %vm623_vm0, %v836_v20, 0.0 }
 0x113   :  { %v910_v21 = vsel %vm623_vm0, %v834_v16, 0.0 }
 0x114   :  { %v716_v22 = vadd.f32 %v715_v19, %v714_v18  ;;  %v911_v23 = vadd.f32 %v910_v21, %v909_v17 }
 0x115   :  { %v1144_v26 = vpop.f32.mrb[16].mxu0  ;;  %v1593_v28 = vpop.f32.mrb[16].mxu1 }
 0x116   :  { %v913_v29 = vadd.f32 %v912_v24, %v911_v23  ;;  %642 = vst.msk [vmem:[%s1967_s2 + $0x90] sm:$0xff] %vm623_vm0, %v1144_v26  ;;  %v432_v30 = vpop.f32.mrb[17].mxu0  ;;  %v718_v32 = vadd.f32 %v717_v25, %v716_v22  ;;  %674 = vst.msk [vmem:[%s1967_s2 + $0x190] sm:$0xff] %vm623_vm0, %v1593_v28  ;;  %v1604_v33 = vpop.f32.mrb[17].mxu1  ;;  %v839_v49 = vmul.f32 %v1144_v26, %v1144_v26  ;;  %v723_v55 = vsel %vm623_vm0, %v1144_v26, 0.0 }
 0x117   :  { %640 = vst.msk [vmem:[%s1967_s2 + $0x80] sm:$0xff] %vm623_vm0, %v432_v30  ;;  %v719_v35 = vsel %vm623_vm0, %v432_v30, 0.0  ;;  %v837_v37 = vmul.f32 %v432_v30, %v432_v30  ;;  %v1145_v38 = vpop.f32.mrb[18].mxu0  ;;  %672 = vst.msk [vmem:[%s1967_s2 + $0x180] sm:$0xff] %vm623_vm0, %v1604_v33  ;;  %v1617_v39 = vpop.f32.mrb[18].mxu1 }
 0x118   :  { %v720_v42 = vadd.f32 %v719_v35, %v718_v32  ;;  %v915_v44 = vadd.f32 %v914_v34, %v913_v29  ;;  %643 = vst.msk [vmem:[%s1967_s2 + $0x98] sm:$0xff] %vm623_vm0, %v1145_v38  ;;  %v435_v45 = vpop.f32.mrb[19].mxu0  ;;  %675 = vst.msk [vmem:[%s1967_s2 + $0x198] sm:$0xff] %vm623_vm0, %v1617_v39  ;;  %v1628_v47 = vpop.f32.mrb[19].mxu1  ;;  %v840_v56 = vmul.f32 %v1145_v38, %v1145_v38  ;;  %v920_v61 = vsel %vm623_vm0, %v839_v49, 0.0 }
 0x119   :  { %v916_v50 = vsel %vm623_vm0, %v837_v37, 0.0  ;;  %641 = vst.msk [vmem:[%s1967_s2 + $0x88] sm:$0xff] %vm623_vm0, %v435_v45  ;;  %v721_v51 = vsel %vm623_vm0, %v435_v45, 0.0  ;;  %v838_v52 = vmul.f32 %v435_v45, %v435_v45  ;;  %673 = vst.msk [vmem:[%s1967_s2 + $0x188] sm:$0xff] %vm623_vm0, %v1628_v47  ;;  %v725_v62 = vsel %vm623_vm0, %v1145_v38, 0.0 }
 0x11a   :  { %v917_v53 = vadd.f32 %v916_v50, %v915_v44  ;;  %v722_v54 = vadd.f32 %v721_v51, %v720_v42  ;;  %v922_v10 = vsel %vm623_vm0, %v840_v56, 0.0 }
 0x11b   :  { %v918_v57 = vsel %vm623_vm0, %v838_v52, 0.0 }
 0x11c   :  { %v724_v58 = vadd.f32 %v723_v55, %v722_v54  ;;  %v919_v60 = vadd.f32 %v918_v57, %v917_v53 }
 0x11d   :  { %v1148_v1 = vpop.f32.mrb[20].mxu0  ;;  %v1645_v2 = vpop.f32.mrb[20].mxu1 }
 0x11e   :  { %v921_v4 = vadd.f32 %v920_v61, %v919_v60  ;;  %646 = vst.msk [vmem:[%s1967_s2 + $0xb0] sm:$0xff] %vm623_vm0, %v1148_v1  ;;  %v448_v5 = vpop.f32.mrb[21].mxu0  ;;  %v726_v7 = vadd.f32 %v725_v62, %v724_v58  ;;  %678 = vst.msk [vmem:[%s1967_s2 + $0x1b0] sm:$0xff] %vm623_vm0, %v1645_v2  ;;  %v1656_v9 = vpop.f32.mrb[21].mxu1  ;;  %v843_v21 = vmul.f32 %v1148_v1, %v1148_v1  ;;  %v731_v29 = vsel %vm623_vm0, %v1148_v1, 0.0 }
 0x11f   :  { %644 = vst.msk [vmem:[%s1967_s2 + $0xa0] sm:$0xff] %vm623_vm0, %v448_v5  ;;  %v727_v13 = vsel %vm623_vm0, %v448_v5, 0.0  ;;  %v841_v14 = vmul.f32 %v448_v5, %v448_v5  ;;  %v1149_v15 = vpop.f32.mrb[22].mxu0  ;;  %676 = vst.msk [vmem:[%s1967_s2 + $0x1a0] sm:$0xff] %vm623_vm0, %v1656_v9  ;;  %v1669_v16 = vpop.f32.mrb[22].mxu1 }
 0x120   :  { %v728_v17 = vadd.f32 %v727_v13, %v726_v7  ;;  %v923_v18 = vadd.f32 %v922_v10, %v921_v4  ;;  %647 = vst.msk [vmem:[%s1967_s2 + $0xb8] sm:$0xff] %vm623_vm0, %v1149_v15  ;;  %v451_v19 = vpop.f32.mrb[23].mxu0  ;;  %679 = vst.msk [vmem:[%s1967_s2 + $0x1b8] sm:$0xff] %vm623_vm0, %v1669_v16  ;;  %v1680_v20 = vpop.f32.mrb[23].mxu1  ;;  %v844_v30 = vmul.f32 %v1149_v15, %v1149_v15  ;;  %v928_v37 = vsel %vm623_vm0, %v843_v21, 0.0 }
 0x121   :  { %v924_v22 = vsel %vm623_vm0, %v841_v14, 0.0  ;;  %645 = vst.msk [vmem:[%s1967_s2 + $0xa8] sm:$0xff] %vm623_vm0, %v451_v19  ;;  %v729_v23 = vsel %vm623_vm0, %v451_v19, 0.0  ;;  %v842_v24 = vmul.f32 %v451_v19, %v451_v19  ;;  %677 = vst.msk [vmem:[%s1967_s2 + $0x1a8] sm:$0xff] %vm623_vm0, %v1680_v20  ;;  %v733_v38 = vsel %vm623_vm0, %v1149_v15, 0.0 }
 0x122   :  { %v925_v25 = vadd.f32 %v924_v22, %v923_v18  ;;  %v730_v26 = vadd.f32 %v729_v23, %v728_v17  ;;  %v930_v52 = vsel %vm623_vm0, %v844_v30, 0.0 }
 0x123   :  { %v926_v32 = vsel %vm623_vm0, %v842_v24, 0.0 }
 0x124   :  { %v732_v34 = vadd.f32 %v731_v29, %v730_v26  ;;  %v927_v35 = vadd.f32 %v926_v32, %v925_v25 }
 0x125   :  { %v1152_v42 = vpop.f32.mrb[24].mxu0  ;;  %v1697_v44 = vpop.f32.mrb[24].mxu1 }
 0x126   :  { %v929_v45 = vadd.f32 %v928_v37, %v927_v35  ;;  %650 = vst.msk [vmem:[%s1967_s2 + $0xd0] sm:$0xff] %vm623_vm0, %v1152_v42  ;;  %v464_v49 = vpop.f32.mrb[25].mxu0  ;;  %v734_v50 = vadd.f32 %v733_v38, %v732_v34  ;;  %682 = vst.msk [vmem:[%s1967_s2 + $0x1d0] sm:$0xff] %vm623_vm0, %v1697_v44  ;;  %v1708_v51 = vpop.f32.mrb[25].mxu1  ;;  %v847_v62 = vmul.f32 %v1152_v42, %v1152_v42  ;;  %v739_v13 = vsel %vm623_vm0, %v1152_v42, 0.0 }
 0x127   :  { %648 = vst.msk [vmem:[%s1967_s2 + $0xc0] sm:$0xff] %vm623_vm0, %v464_v49  ;;  %v735_v53 = vsel %vm623_vm0, %v464_v49, 0.0  ;;  %v845_v54 = vmul.f32 %v464_v49, %v464_v49  ;;  %v1153_v55 = vpop.f32.mrb[26].mxu0  ;;  %680 = vst.msk [vmem:[%s1967_s2 + $0x1c0] sm:$0xff] %vm623_vm0, %v1708_v51  ;;  %v1721_v56 = vpop.f32.mrb[26].mxu1 }
 0x128   :  { %v736_v57 = vadd.f32 %v735_v53, %v734_v50  ;;  %v931_v58 = vadd.f32 %v930_v52, %v929_v45  ;;  %651 = vst.msk [vmem:[%s1967_s2 + $0xd8] sm:$0xff] %vm623_vm0, %v1153_v55  ;;  %v467_v60 = vpop.f32.mrb[27].mxu0  ;;  %683 = vst.msk [vmem:[%s1967_s2 + $0x1d8] sm:$0xff] %vm623_vm0, %v1721_v56  ;;  %v1732_v61 = vpop.f32.mrb[27].mxu1  ;;  %v848_v14 = vmul.f32 %v1153_v55, %v1153_v55  ;;  %v936_v19 = vsel %vm623_vm0, %v847_v62, 0.0 }
 0x129   :  { %v932_v1 = vsel %vm623_vm0, %v845_v54, 0.0  ;;  %649 = vst.msk [vmem:[%s1967_s2 + $0xc8] sm:$0xff] %vm623_vm0, %v467_v60  ;;  %v737_v4 = vsel %vm623_vm0, %v467_v60, 0.0  ;;  %v846_v5 = vmul.f32 %v467_v60, %v467_v60  ;;  %681 = vst.msk [vmem:[%s1967_s2 + $0x1c8] sm:$0xff] %vm623_vm0, %v1732_v61  ;;  %v741_v21 = vsel %vm623_vm0, %v1153_v55, 0.0 }
 0x12a   :  { %v933_v7 = vadd.f32 %v932_v1, %v931_v58  ;;  %v738_v10 = vadd.f32 %v737_v4, %v736_v57  ;;  %v938_v30 = vsel %vm623_vm0, %v848_v14, 0.0  ;;  %v853_v1 = vmul.f32 %v1397_v43, %v1397_v43 }
 0x12b   :  { %v934_v15 = vsel %vm623_vm0, %v846_v5, 0.0 }
 0x12c   :  { %v740_v17 = vadd.f32 %v739_v13, %v738_v10  ;;  %v935_v18 = vadd.f32 %v934_v15, %v933_v7  ;;  %v751_v13 = vsel %vm623_vm0, %v1397_v43, 0.0  ;;  %v755_v43 = vsel %vm623_vm0, %v1386_v41, 0.0 }
 0x12d   :  { %v1156_v22 = vpop.f32.mrb[28].mxu0  ;;  %v1749_v23 = vpop.f32.mrb[28].mxu1 }
 0x12e   :  { %v937_v24 = vadd.f32 %v936_v19, %v935_v18  ;;  %654 = vst.msk [vmem:[%s1967_s2 + $0xf0] sm:$0xff] %vm623_vm0, %v1156_v22  ;;  %v480_v25 = vpop.f32.mrb[29].mxu0  ;;  %v742_v26 = vadd.f32 %v741_v21, %v740_v17  ;;  %686 = vst.msk [vmem:[%s1967_s2 + $0x1f0] sm:$0xff] %vm623_vm0, %v1749_v23  ;;  %v1760_v29 = vpop.f32.mrb[29].mxu1  ;;  %v851_v50 = vmul.f32 %v1156_v22, %v1156_v22  ;;  %v747_v58 = vsel %vm623_vm0, %v1156_v22, 0.0 }
 0x12f   :  { %652 = vst.msk [vmem:[%s1967_s2 + $0xe0] sm:$0xff] %vm623_vm0, %v480_v25  ;;  %v743_v32 = vsel %vm623_vm0, %v480_v25, 0.0  ;;  %v849_v34 = vmul.f32 %v480_v25, %v480_v25  ;;  %v1157_v35 = vpop.f32.mrb[30].mxu0  ;;  %684 = vst.msk [vmem:[%s1967_s2 + $0x1e0] sm:$0xff] %vm623_vm0, %v1760_v29  ;;  %v1773_v37 = vpop.f32.mrb[30].mxu1  ;;  %v948_v18 = vsel %vm623_vm0, %v853_v1, 0.0  ;;  %v854_v19 = vmul.f32 %v1419_v48, %v1419_v48 }
 0x130   :  { %v744_v38 = vadd.f32 %v743_v32, %v742_v26  ;;  %v939_v42 = vadd.f32 %v938_v30, %v937_v24  ;;  %655 = vst.msk [vmem:[%s1967_s2 + $0xf8] sm:$0xff] %vm623_vm0, %v1157_v35  ;;  %v483_v45 = vpop.f32.mrb[31].mxu0  ;;  %687 = vst.msk [vmem:[%s1967_s2 + $0x1f8] sm:$0xff] %vm623_vm0, %v1773_v37  ;;  %v1784_v49 = vpop.f32.mrb[31].mxu1  ;;  %v852_v60 = vmul.f32 %v1157_v35, %v1157_v35  ;;  %v944_v7 = vsel %vm623_vm0, %v851_v50, 0.0 }
 0x131   :  { %v940_v52 = vsel %vm623_vm0, %v849_v34, 0.0  ;;  %653 = vst.msk [vmem:[%s1967_s2 + $0xe8] sm:$0xff] %vm623_vm0, %v483_v45  ;;  %v745_v53 = vsel %vm623_vm0, %v483_v45, 0.0  ;;  %v850_v54 = vmul.f32 %v483_v45, %v483_v45  ;;  %685 = vst.msk [vmem:[%s1967_s2 + $0x1e8] sm:$0xff] %vm623_vm0, %v1784_v49  ;;  %v749_v10 = vsel %vm623_vm0, %v1157_v35, 0.0 }
 0x132   :  { %v941_v55 = vadd.f32 %v940_v52, %v939_v42  ;;  %v746_v57 = vadd.f32 %v745_v53, %v744_v38  ;;  %v946_v17 = vsel %vm623_vm0, %v852_v60, 0.0  ;;  %v855_v24 = vmul.f32 %v1386_v41, %v1386_v41 }
 0x133   :  { %v942_v62 = vsel %vm623_vm0, %v850_v54, 0.0  ;;  %v753_v25 = vsel %vm623_vm0, %v1419_v48, 0.0  ;;  %v856_v32 = vmul.f32 %v1408_v46, %v1408_v46  ;;  %v950_v34 = vsel %vm623_vm0, %v854_v19, 0.0 }
 0x134   :  { %v748_v4 = vadd.f32 %v747_v58, %v746_v57  ;;  %v943_v5 = vadd.f32 %v942_v62, %v941_v55  ;;  %v857_v35 = vmul.f32 %v1448_v3, %v1448_v3  ;;  %v952_v45 = vsel %vm623_vm0, %v855_v24, 0.0 }
 0x135   :  { %v757_v48 = vsel %vm623_vm0, %v1408_v46, 0.0  ;;  %v759_v50 = vsel %vm623_vm0, %v1448_v3, 0.0  ;;  %v954_v53 = vsel %vm623_vm0, %v856_v32, 0.0  ;;  %v858_v55 = vmul.f32 %v1472_v12, %v1472_v12 }
 0x136   :  { %v945_v14 = vadd.f32 %v944_v7, %v943_v5  ;;  %v750_v15 = vadd.f32 %v749_v10, %v748_v4  ;;  %v956_v54 = vsel %vm623_vm0, %v857_v35, 0.0  ;;  %v859_v60 = vmul.f32 %v1437_v63, %v1437_v63 }
 0x137   :  { %v761_v46 = vsel %vm623_vm0, %v1472_v12, 0.0  ;;  %v763_v3 = vsel %vm623_vm0, %v1437_v63, 0.0  ;;  %v860_v4 = vmul.f32 %v1461_v8, %v1461_v8  ;;  %v958_v5 = vsel %vm623_vm0, %v858_v55, 0.0 }
 0x138   :  { %v752_v21 = vadd.f32 %v751_v13, %v750_v15  ;;  %v947_v22 = vadd.f32 %v946_v17, %v945_v14  ;;  %v861_v7 = vmul.f32 %v1500_v31, %v1500_v31  ;;  %v960_v14 = vsel %vm623_vm0, %v859_v60, 0.0 }
 0x139   :  { %v765_v12 = vsel %vm623_vm0, %v1461_v8, 0.0  ;;  %v767_v15 = vsel %vm623_vm0, %v1500_v31, 0.0  ;;  %v769_v8 = vsel %vm623_vm0, %v1524_v40, 0.0  ;;  %v771_v31 = vsel %vm623_vm0, %v1489_v27, 0.0 }
 0x13a   :  { %v949_v26 = vadd.f32 %v948_v18, %v947_v22  ;;  %v754_v30 = vadd.f32 %v753_v25, %v752_v21  ;;  %v962_v18 = vsel %vm623_vm0, %v860_v4, 0.0  ;;  %v964_v19 = vsel %vm623_vm0, %v861_v7, 0.0 }
 0x13b   :  { %v862_v21 = vmul.f32 %v1524_v40, %v1524_v40  ;;  %v863_v25 = vmul.f32 %v1489_v27, %v1489_v27  ;;  %v773_v40 = vsel %vm623_vm0, %v1513_v36, 0.0  ;;  %v867_v55 = vmul.f32 %v1541_v59, %v1541_v59 }
 0x13c   :  { %v756_v38 = vadd.f32 %v755_v43, %v754_v30  ;;  %v951_v42 = vadd.f32 %v950_v34, %v949_v26  ;;  %v864_v43 = vmul.f32 %v1513_v36, %v1513_v36  ;;  %v865_v34 = vmul.f32 %v1552_v0, %v1552_v0 }
 0x13d   :  { %v966_v32 = vsel %vm623_vm0, %v862_v21, 0.0  ;;  %v777_v36 = vsel %vm623_vm0, %v1576_v11, 0.0  ;;  %v868_v60 = vmul.f32 %v1565_v6, %v1565_v6  ;;  %v976_v4 = vsel %vm623_vm0, %v867_v55, 0.0 }
 0x13e   :  { %v953_v52 = vadd.f32 %v952_v45, %v951_v42  ;;  %v758_v41 = vadd.f32 %v757_v48, %v756_v38  ;;  %v968_v42 = vsel %vm623_vm0, %v863_v25, 0.0  ;;  %v775_v45 = vsel %vm623_vm0, %v1552_v0, 0.0 }
 0x13f   :  { %v779_v0 = vsel %vm623_vm0, %v1541_v59, 0.0 }
 0x140   :  { %v760_v57 = vadd.f32 %v759_v50, %v758_v41  ;;  %v955_v58 = vadd.f32 %v954_v53, %v953_v52  ;;  %v970_v50 = vsel %vm623_vm0, %v864_v43, 0.0  ;;  %v972_v52 = vsel %vm623_vm0, %v865_v34, 0.0 }
 0x141   :  { %v866_v41 = vmul.f32 %v1576_v11, %v1576_v11  ;;  %v781_v11 = vsel %vm623_vm0, %v1565_v6, 0.0  ;;  %v785_v6 = vsel %vm623_vm0, %v1628_v47, 0.0 }
 0x142   :  { %v957_v62 = vadd.f32 %v956_v54, %v955_v58  ;;  %v762_v1 = vadd.f32 %v761_v46, %v760_v57 }
 0x143   :  { %v974_v46 = vsel %vm623_vm0, %v866_v41, 0.0 }
 0x144   :  { %v764_v10 = vadd.f32 %v763_v3, %v762_v1  ;;  %v959_v13 = vadd.f32 %v958_v5, %v957_v62  ;;  %v869_v62 = vmul.f32 %v1604_v33, %v1604_v33  ;;  %v783_v5 = vsel %vm623_vm0, %v1604_v33, 0.0 }
 0x145   :  { %v787_v33 = vsel %vm623_vm0, %v1593_v28, 0.0 }
 0x146   :  { %v961_v17 = vadd.f32 %v960_v14, %v959_v13  ;;  %v766_v63 = vadd.f32 %v765_v12, %v764_v10  ;;  %v978_v10 = vsel %vm623_vm0, %v868_v60, 0.0  ;;  %v980_v13 = vsel %vm623_vm0, %v869_v62, 0.0 }
 0x147   :  { %v870_v14 = vmul.f32 %v1628_v47, %v1628_v47  ;;  %v789_v47 = vsel %vm623_vm0, %v1617_v39, 0.0  ;;  %v879_v60 = vmul.f32 %v1697_v44, %v1697_v44 }
 0x148   :  { %v768_v22 = vadd.f32 %v767_v15, %v766_v63  ;;  %v963_v24 = vadd.f32 %v962_v18, %v961_v17  ;;  %v871_v17 = vmul.f32 %v1593_v28, %v1593_v28 }
 0x149   :  { %v982_v21 = vsel %vm623_vm0, %v870_v14, 0.0 }
 0x14a   :  { %v965_v26 = vadd.f32 %v964_v19, %v963_v24  ;;  %v770_v30 = vadd.f32 %v769_v8, %v768_v22  ;;  %v872_v19 = vmul.f32 %v1617_v39, %v1617_v39  ;;  %v873_v22 = vmul.f32 %v1656_v9, %v1656_v9 }
 0x14b   :  { %v984_v8 = vsel %vm623_vm0, %v871_v17, 0.0  ;;  %v793_v39 = vsel %vm623_vm0, %v1680_v20, 0.0 }
 0x14c   :  { %v772_v35 = vadd.f32 %v771_v31, %v770_v30  ;;  %v967_v38 = vadd.f32 %v966_v32, %v965_v26  ;;  %v791_v26 = vsel %vm623_vm0, %v1656_v9, 0.0  ;;  %v986_v31 = vsel %vm623_vm0, %v872_v19, 0.0 }
 0x14d   :  { %v988_v43 = vsel %vm623_vm0, %v873_v22, 0.0  ;;  %v874_v32 = vmul.f32 %v1680_v20, %v1680_v20  ;;  %v795_v9 = vsel %vm623_vm0, %v1645_v2, 0.0  ;;  %v797_v20 = vsel %vm623_vm0, %v1669_v16, 0.0 }
 0x14e   :  { %v969_v48 = vadd.f32 %v968_v42, %v967_v38  ;;  %v774_v27 = vadd.f32 %v773_v40, %v772_v35  ;;  %v875_v38 = vmul.f32 %v1645_v2, %v1645_v2 }
 0x150   :  { %v776_v53 = vadd.f32 %v775_v45, %v774_v27  ;;  %v971_v54 = vadd.f32 %v970_v50, %v969_v48  ;;  %v876_v45 = vmul.f32 %v1669_v16, %v1669_v16  ;;  %v990_v48 = vsel %vm623_vm0, %v874_v32, 0.0 }
 0x151   :  { %v877_v27 = vmul.f32 %v1708_v51, %v1708_v51  ;;  %v992_v41 = vsel %vm623_vm0, %v875_v38, 0.0  ;;  %v801_v16 = vsel %vm623_vm0, %v1732_v61, 0.0 }
 0x152   :  { %v973_v57 = vadd.f32 %v972_v52, %v971_v54  ;;  %v778_v58 = vadd.f32 %v777_v36, %v776_v53  ;;  %v799_v53 = vsel %vm623_vm0, %v1708_v51, 0.0  ;;  %v994_v55 = vsel %vm623_vm0, %v876_v45, 0.0 }
 0x153   :  { %v996_v36 = vsel %vm623_vm0, %v877_v27, 0.0  ;;  %v803_v51 = vsel %vm623_vm0, %v1697_v44, 0.0 }
 0x154   :  { %v780_v1 = vadd.f32 %v779_v0, %v778_v58  ;;  %v975_v3 = vadd.f32 %v974_v46, %v973_v57  ;;  %v878_v57 = vmul.f32 %v1732_v61, %v1732_v61  ;;  %v805_v61 = vsel %vm623_vm0, %v1721_v56, 0.0 }
 0x156   :  { %v977_v7 = vadd.f32 %v976_v4, %v975_v3  ;;  %v782_v59 = vadd.f32 %v781_v11, %v780_v1  ;;  %v880_v1 = vmul.f32 %v1721_v56, %v1721_v56  ;;  %v998_v3 = vsel %vm623_vm0, %v878_v57, 0.0 }
 0x157   :  { %v881_v4 = vmul.f32 %v1760_v29, %v1760_v29  ;;  %v809_v56 = vsel %vm623_vm0, %v1784_v49, 0.0 }
 0x158   :  { %v784_v12 = vadd.f32 %v783_v5, %v782_v59  ;;  %v979_v15 = vadd.f32 %v978_v10, %v977_v7  ;;  %v1000_v7 = vsel %vm623_vm0, %v879_v60, 0.0  ;;  %v807_v59 = vsel %vm623_vm0, %v1760_v29, 0.0 }
 0x159   :  { %v1004_v14 = vsel %vm623_vm0, %v881_v4, 0.0  ;;  %v811_v29 = vsel %vm623_vm0, %v1749_v23, 0.0 }
 0x15a   :  { %v981_v63 = vadd.f32 %v980_v13, %v979_v15  ;;  %v786_v18 = vadd.f32 %v785_v6, %v784_v12  ;;  %v1002_v13 = vsel %vm623_vm0, %v880_v1, 0.0  ;;  %v882_v12 = vmul.f32 %v1784_v49, %v1784_v49 }
 0x15b   :  { %v883_v6 = vmul.f32 %v1749_v23, %v1749_v23 }
 0x15c   :  { %v788_v24 = vadd.f32 %v787_v33, %v786_v18  ;;  %v983_v25 = vadd.f32 %v982_v21, %v981_v63  ;;  %v884_v33 = vmul.f32 %v1773_v37, %v1773_v37  ;;  %v1006_v19 = vsel %vm623_vm0, %v882_v12, 0.0 }
 0x15e   :  { %v985_v30 = vadd.f32 %v984_v8, %v983_v25  ;;  %v790_v28 = vadd.f32 %v789_v47, %v788_v24  ;;  %v1008_v24 = vsel %vm623_vm0, %v883_v6, 0.0  ;;  %v813_v25 = vsel %vm623_vm0, %v1773_v37, 0.0 }
 0x15f   :  { %v1010_v49 = vsel %vm623_vm0, %v884_v33, 0.0 }
 0x160   :  { %v792_v34 = vadd.f32 %v791_v26, %v790_v28  ;;  %v987_v35 = vadd.f32 %v986_v31, %v985_v30 }
 0x162   :  { %v989_v42 = vadd.f32 %v988_v43, %v987_v35  ;;  %v794_v40 = vadd.f32 %v793_v39, %v792_v34 }
 0x164   :  { %v796_v50 = vadd.f32 %v795_v9, %v794_v40  ;;  %v991_v52 = vadd.f32 %v990_v48, %v989_v42 }
 0x166   :  { %v993_v54 = vadd.f32 %v992_v41, %v991_v52  ;;  %v798_v2 = vadd.f32 %v797_v20, %v796_v50 }
 0x168   :  { %v800_v58 = vadd.f32 %v799_v53, %v798_v2  ;;  %v995_v0 = vadd.f32 %v994_v55, %v993_v54 }
 0x16a   :  { %v997_v46 = vadd.f32 %v996_v36, %v995_v0  ;;  %v802_v62 = vadd.f32 %v801_v16, %v800_v58 }
 0x16c   :  { %v804_v11 = vadd.f32 %v803_v51, %v802_v62  ;;  %v999_v5 = vadd.f32 %v998_v3, %v997_v46 }
 0x16e   :  { %v1001_v10 = vadd.f32 %v1000_v7, %v999_v5  ;;  %v806_v44 = vadd.f32 %v805_v61, %v804_v11 }
 0x170   :  { %v808_v15 = vadd.f32 %v807_v59, %v806_v44  ;;  %v1003_v17 = vadd.f32 %v1002_v13, %v1001_v10 }
 0x172   :  { %v1005_v63 = vadd.f32 %v1004_v14, %v1003_v17  ;;  %v810_v18 = vadd.f32 %v809_v56, %v808_v15 }
 0x174   :  { %v812_v21 = vadd.f32 %v811_v29, %v810_v18  ;;  %v1007_v22 = vadd.f32 %v1006_v19, %v1005_v63 }
 0x176   :  { %v814_v8 = vadd.f32 %v813_v25, %v812_v21  ;;  %v1009_v47 = vadd.f32 %v1008_v24, %v1007_v22 }
 0x178   :  { %v815_v26 = vrot.slane %v814_v8, 4  ;;  %v1011_v30 = vadd.f32 %v1010_v49, %v1009_v47 }
 0x17a   :  { %v816_v28 = vadd.f32 %v815_v26, %v814_v8  ;;  %v1012_v23 = vrot.slane %v1011_v30, 4 }
 0x17c   :  { %v817_v31 = vrot.slane %v816_v28, 2  ;;  %v1013_v43 = vadd.f32 %v1012_v23, %v1011_v30 }
 0x17e   :  { %v818_v32 = vadd.f32 %v817_v31, %v816_v28  ;;  %v1014_v34 = vrot.slane %v1013_v43, 2 }
 0x180   :  { %v819_v35 = vrot.slane %v818_v32, 1  ;;  %v1015_v38 = vadd.f32 %v1014_v34, %v1013_v43 }
 0x182   :  { %v1016_v39 = vrot.slane %v1015_v38, 1  ;;  %v820_v42 = vadd.f32 %v819_v35, %v818_v32 }
 0x184   :  { %v1017_v40 = vadd.f32 %v1016_v39, %v1015_v38 }
 0x186   :  { %v1019_v37 = vsel %vm1018_vm1, %v820_v42, %v1017_v40 }
 0x187   :  { %1021 = vst.msk [vmem:[%s1968_s3] sm:$0x3] %vm1020_vm2, %v1019_v37 }

// kernel: discriminator_forward.9
= control target key start
LH: loop header
LB: loop body
LE: loop exit
PB: predicated region body
PF: predicated region fallthrough
CT: control target
= control target key end

     0   :  { %vm668_vm0 = vcmask 125952   ;;  %s1473_s0 = inlined_call_operand.vmem [shape: f32[512,16], index: 0, kind: input, shape index: {}]   ;;  %s1474_s1 = inlined_call_operand.vmem [shape: f32[1,16], index: 1, kind: input, shape index: {}]   ;;  %s1475_s2 = inlined_call_operand.vmem [shape: f32[1,16], index: 2, kind: input, shape index: {}]   ;;  %s1476_s3 = inlined_call_operand.vmem [shape: bf16[512,16], index: 3, kind: output, shape index: {}]  }
   0x1   :  { %v14_v0 = vld [vmem:[%s1473_s0] sm:$0xff]  ;;  %v15_v4 = vld [vmem:[%s1473_s0 + $0x8] sm:$0xff]  ;;  %v16_v5 = vld [vmem:[%s1473_s0 + $0x10] sm:$0xff] }
   0x2   :  { %v893_v1 = vld [vmem:[%s1474_s1] ss:$0 sm:$0xff]  ;;  %v17_v6 = vld [vmem:[%s1473_s0 + $0x18] sm:$0xff]  ;;  %v19_v11 = vld [vmem:[%s1473_s0 + $0x28] sm:$0xff] }
   0x3   :  { %v898_v2 = vld [vmem:[%s1475_s2] ss:$0 sm:$0xff]  ;;  %v85_v3 = vmul.f32 %v893_v1, %v14_v0  ;;  %v86_v7 = vmul.f32 %v893_v1, %v15_v4  ;;  %v87_v8 = vmul.f32 %v893_v1, %v16_v5  ;;  %v88_v9 = vmul.f32 %v893_v1, %v17_v6  ;;  %v20_v12 = vld [vmem:[%s1473_s0 + $0x30] sm:$0xff]  ;;  %v21_v17 = vld [vmem:[%s1473_s0 + $0x38] sm:$0xff] }
   0x4   :  { %v18_v10 = vld [vmem:[%s1473_s0 + $0x20] sm:$0xff]  ;;  %v90_v15 = vmul.f32 %v893_v1, %v19_v11  ;;  %v91_v16 = vmul.f32 %v893_v1, %v20_v12  ;;  %v92_v21 = vmul.f32 %v893_v1, %v21_v17  ;;  %v23_v34 = vld [vmem:[%s1473_s0 + $0x48] sm:$0xff]  ;;  %v24_v38 = vld [vmem:[%s1473_s0 + $0x50] sm:$0xff] }
   0x5   :  { %v156_v13 = vadd.f32 %v898_v2, %v85_v3  ;;  %v89_v14 = vmul.f32 %v893_v1, %v18_v10  ;;  %v157_v18 = vadd.f32 %v898_v2, %v86_v7  ;;  %v158_v19 = vadd.f32 %v898_v2, %v87_v8  ;;  %v22_v33 = vld [vmem:[%s1473_s0 + $0x40] sm:$0xff]  ;;  %v25_v47 = vld [vmem:[%s1473_s0 + $0x58] sm:$0xff]  ;;  %v27_v62 = vld [vmem:[%s1473_s0 + $0x68] sm:$0xff] }
   0x6   :  { %v159_v20 = vadd.f32 %v898_v2, %v88_v9  ;;  %v161_v24 = vadd.f32 %v898_v2, %v90_v15  ;;  %v162_v42 = vadd.f32 %v898_v2, %v91_v16  ;;  %v163_v44 = vadd.f32 %v898_v2, %v92_v21  ;;  %v26_v58 = vld [vmem:[%s1473_s0 + $0x60] sm:$0xff]  ;;  %v28_v63 = vld [vmem:[%s1473_s0 + $0x70] sm:$0xff]  ;;  %v29_v12 = vld [vmem:[%s1473_s0 + $0x78] sm:$0xff] }
   0x7   :  { %vm220_vm1 = vcmp.gt.f32.partialorder %v156_v13, 0.0  ;;  %v284_v22 = vmul.f32 0.2, %v156_v13  ;;  %v160_v23 = vadd.f32 %v898_v2, %v89_v14  ;;  %vm221_vm2 = vcmp.gt.f32.partialorder %v157_v18, 0.0  ;;  %v31_v14 = vld [vmem:[%s1473_s0 + $0x88] sm:$0xff] }
   0x8   :  { %v285_v25 = vmul.f32 0.2, %v157_v18  ;;  %vm222_vm3 = vcmp.gt.f32.partialorder %v158_v19, 0.0  ;;  %v286_v26 = vmul.f32 0.2, %v158_v19  ;;  %vm223_vm4 = vcmp.gt.f32.partialorder %v159_v20, 0.0 }
   0x9   :  { %v348_v27 = vsel %vm220_vm1, %v156_v13, %v284_v22  ;;  %v287_v28 = vmul.f32 0.2, %v159_v20  ;;  %vm224_vm5 = vcmp.gt.f32.partialorder %v160_v23, 0.0  ;;  %v288_v32 = vmul.f32 0.2, %v160_v23  ;;  %v30_v13 = vld [vmem:[%s1473_s0 + $0x80] sm:$0xff] }
   0xa   :  { %v803_v29 = vpack.c.bf16 %v348_v27, %v348_v27  ;;  %v349_v30 = vsel %vm221_vm2, %v157_v18, %v285_v25  ;;  %v350_v31 = vsel %vm222_vm3, %v158_v19, %v286_v26  ;;  %vm225_vm6 = vcmp.gt.f32.partialorder %v161_v24, 0.0  ;;  %v32_v26 = vld [vmem:[%s1473_s0 + $0x90] sm:$0xff] }
   0xb   :  { %v804_v35 = vpack.c.bf16 %v349_v30, %v349_v30  ;;  %v805_v36 = vpack.c.bf16 %v350_v31, %v350_v31  ;;  %v351_v37 = vsel %vm223_vm4, %v159_v20, %v287_v28  ;;  %v352_v40 = vsel %vm224_vm5, %v160_v23, %v288_v32 }
   0xc   :  { %669 = vst.msk [vmem:[%s1476_s3] sm:$0xf] %vm668_vm0, %v803_v29  ;;  %v806_v39 = vpack.c.bf16 %v351_v37, %v351_v37  ;;  %v289_v41 = vmul.f32 0.2, %v161_v24  ;;  %v807_v43 = vpack.c.bf16 %v352_v40, %v352_v40  ;;  %v93_v45 = vmul.f32 %v893_v1, %v22_v33  ;;  %v34_v40 = vld [vmem:[%s1473_s0 + $0xa0] sm:$0xff] }
   0xd   :  { %670 = vst.msk [vmem:[%s1476_s3 + $0x4] sm:$0xf] %vm668_vm0, %v804_v35  ;;  %671 = vst.msk [vmem:[%s1476_s3 + $0x8] sm:$0xf] %vm668_vm0, %v805_v36  ;;  %v94_v46 = vmul.f32 %v893_v1, %v23_v34  ;;  %vm226_vm7 = vcmp.gt.f32.partialorder %v162_v42, 0.0  ;;  %v95_v50 = vmul.f32 %v893_v1, %v24_v38  ;;  %vm227_vm8 = vcmp.gt.f32.partialorder %v163_v44, 0.0 }
   0xe   :  { %672 = vst.msk [vmem:[%s1476_s3 + $0xc] sm:$0xf] %vm668_vm0, %v806_v39  ;;  %v353_v48 = vsel %vm225_vm6, %v161_v24, %v289_v41  ;;  %v290_v49 = vmul.f32 0.2, %v162_v42  ;;  %673 = vst.msk [vmem:[%s1476_s3 + $0x10] sm:$0xf] %vm668_vm0, %v807_v43  ;;  %v164_v53 = vadd.f32 %v898_v2, %v93_v45  ;;  %v96_v57 = vmul.f32 %v893_v1, %v25_v47 }
   0xf   :  { %v808_v51 = vpack.c.bf16 %v353_v48, %v353_v48  ;;  %v291_v52 = vmul.f32 0.2, %v163_v44  ;;  %v165_v55 = vadd.f32 %v898_v2, %v94_v46  ;;  %v166_v56 = vadd.f32 %v898_v2, %v95_v50  ;;  %v33_v39 = vld [vmem:[%s1473_s0 + $0x98] sm:$0xff]  ;;  %v35_v41 = vld [vmem:[%s1473_s0 + $0xa8] sm:$0xff] }
  0x10   :  { %v354_v54 = vsel %vm226_vm7, %v162_v42, %v290_v49  ;;  %vm228_vm9 = vcmp.gt.f32.partialorder %v164_v53, 0.0  ;;  %v292_v61 = vmul.f32 0.2, %v164_v53  ;;  %v167_v6 = vadd.f32 %v898_v2, %v96_v57  ;;  %v38_v57 = vld [vmem:[%s1473_s0 + $0xc0] sm:$0xff] }
  0x11   :  { %674 = vst.msk [vmem:[%s1476_s3 + $0x14] sm:$0xf] %vm668_vm0, %v808_v51  ;;  %v809_v59 = vpack.c.bf16 %v354_v54, %v354_v54  ;;  %v355_v60 = vsel %vm227_vm8, %v163_v44, %v291_v52  ;;  %vm229_vm10 = vcmp.gt.f32.partialorder %v165_v55, 0.0  ;;  %v293_v3 = vmul.f32 0.2, %v165_v55  ;;  %v36_v52 = vld [vmem:[%s1473_s0 + $0xb0] sm:$0xff] }
  0x12   :  { %v810_v0 = vpack.c.bf16 %v355_v60, %v355_v60  ;;  %vm230_vm11 = vcmp.gt.f32.partialorder %v166_v56, 0.0  ;;  %v356_v4 = vsel %vm228_vm9, %v164_v53, %v292_v61  ;;  %v294_v5 = vmul.f32 0.2, %v166_v56  ;;  %v37_v53 = vld [vmem:[%s1473_s0 + $0xb8] sm:$0xff] }
  0x13   :  { %675 = vst.msk [vmem:[%s1476_s3 + $0x18] sm:$0xf] %vm668_vm0, %v809_v59  ;;  %v97_v7 = vmul.f32 %v893_v1, %v26_v58  ;;  %v811_v8 = vpack.c.bf16 %v356_v4, %v356_v4  ;;  %v357_v9 = vsel %vm229_vm10, %v165_v55, %v293_v3  ;;  %v98_v10 = vmul.f32 %v893_v1, %v27_v62 }
  0x14   :  { %676 = vst.msk [vmem:[%s1476_s3 + $0x1c] sm:$0xf] %vm668_vm0, %v810_v0  ;;  %v99_v11 = vmul.f32 %v893_v1, %v28_v63  ;;  %v812_v15 = vpack.c.bf16 %v357_v9, %v357_v9  ;;  %v358_v16 = vsel %vm230_vm11, %v166_v56, %v294_v5  ;;  %vm231_vm12 = vcmp.gt.f32.partialorder %v167_v6, 0.0 }
  0x15   :  { %v295_v17 = vmul.f32 0.2, %v167_v6  ;;  %677 = vst.msk [vmem:[%s1476_s3 + $0x20] sm:$0xf] %vm668_vm0, %v811_v8  ;;  %v813_v18 = vpack.c.bf16 %v358_v16, %v358_v16  ;;  %v168_v19 = vadd.f32 %v898_v2, %v97_v7  ;;  %v169_v20 = vadd.f32 %v898_v2, %v98_v10  ;;  %v39_v7 = vld [vmem:[%s1473_s0 + $0xc8] sm:$0xff] }
  0x16   :  { %v170_v21 = vadd.f32 %v898_v2, %v99_v11  ;;  %678 = vst.msk [vmem:[%s1476_s3 + $0x24] sm:$0xf] %vm668_vm0, %v812_v15  ;;  %v100_v23 = vmul.f32 %v893_v1, %v29_v12  ;;  %v101_v24 = vmul.f32 %v893_v1, %v30_v13  ;;  %v102_v25 = vmul.f32 %v893_v1, %v31_v14 }
  0x17   :  { %v359_v22 = vsel %vm231_vm12, %v167_v6, %v295_v17  ;;  %679 = vst.msk [vmem:[%s1476_s3 + $0x28] sm:$0xf] %vm668_vm0, %v813_v18  ;;  %vm232_vm13 = vcmp.gt.f32.partialorder %v168_v19, 0.0  ;;  %v296_v28 = vmul.f32 0.2, %v168_v19  ;;  %vm233_vm14 = vcmp.gt.f32.partialorder %v169_v20, 0.0 }
  0x18   :  { %v814_v27 = vpack.c.bf16 %v359_v22, %v359_v22  ;;  %v297_v29 = vmul.f32 0.2, %v169_v20  ;;  %vm234_vm15 = vcmp.gt.f32.partialorder %v170_v21, 0.0  ;;  %v298_v30 = vmul.f32 0.2, %v170_v21  ;;  %v40_v18 = vld [vmem:[%s1473_s0 + $0xd0] sm:$0xff] }
  0x19   :  { %v171_v31 = vadd.f32 %v898_v2, %v100_v23  ;;  %v360_v32 = vsel %vm232_vm13, %v168_v19, %v296_v28  ;;  %v172_v33 = vadd.f32 %v898_v2, %v101_v24  ;;  %v173_v34 = vadd.f32 %v898_v2, %v102_v25  ;;  %v41_v22 = vld [vmem:[%s1473_s0 + $0xd8] sm:$0xff]  ;;  %v42_v23 = vld [vmem:[%s1473_s0 + $0xe0] sm:$0xff] }
  0x1a   :  { %680 = vst.msk [vmem:[%s1476_s3 + $0x2c] sm:$0xf] %vm668_vm0, %v814_v27  ;;  %v103_v35 = vmul.f32 %v893_v1, %v32_v26  ;;  %v815_v36 = vpack.c.bf16 %v360_v32, %v360_v32  ;;  %v361_v37 = vsel %vm233_vm14, %v169_v20, %v297_v29  ;;  %v362_v38 = vsel %vm234_vm15, %v170_v21, %v298_v30 }
  0x1b   :  { %vm235_vm1 = vcmp.gt.f32.partialorder %v171_v31, 0.0  ;;  %v816_v42 = vpack.c.bf16 %v361_v37, %v361_v37  ;;  %v817_v43 = vpack.c.bf16 %v362_v38, %v362_v38  ;;  %v299_v44 = vmul.f32 0.2, %v171_v31 }
  0x1c   :  { %vm236_vm2 = vcmp.gt.f32.partialorder %v172_v33, 0.0  ;;  %681 = vst.msk [vmem:[%s1476_s3 + $0x30] sm:$0xf] %vm668_vm0, %v815_v36  ;;  %v300_v45 = vmul.f32 0.2, %v172_v33  ;;  %vm237_vm3 = vcmp.gt.f32.partialorder %v173_v34, 0.0  ;;  %v174_v47 = vadd.f32 %v898_v2, %v103_v35 }
  0x1d   :  { %v301_v46 = vmul.f32 0.2, %v173_v34  ;;  %682 = vst.msk [vmem:[%s1476_s3 + $0x34] sm:$0xf] %vm668_vm0, %v816_v42  ;;  %683 = vst.msk [vmem:[%s1476_s3 + $0x38] sm:$0xf] %vm668_vm0, %v817_v43  ;;  %v363_v48 = vsel %vm235_vm1, %v171_v31, %v299_v44  ;;  %v104_v49 = vmul.f32 %v893_v1, %v33_v39  ;;  %v105_v50 = vmul.f32 %v893_v1, %v34_v40 }
  0x1e   :  { %v106_v51 = vmul.f32 %v893_v1, %v35_v41  ;;  %v818_v54 = vpack.c.bf16 %v363_v48, %v363_v48  ;;  %v364_v55 = vsel %vm236_vm2, %v172_v33, %v300_v45  ;;  %vm238_vm4 = vcmp.gt.f32.partialorder %v174_v47, 0.0  ;;  %v44_v35 = vld [vmem:[%s1473_s0 + $0xf0] sm:$0xff]  ;;  %v45_v36 = vld [vmem:[%s1473_s0 + $0xf8] sm:$0xff]  ;;  %v46_v48 = vld [vmem:[%s1473_s0 + $0x100] sm:$0xff] }
  0x1f   :  { %v365_v56 = vsel %vm237_vm3, %v173_v34, %v301_v46  ;;  %v819_v58 = vpack.c.bf16 %v364_v55, %v364_v55  ;;  %v302_v60 = vmul.f32 0.2, %v174_v47  ;;  %v175_v61 = vadd.f32 %v898_v2, %v104_v49  ;;  %v43_v34 = vld [vmem:[%s1473_s0 + $0xe8] sm:$0xff] }
  0x20   :  { %v820_v59 = vpack.c.bf16 %v365_v56, %v365_v56  ;;  %684 = vst.msk [vmem:[%s1476_s3 + $0x3c] sm:$0xf] %vm668_vm0, %v818_v54  ;;  %v176_v62 = vadd.f32 %v898_v2, %v105_v50  ;;  %v177_v63 = vadd.f32 %v898_v2, %v106_v51  ;;  %v107_v0 = vmul.f32 %v893_v1, %v36_v52 }
  0x21   :  { %v108_v3 = vmul.f32 %v893_v1, %v37_v53  ;;  %685 = vst.msk [vmem:[%s1476_s3 + $0x40] sm:$0xf] %vm668_vm0, %v819_v58  ;;  %v366_v4 = vsel %vm238_vm4, %v174_v47, %v302_v60  ;;  %vm239_vm5 = vcmp.gt.f32.partialorder %v175_v61, 0.0  ;;  %v303_v5 = vmul.f32 0.2, %v175_v61 }
  0x22   :  { %686 = vst.msk [vmem:[%s1476_s3 + $0x44] sm:$0xf] %vm668_vm0, %v820_v59  ;;  %v109_v6 = vmul.f32 %v893_v1, %v38_v57  ;;  %v821_v8 = vpack.c.bf16 %v366_v4, %v366_v4  ;;  %vm240_vm6 = vcmp.gt.f32.partialorder %v176_v62, 0.0  ;;  %v304_v9 = vmul.f32 0.2, %v176_v62 }
  0x23   :  { %vm241_vm7 = vcmp.gt.f32.partialorder %v177_v63, 0.0  ;;  %v367_v10 = vsel %vm239_vm5, %v175_v61, %v303_v5  ;;  %v305_v11 = vmul.f32 0.2, %v177_v63  ;;  %v178_v12 = vadd.f32 %v898_v2, %v107_v0  ;;  %v47_v61 = vld [vmem:[%s1473_s0 + $0x108] sm:$0xff] }
  0x24   :  { %v179_v13 = vadd.f32 %v898_v2, %v108_v3  ;;  %687 = vst.msk [vmem:[%s1476_s3 + $0x48] sm:$0xf] %vm668_vm0, %v821_v8  ;;  %v822_v14 = vpack.c.bf16 %v367_v10, %v367_v10  ;;  %v368_v15 = vsel %vm240_vm6, %v176_v62, %v304_v9  ;;  %v180_v16 = vadd.f32 %v898_v2, %v109_v6  ;;  %v48_v62 = vld [vmem:[%s1473_s0 + $0x110] sm:$0xff] }
  0x25   :  { %v110_v17 = vmul.f32 %v893_v1, %v39_v7  ;;  %v823_v19 = vpack.c.bf16 %v368_v15, %v368_v15  ;;  %v369_v20 = vsel %vm241_vm7, %v177_v63, %v305_v11  ;;  %vm242_vm8 = vcmp.gt.f32.partialorder %v178_v12, 0.0  ;;  %v49_v63 = vld [vmem:[%s1473_s0 + $0x118] sm:$0xff] }
  0x26   :  { %v306_v21 = vmul.f32 0.2, %v178_v12  ;;  %688 = vst.msk [vmem:[%s1476_s3 + $0x4c] sm:$0xf] %vm668_vm0, %v822_v14  ;;  %v824_v24 = vpack.c.bf16 %v369_v20, %v369_v20  ;;  %vm243_vm9 = vcmp.gt.f32.partialorder %v179_v13, 0.0  ;;  %vm244_vm10 = vcmp.gt.f32.partialorder %v180_v16, 0.0 }
  0x27   :  { %v307_v25 = vmul.f32 0.2, %v179_v13  ;;  %689 = vst.msk [vmem:[%s1476_s3 + $0x50] sm:$0xf] %vm668_vm0, %v823_v19  ;;  %v308_v27 = vmul.f32 0.2, %v180_v16  ;;  %v181_v28 = vadd.f32 %v898_v2, %v110_v17  ;;  %v111_v29 = vmul.f32 %v893_v1, %v40_v18 }
  0x28   :  { %v370_v26 = vsel %vm242_vm8, %v178_v12, %v306_v21  ;;  %690 = vst.msk [vmem:[%s1476_s3 + $0x54] sm:$0xf] %vm668_vm0, %v824_v24  ;;  %v112_v32 = vmul.f32 %v893_v1, %v41_v22  ;;  %v113_v33 = vmul.f32 %v893_v1, %v42_v23  ;;  %v114_v45 = vmul.f32 %v893_v1, %v43_v34  ;;  %v50_v12 = vld [vmem:[%s1473_s0 + $0x120] sm:$0xff]  ;;  %v52_v17 = vld [vmem:[%s1473_s0 + $0x130] sm:$0xff] }
  0x29   :  { %v825_v30 = vpack.c.bf16 %v370_v26, %v370_v26  ;;  %v371_v31 = vsel %vm243_vm9, %v179_v13, %v307_v25  ;;  %v372_v38 = vsel %vm244_vm10, %v180_v16, %v308_v27  ;;  %vm245_vm11 = vcmp.gt.f32.partialorder %v181_v28, 0.0  ;;  %v51_v13 = vld [vmem:[%s1473_s0 + $0x128] sm:$0xff] }
  0x2a   :  { %v826_v37 = vpack.c.bf16 %v371_v31, %v371_v31  ;;  %v309_v39 = vmul.f32 0.2, %v181_v28  ;;  %v827_v40 = vpack.c.bf16 %v372_v38, %v372_v38  ;;  %v182_v41 = vadd.f32 %v898_v2, %v111_v29  ;;  %v53_v29 = vld [vmem:[%s1473_s0 + $0x138] sm:$0xff] }
  0x2b   :  { %691 = vst.msk [vmem:[%s1476_s3 + $0x58] sm:$0xf] %vm668_vm0, %v825_v30  ;;  %v183_v42 = vadd.f32 %v898_v2, %v112_v32  ;;  %v184_v43 = vadd.f32 %v898_v2, %v113_v33  ;;  %v115_v46 = vmul.f32 %v893_v1, %v44_v35  ;;  %v116_v47 = vmul.f32 %v893_v1, %v45_v36 }
  0x2c   :  { %692 = vst.msk [vmem:[%s1476_s3 + $0x5c] sm:$0xf] %vm668_vm0, %v826_v37  ;;  %v373_v44 = vsel %vm245_vm11, %v181_v28, %v309_v39  ;;  %693 = vst.msk [vmem:[%s1476_s3 + $0x60] sm:$0xf] %vm668_vm0, %v827_v40  ;;  %vm246_vm12 = vcmp.gt.f32.partialorder %v182_v41, 0.0  ;;  %v185_v53 = vadd.f32 %v898_v2, %v114_v45  ;;  %v117_v57 = vmul.f32 %v893_v1, %v46_v48  ;;  %v54_v40 = vld [vmem:[%s1473_s0 + $0x140] sm:$0xff] }
  0x2d   :  { %v828_v49 = vpack.c.bf16 %v373_v44, %v373_v44  ;;  %v310_v50 = vmul.f32 0.2, %v182_v41  ;;  %vm247_vm13 = vcmp.gt.f32.partialorder %v183_v42, 0.0  ;;  %v311_v51 = vmul.f32 0.2, %v183_v42  ;;  %v55_v44 = vld [vmem:[%s1473_s0 + $0x148] sm:$0xff] }
  0x2e   :  { %vm248_vm14 = vcmp.gt.f32.partialorder %v184_v43, 0.0  ;;  %v312_v52 = vmul.f32 0.2, %v184_v43  ;;  %v186_v55 = vadd.f32 %v898_v2, %v115_v46  ;;  %v187_v56 = vadd.f32 %v898_v2, %v116_v47  ;;  %v56_v45 = vld [vmem:[%s1473_s0 + $0x150] sm:$0xff] }
  0x2f   :  { %694 = vst.msk [vmem:[%s1476_s3 + $0x64] sm:$0xf] %vm668_vm0, %v828_v49  ;;  %v374_v54 = vsel %vm246_vm12, %v182_v41, %v310_v50  ;;  %v375_v59 = vsel %vm247_vm13, %v183_v42, %v311_v51  ;;  %vm249_vm15 = vcmp.gt.f32.partialorder %v185_v53, 0.0  ;;  %v313_v4 = vmul.f32 0.2, %v185_v53 }
  0x30   :  { %v829_v58 = vpack.c.bf16 %v374_v54, %v374_v54  ;;  %v376_v60 = vsel %vm248_vm14, %v184_v43, %v312_v52  ;;  %v830_v0 = vpack.c.bf16 %v375_v59, %v375_v59  ;;  %vm250_vm1 = vcmp.gt.f32.partialorder %v186_v55, 0.0 }
  0x31   :  { %v831_v3 = vpack.c.bf16 %v376_v60, %v376_v60  ;;  %v314_v5 = vmul.f32 0.2, %v186_v55  ;;  %vm251_vm2 = vcmp.gt.f32.partialorder %v187_v56, 0.0  ;;  %v315_v6 = vmul.f32 0.2, %v187_v56 }
  0x32   :  { %695 = vst.msk [vmem:[%s1476_s3 + $0x68] sm:$0xf] %vm668_vm0, %v829_v58  ;;  %v188_v7 = vadd.f32 %v898_v2, %v117_v57  ;;  %696 = vst.msk [vmem:[%s1476_s3 + $0x6c] sm:$0xf] %vm668_vm0, %v830_v0  ;;  %v377_v8 = vsel %vm249_vm15, %v185_v53, %v313_v4  ;;  %v118_v9 = vmul.f32 %v893_v1, %v47_v61  ;;  %v58_v57 = vld [vmem:[%s1473_s0 + $0x160] sm:$0xff]  ;;  %v59_v58 = vld [vmem:[%s1473_s0 + $0x168] sm:$0xff] }
  0x33   :  { %697 = vst.msk [vmem:[%s1476_s3 + $0x70] sm:$0xf] %vm668_vm0, %v831_v3  ;;  %v119_v10 = vmul.f32 %v893_v1, %v48_v62  ;;  %v120_v11 = vmul.f32 %v893_v1, %v49_v63  ;;  %v832_v14 = vpack.c.bf16 %v377_v8, %v377_v8  ;;  %v378_v15 = vsel %vm250_vm1, %v186_v55, %v314_v5  ;;  %v60_v8 = vld [vmem:[%s1473_s0 + $0x170] sm:$0xff] }
  0x34   :  { %v379_v16 = vsel %vm251_vm2, %v187_v56, %v315_v6  ;;  %vm252_vm3 = vcmp.gt.f32.partialorder %v188_v7, 0.0  ;;  %v833_v18 = vpack.c.bf16 %v378_v15, %v378_v15  ;;  %v316_v20 = vmul.f32 0.2, %v188_v7  ;;  %v57_v56 = vld [vmem:[%s1473_s0 + $0x158] sm:$0xff] }
  0x35   :  { %v834_v19 = vpack.c.bf16 %v379_v16, %v379_v16  ;;  %v189_v21 = vadd.f32 %v898_v2, %v118_v9  ;;  %698 = vst.msk [vmem:[%s1476_s3 + $0x74] sm:$0xf] %vm668_vm0, %v832_v14  ;;  %v190_v22 = vadd.f32 %v898_v2, %v119_v10  ;;  %v191_v23 = vadd.f32 %v898_v2, %v120_v11 }
  0x36   :  { %v121_v24 = vmul.f32 %v893_v1, %v50_v12  ;;  %v122_v25 = vmul.f32 %v893_v1, %v51_v13  ;;  %699 = vst.msk [vmem:[%s1476_s3 + $0x78] sm:$0xf] %vm668_vm0, %v833_v18  ;;  %v380_v26 = vsel %vm252_vm3, %v188_v7, %v316_v20  ;;  %v123_v28 = vmul.f32 %v893_v1, %v52_v17 }
  0x37   :  { %700 = vst.msk [vmem:[%s1476_s3 + $0x7c] sm:$0xf] %vm668_vm0, %v834_v19  ;;  %vm253_vm4 = vcmp.gt.f32.partialorder %v189_v21, 0.0  ;;  %v317_v27 = vmul.f32 0.2, %v189_v21  ;;  %v835_v30 = vpack.c.bf16 %v380_v26, %v380_v26  ;;  %vm254_vm5 = vcmp.gt.f32.partialorder %v190_v22, 0.0 }
  0x38   :  { %v318_v31 = vmul.f32 0.2, %v190_v22  ;;  %vm255_vm6 = vcmp.gt.f32.partialorder %v191_v23, 0.0  ;;  %v319_v33 = vmul.f32 0.2, %v191_v23  ;;  %v192_v34 = vadd.f32 %v898_v2, %v121_v24 }
  0x39   :  { %v381_v32 = vsel %vm253_vm4, %v189_v21, %v317_v27  ;;  %v193_v35 = vadd.f32 %v898_v2, %v122_v25  ;;  %701 = vst.msk [vmem:[%s1476_s3 + $0x80] sm:$0xf] %vm668_vm0, %v835_v30  ;;  %v194_v38 = vadd.f32 %v898_v2, %v123_v28  ;;  %v124_v39 = vmul.f32 %v893_v1, %v53_v29  ;;  %v61_v21 = vld [vmem:[%s1473_s0 + $0x178] sm:$0xff] }
  0x3a   :  { %v836_v36 = vpack.c.bf16 %v381_v32, %v381_v32  ;;  %v382_v37 = vsel %vm254_vm5, %v190_v22, %v318_v31  ;;  %v383_v42 = vsel %vm255_vm6, %v191_v23, %v319_v33  ;;  %vm256_vm7 = vcmp.gt.f32.partialorder %v192_v34, 0.0  ;;  %v62_v22 = vld [vmem:[%s1473_s0 + $0x180] sm:$0xff]  ;;  %v63_v23 = vld [vmem:[%s1473_s0 + $0x188] sm:$0xff] }
  0x3b   :  { %v837_v41 = vpack.c.bf16 %v382_v37, %v382_v37  ;;  %v320_v43 = vmul.f32 0.2, %v192_v34  ;;  %v838_v46 = vpack.c.bf16 %v383_v42, %v383_v42  ;;  %vm257_vm8 = vcmp.gt.f32.partialorder %v193_v35, 0.0 }
  0x3c   :  { %702 = vst.msk [vmem:[%s1476_s3 + $0x84] sm:$0xf] %vm668_vm0, %v836_v36  ;;  %v321_v47 = vmul.f32 0.2, %v193_v35  ;;  %vm258_vm9 = vcmp.gt.f32.partialorder %v194_v38, 0.0  ;;  %v195_v50 = vadd.f32 %v898_v2, %v124_v39  ;;  %v125_v51 = vmul.f32 %v893_v1, %v54_v40  ;;  %v66_v39 = vld [vmem:[%s1473_s0 + $0x1a0] sm:$0xff] }
  0x3d   :  { %703 = vst.msk [vmem:[%s1476_s3 + $0x88] sm:$0xf] %vm668_vm0, %v837_v41  ;;  %v384_v48 = vsel %vm256_vm7, %v192_v34, %v320_v43  ;;  %v322_v49 = vmul.f32 0.2, %v194_v38  ;;  %704 = vst.msk [vmem:[%s1476_s3 + $0x8c] sm:$0xf] %vm668_vm0, %v838_v46  ;;  %v126_v54 = vmul.f32 %v893_v1, %v55_v44  ;;  %v127_v55 = vmul.f32 %v893_v1, %v56_v45 }
  0x3e   :  { %v839_v52 = vpack.c.bf16 %v384_v48, %v384_v48  ;;  %v385_v53 = vsel %vm257_vm8, %v193_v35, %v321_v47  ;;  %vm259_vm10 = vcmp.gt.f32.partialorder %v195_v50, 0.0  ;;  %v323_v61 = vmul.f32 0.2, %v195_v50  ;;  %v64_v34 = vld [vmem:[%s1473_s0 + $0x190] sm:$0xff]  ;;  %v65_v35 = vld [vmem:[%s1473_s0 + $0x198] sm:$0xff] }
  0x3f   :  { %v840_v59 = vpack.c.bf16 %v385_v53, %v385_v53  ;;  %v386_v60 = vsel %vm258_vm9, %v194_v38, %v322_v49  ;;  %v196_v63 = vadd.f32 %v898_v2, %v125_v51  ;;  %v197_v0 = vadd.f32 %v898_v2, %v126_v54  ;;  %v67_v51 = vld [vmem:[%s1473_s0 + $0x1a8] sm:$0xff] }
  0x40   :  { %705 = vst.msk [vmem:[%s1476_s3 + $0x90] sm:$0xf] %vm668_vm0, %v839_v52  ;;  %v841_v62 = vpack.c.bf16 %v386_v60, %v386_v60  ;;  %v198_v3 = vadd.f32 %v898_v2, %v127_v55  ;;  %v387_v4 = vsel %vm259_vm10, %v195_v50, %v323_v61  ;;  %v128_v5 = vmul.f32 %v893_v1, %v57_v56 }
  0x41   :  { %706 = vst.msk [vmem:[%s1476_s3 + $0x94] sm:$0xf] %vm668_vm0, %v840_v59  ;;  %v129_v6 = vmul.f32 %v893_v1, %v58_v57  ;;  %v130_v7 = vmul.f32 %v893_v1, %v59_v58  ;;  %v842_v9 = vpack.c.bf16 %v387_v4, %v387_v4  ;;  %vm260_vm11 = vcmp.gt.f32.partialorder %v196_v63, 0.0  ;;  %v69_v4 = vld [vmem:[%s1473_s0 + $0x1b8] sm:$0xff] }
  0x42   :  { %707 = vst.msk [vmem:[%s1476_s3 + $0x98] sm:$0xf] %vm668_vm0, %v841_v62  ;;  %v324_v10 = vmul.f32 0.2, %v196_v63  ;;  %vm261_vm12 = vcmp.gt.f32.partialorder %v197_v0, 0.0  ;;  %vm262_vm13 = vcmp.gt.f32.partialorder %v198_v3, 0.0  ;;  %v199_v13 = vadd.f32 %v898_v2, %v128_v5 }
  0x43   :  { %v325_v11 = vmul.f32 0.2, %v197_v0  ;;  %v326_v12 = vmul.f32 0.2, %v198_v3  ;;  %708 = vst.msk [vmem:[%s1476_s3 + $0x9c] sm:$0xf] %vm668_vm0, %v842_v9  ;;  %v200_v15 = vadd.f32 %v898_v2, %v129_v6  ;;  %v201_v16 = vadd.f32 %v898_v2, %v130_v7 }
  0x44   :  { %v388_v14 = vsel %vm260_vm11, %v196_v63, %v324_v10  ;;  %v131_v17 = vmul.f32 %v893_v1, %v60_v8  ;;  %vm263_vm14 = vcmp.gt.f32.partialorder %v199_v13, 0.0  ;;  %v327_v26 = vmul.f32 0.2, %v199_v13  ;;  %v68_v62 = vld [vmem:[%s1473_s0 + $0x1b0] sm:$0xff]  ;;  %v70_v5 = vld [vmem:[%s1473_s0 + $0x1c0] sm:$0xff] }
  0x45   :  { %v843_v18 = vpack.c.bf16 %v388_v14, %v388_v14  ;;  %v389_v19 = vsel %vm261_vm12, %v197_v0, %v325_v11  ;;  %v390_v20 = vsel %vm262_vm13, %v198_v3, %v326_v12  ;;  %vm264_vm15 = vcmp.gt.f32.partialorder %v200_v15, 0.0 }
  0x46   :  { %v844_v24 = vpack.c.bf16 %v389_v19, %v389_v19  ;;  %v845_v25 = vpack.c.bf16 %v390_v20, %v390_v20  ;;  %v328_v27 = vmul.f32 0.2, %v200_v15  ;;  %vm265_vm1 = vcmp.gt.f32.partialorder %v201_v16, 0.0 }
  0x47   :  { %709 = vst.msk [vmem:[%s1476_s3 + $0xa0] sm:$0xf] %vm668_vm0, %v843_v18  ;;  %v329_v28 = vmul.f32 0.2, %v201_v16  ;;  %v202_v29 = vadd.f32 %v898_v2, %v131_v17  ;;  %v391_v30 = vsel %vm263_vm14, %v199_v13, %v327_v26  ;;  %v132_v31 = vmul.f32 %v893_v1, %v61_v21  ;;  %v72_v17 = vld [vmem:[%s1473_s0 + $0x1d0] sm:$0xff]  ;;  %v73_v18 = vld [vmem:[%s1473_s0 + $0x1d8] sm:$0xff] }
  0x48   :  { %710 = vst.msk [vmem:[%s1476_s3 + $0xa4] sm:$0xf] %vm668_vm0, %v844_v24  ;;  %711 = vst.msk [vmem:[%s1476_s3 + $0xa8] sm:$0xf] %vm668_vm0, %v845_v25  ;;  %v133_v32 = vmul.f32 %v893_v1, %v62_v22  ;;  %v134_v33 = vmul.f32 %v893_v1, %v63_v23  ;;  %v846_v36 = vpack.c.bf16 %v391_v30, %v391_v30  ;;  %v74_v30 = vld [vmem:[%s1473_s0 + $0x1e0] sm:$0xff] }
  0x49   :  { %v392_v37 = vsel %vm264_vm15, %v200_v15, %v328_v27  ;;  %v393_v38 = vsel %vm265_vm1, %v201_v16, %v329_v28  ;;  %vm266_vm2 = vcmp.gt.f32.partialorder %v202_v29, 0.0  ;;  %v330_v42 = vmul.f32 0.2, %v202_v29  ;;  %v71_v16 = vld [vmem:[%s1473_s0 + $0x1c8] sm:$0xff] }
  0x4a   :  { %v847_v40 = vpack.c.bf16 %v392_v37, %v392_v37  ;;  %v848_v41 = vpack.c.bf16 %v393_v38, %v393_v38  ;;  %v203_v43 = vadd.f32 %v898_v2, %v132_v31  ;;  %712 = vst.msk [vmem:[%s1476_s3 + $0xac] sm:$0xf] %vm668_vm0, %v846_v36  ;;  %v204_v44 = vadd.f32 %v898_v2, %v133_v32 }
  0x4b   :  { %v205_v45 = vadd.f32 %v898_v2, %v134_v33  ;;  %v135_v46 = vmul.f32 %v893_v1, %v64_v34  ;;  %v136_v47 = vmul.f32 %v893_v1, %v65_v35  ;;  %v394_v48 = vsel %vm266_vm2, %v202_v29, %v330_v42 }
  0x4c   :  { %713 = vst.msk [vmem:[%s1476_s3 + $0xb0] sm:$0xf] %vm668_vm0, %v847_v40  ;;  %714 = vst.msk [vmem:[%s1476_s3 + $0xb4] sm:$0xf] %vm668_vm0, %v848_v41  ;;  %vm267_vm3 = vcmp.gt.f32.partialorder %v203_v43, 0.0  ;;  %v137_v50 = vmul.f32 %v893_v1, %v66_v39  ;;  %v849_v52 = vpack.c.bf16 %v394_v48, %v394_v48  ;;  %vm268_vm4 = vcmp.gt.f32.partialorder %v204_v44, 0.0 }
  0x4d   :  { %v331_v49 = vmul.f32 0.2, %v203_v43  ;;  %v332_v53 = vmul.f32 0.2, %v204_v44  ;;  %vm269_vm5 = vcmp.gt.f32.partialorder %v205_v45, 0.0  ;;  %v206_v56 = vadd.f32 %v898_v2, %v135_v46 }
  0x4e   :  { %v333_v55 = vmul.f32 0.2, %v205_v45  ;;  %v207_v57 = vadd.f32 %v898_v2, %v136_v47  ;;  %715 = vst.msk [vmem:[%s1476_s3 + $0xb8] sm:$0xf] %vm668_vm0, %v849_v52  ;;  %v208_v60 = vadd.f32 %v898_v2, %v137_v50  ;;  %v138_v61 = vmul.f32 %v893_v1, %v67_v51 }
  0x4f   :  { %v395_v54 = vsel %vm267_vm3, %v203_v43, %v331_v49  ;;  %v396_v59 = vsel %vm268_vm4, %v204_v44, %v332_v53  ;;  %vm270_vm6 = vcmp.gt.f32.partialorder %v206_v56, 0.0  ;;  %v334_v3 = vmul.f32 0.2, %v206_v56  ;;  %v75_v43 = vld [vmem:[%s1473_s0 + $0x1e8] sm:$0xff]  ;;  %v76_v44 = vld [vmem:[%s1473_s0 + $0x1f0] sm:$0xff] }
  0x50   :  { %v850_v58 = vpack.c.bf16 %v395_v54, %v395_v54  ;;  %v851_v63 = vpack.c.bf16 %v396_v59, %v396_v59  ;;  %v397_v0 = vsel %vm269_vm5, %v205_v45, %v333_v55  ;;  %vm271_vm7 = vcmp.gt.f32.partialorder %v207_v57, 0.0  ;;  %v77_v45 = vld [vmem:[%s1473_s0 + $0x1f8] sm:$0xff] }
  0x51   :  { %v852_v6 = vpack.c.bf16 %v397_v0, %v397_v0  ;;  %v335_v7 = vmul.f32 0.2, %v207_v57  ;;  %vm272_vm8 = vcmp.gt.f32.partialorder %v208_v60, 0.0  ;;  %v398_v8 = vsel %vm270_vm6, %v206_v56, %v334_v3 }
  0x52   :  { %716 = vst.msk [vmem:[%s1476_s3 + $0xbc] sm:$0xf] %vm668_vm0, %v850_v58  ;;  %717 = vst.msk [vmem:[%s1476_s3 + $0xc0] sm:$0xf] %vm668_vm0, %v851_v63  ;;  %v336_v9 = vmul.f32 0.2, %v208_v60  ;;  %v209_v10 = vadd.f32 %v898_v2, %v138_v61  ;;  %v139_v11 = vmul.f32 %v893_v1, %v68_v62  ;;  %v853_v12 = vpack.c.bf16 %v398_v8, %v398_v8 }
  0x53   :  { %718 = vst.msk [vmem:[%s1476_s3 + $0xc4] sm:$0xf] %vm668_vm0, %v852_v6  ;;  %v399_v13 = vsel %vm271_vm7, %v207_v57, %v335_v7  ;;  %v140_v14 = vmul.f32 %v893_v1, %v69_v4  ;;  %v141_v15 = vmul.f32 %v893_v1, %v70_v5  ;;  %v142_v27 = vmul.f32 %v893_v1, %v71_v16 }
  0x54   :  { %v854_v19 = vpack.c.bf16 %v399_v13, %v399_v13  ;;  %v400_v20 = vsel %vm272_vm8, %v208_v60, %v336_v9  ;;  %vm273_vm9 = vcmp.gt.f32.partialorder %v209_v10, 0.0  ;;  %v337_v21 = vmul.f32 0.2, %v209_v10  ;;  %719 = vst.msk [vmem:[%s1476_s3 + $0xc8] sm:$0xf] %vm668_vm0, %v853_v12 }
  0x55   :  { %v855_v22 = vpack.c.bf16 %v400_v20, %v400_v20  ;;  %v210_v23 = vadd.f32 %v898_v2, %v139_v11  ;;  %v211_v24 = vadd.f32 %v898_v2, %v140_v14  ;;  %v212_v25 = vadd.f32 %v898_v2, %v141_v15 }
  0x56   :  { %720 = vst.msk [vmem:[%s1476_s3 + $0xcc] sm:$0xf] %vm668_vm0, %v854_v19  ;;  %v401_v26 = vsel %vm273_vm9, %v209_v10, %v337_v21  ;;  %v143_v28 = vmul.f32 %v893_v1, %v72_v17  ;;  %v144_v29 = vmul.f32 %v893_v1, %v73_v18  ;;  %v213_v35 = vadd.f32 %v898_v2, %v142_v27 }
  0x57   :  { %721 = vst.msk [vmem:[%s1476_s3 + $0xd0] sm:$0xf] %vm668_vm0, %v855_v22  ;;  %v856_v31 = vpack.c.bf16 %v401_v26, %v401_v26  ;;  %vm274_vm10 = vcmp.gt.f32.partialorder %v210_v23, 0.0  ;;  %v338_v32 = vmul.f32 0.2, %v210_v23  ;;  %vm275_vm11 = vcmp.gt.f32.partialorder %v211_v24, 0.0 }
  0x58   :  { %v339_v33 = vmul.f32 0.2, %v211_v24  ;;  %vm276_vm12 = vcmp.gt.f32.partialorder %v212_v25, 0.0  ;;  %v340_v34 = vmul.f32 0.2, %v212_v25  ;;  %v214_v37 = vadd.f32 %v898_v2, %v143_v28 }
  0x59   :  { %722 = vst.msk [vmem:[%s1476_s3 + $0xd4] sm:$0xf] %vm668_vm0, %v856_v31  ;;  %v402_v36 = vsel %vm274_vm10, %v210_v23, %v338_v32  ;;  %v215_v38 = vadd.f32 %v898_v2, %v144_v29  ;;  %v145_v39 = vmul.f32 %v893_v1, %v74_v30  ;;  %vm277_vm13 = vcmp.gt.f32.partialorder %v213_v35, 0.0 }
  0x5a   :  { %v857_v40 = vpack.c.bf16 %v402_v36, %v402_v36  ;;  %v403_v41 = vsel %vm275_vm11, %v211_v24, %v339_v33  ;;  %v404_v42 = vsel %vm276_vm12, %v212_v25, %v340_v34  ;;  %v341_v48 = vmul.f32 0.2, %v213_v35 }
  0x5b   :  { %v858_v46 = vpack.c.bf16 %v403_v41, %v403_v41  ;;  %v859_v47 = vpack.c.bf16 %v404_v42, %v404_v42  ;;  %vm278_vm14 = vcmp.gt.f32.partialorder %v214_v37, 0.0  ;;  %v342_v49 = vmul.f32 0.2, %v214_v37 }
  0x5c   :  { %723 = vst.msk [vmem:[%s1476_s3 + $0xd8] sm:$0xf] %vm668_vm0, %v857_v40  ;;  %vm279_vm15 = vcmp.gt.f32.partialorder %v215_v38, 0.0  ;;  %v343_v50 = vmul.f32 0.2, %v215_v38  ;;  %v216_v51 = vadd.f32 %v898_v2, %v145_v39  ;;  %v405_v52 = vsel %vm277_vm13, %v213_v35, %v341_v48 }
  0x5d   :  { %724 = vst.msk [vmem:[%s1476_s3 + $0xdc] sm:$0xf] %vm668_vm0, %v858_v46  ;;  %725 = vst.msk [vmem:[%s1476_s3 + $0xe0] sm:$0xf] %vm668_vm0, %v859_v47  ;;  %v146_v53 = vmul.f32 %v893_v1, %v75_v43  ;;  %v147_v54 = vmul.f32 %v893_v1, %v76_v44  ;;  %v148_v55 = vmul.f32 %v893_v1, %v77_v45 }
  0x5e   :  { %v860_v56 = vpack.c.bf16 %v405_v52, %v405_v52  ;;  %v406_v57 = vsel %vm278_vm14, %v214_v37, %v342_v49  ;;  %v407_v58 = vsel %vm279_vm15, %v215_v38, %v343_v50  ;;  %vm280_vm1 = vcmp.gt.f32.partialorder %v216_v51, 0.0 }
  0x5f   :  { %v861_v59 = vpack.c.bf16 %v406_v57, %v406_v57  ;;  %v862_v60 = vpack.c.bf16 %v407_v58, %v407_v58  ;;  %v344_v61 = vmul.f32 0.2, %v216_v51  ;;  %v217_v62 = vadd.f32 %v898_v2, %v146_v53 }
  0x60   :  { %726 = vst.msk [vmem:[%s1476_s3 + $0xe4] sm:$0xf] %vm668_vm0, %v860_v56  ;;  %v218_v63 = vadd.f32 %v898_v2, %v147_v54  ;;  %v219_v0 = vadd.f32 %v898_v2, %v148_v55 }
  0x61   :  { %727 = vst.msk [vmem:[%s1476_s3 + $0xe8] sm:$0xf] %vm668_vm0, %v861_v59  ;;  %728 = vst.msk [vmem:[%s1476_s3 + $0xec] sm:$0xf] %vm668_vm0, %v862_v60  ;;  %v408_v1 = vsel %vm280_vm1, %v216_v51, %v344_v61  ;;  %vm281_vm2 = vcmp.gt.f32.partialorder %v217_v62, 0.0 }
  0x62   :  { %v345_v3 = vmul.f32 0.2, %v217_v62  ;;  %v863_v4 = vpack.c.bf16 %v408_v1, %v408_v1  ;;  %vm282_vm3 = vcmp.gt.f32.partialorder %v218_v63, 0.0  ;;  %v346_v5 = vmul.f32 0.2, %v218_v63 }
  0x63   :  { %vm283_vm4 = vcmp.gt.f32.partialorder %v219_v0, 0.0  ;;  %v347_v7 = vmul.f32 0.2, %v219_v0 }
  0x64   :  { %v409_v6 = vsel %vm281_vm2, %v217_v62, %v345_v3  ;;  %729 = vst.msk [vmem:[%s1476_s3 + $0xf0] sm:$0xf] %vm668_vm0, %v863_v4  ;;  %v410_v8 = vsel %vm282_vm3, %v218_v63, %v346_v5 }
  0x65   :  { %v864_v2 = vpack.c.bf16 %v409_v6, %v409_v6  ;;  %v865_v9 = vpack.c.bf16 %v410_v8, %v410_v8  ;;  %v411_v10 = vsel %vm283_vm4, %v219_v0, %v347_v7 }
  0x66   :  { %v866_v11 = vpack.c.bf16 %v411_v10, %v411_v10 }
  0x67   :  { %730 = vst.msk [vmem:[%s1476_s3 + $0xf4] sm:$0xf] %vm668_vm0, %v864_v2  ;;  %731 = vst.msk [vmem:[%s1476_s3 + $0xf8] sm:$0xf] %vm668_vm0, %v865_v9 }
  0x68   :  { %732 = vst.msk [vmem:[%s1476_s3 + $0xfc] sm:$0xf] %vm668_vm0, %v866_v11 }

// kernel: discriminator_forward.10
= control target key start
LH: loop header
LB: loop body
LE: loop exit
PB: predicated region body
PF: predicated region fallthrough
CT: control target
= control target key end

     0   :  { %vm335_vm0 = vcmask 261120   ;;  %vm442_vm1 = vcmask 1040384   ;;  %vm444_vm2 = vcmask 254976   ;;  %s851_s1 = inlined_call_operand.vmem [shape: bf16[256,32], index: 1, kind: input, shape index: {}]   ;;  %s852_s0 = inlined_call_operand.vmem [shape: bf16[128,256], index: 0, kind: input, shape index: {}]   ;;  %s853_s2 = inlined_call_operand.vmem [shape: f32[128,32], index: 2, kind: output, shape index: {0}]   ;;  %s854_s3 = inlined_call_operand.vmem [shape: f32[1,2,32], index: 3, kind: output, shape index: {1}]  }
   0x1   :  { %v566_v0 = vld [vmem:[%s851_s1 + $0x40] sm:$0xff]   ;;  %v568_v2 = vld [vmem:[%s851_s1 + $0x48] sm:$0xff]   ;;  %v570_v4 = vld [vmem:[%s851_s1 + $0x50] sm:$0xff]  }
   0x2   :  { %v567_v1 = vld [vmem:[%s851_s1] sm:$0xff]   ;;  %486 = vmatprep.subr.bf16.mxu0 %v566_v0  ;;  %550 = vmatprep.subr.bf16.mxu1 %v566_v0  ;;  %v569_v3 = vld [vmem:[%s851_s1 + $0x8] sm:$0xff]   ;;  %v571_v5 = vld [vmem:[%s851_s1 + $0x10] sm:$0xff]  }
   0x3   :  { %487 = vmatpush3.bf16.msra.mxu0 %v567_v1  ;;  %558 = vmatpush3.bf16.msra.mxu1 %v567_v1  ;;  %v572_v6 = vld [vmem:[%s851_s1 + $0x58] sm:$0xff]   ;;  %v574_v8 = vld [vmem:[%s851_s1 + $0x60] sm:$0xff]   ;;  %v576_v10 = vld [vmem:[%s851_s1 + $0x68] sm:$0xff]  }
   0x4   :  { %488 = vmatprep.subr.bf16.mxu0 %v568_v2  ;;  %551 = vmatprep.subr.bf16.mxu1 %v568_v2  ;;  %v573_v7 = vld [vmem:[%s851_s1 + $0x18] sm:$0xff]   ;;  %v575_v9 = vld [vmem:[%s851_s1 + $0x20] sm:$0xff]   ;;  %v577_v12 = vld [vmem:[%s851_s1 + $0x28] sm:$0xff]  }
   0x5   :  { %v584_v11 = vld [vmem:[%s852_s0 + $0x4] ss:$8 sps:$4 sm:$0xff]   ;;  %v578_v14 = vld [vmem:[%s851_s1 + $0x70] sm:$0xff]   ;;  %v580_v16 = vld [vmem:[%s851_s1 + $0x78] sm:$0xff]  }
   0x6   :  { %v590_v13 = vld [vmem:[%s852_s0 + $0x44] ss:$8 sps:$4 sm:$0xff]   ;;  %270 = vmatprep.mubr.bf16.mxu0 %v584_v11  ;;  %v579_v15 = vld [vmem:[%s851_s1 + $0x30] sm:$0xff]   ;;  %v581_v17 = vld [vmem:[%s851_s1 + $0x38] sm:$0xff]  }
   0x7   :  { %489 = vmatpush3.bf16.msra.mxu0 %v569_v3  ;;  %559 = vmatpush3.bf16.msra.mxu1 %v569_v3  ;;  %v582_v18 = vld [vmem:[%s852_s0] ss:$8 sps:$4 sm:$0xff]   ;;  %v585_v20 = vld [vmem:[%s852_s0 + $0x14] ss:$8 sps:$4 sm:$0xff]   ;;  %v587_v22 = vld [vmem:[%s852_s0 + $0x10] ss:$8 sps:$4 sm:$0xff]  }
   0x8   :  { %490 = vmatprep.subr.bf16.mxu0 %v570_v4  ;;  %552 = vmatprep.subr.bf16.mxu1 %v570_v4  ;;  %v588_v19 = vld [vmem:[%s852_s0 + $0x40] ss:$8 sps:$4 sm:$0xff]   ;;  %v594_v21 = vld [vmem:[%s852_s0 + $0x54] ss:$8 sps:$4 sm:$0xff]   ;;  %v596_v23 = vld [vmem:[%s852_s0 + $0x50] ss:$8 sps:$4 sm:$0xff]  }
   0x9   :  { %302 = vmatprep.mubr.bf16.mxu1 %v590_v13  ;;  %v591_v24 = vld [vmem:[%s852_s0 + $0x24] ss:$8 sps:$4 sm:$0xff]   ;;  %v593_v26 = vld [vmem:[%s852_s0 + $0x20] ss:$8 sps:$4 sm:$0xff]   ;;  %v597_v28 = vld [vmem:[%s852_s0 + $0x34] ss:$8 sps:$4 sm:$0xff]  }
   0xa   :  { %v600_v25 = vld [vmem:[%s852_s0 + $0x64] ss:$8 sps:$4 sm:$0xff]   ;;  %v602_v27 = vld [vmem:[%s852_s0 + $0x60] ss:$8 sps:$4 sm:$0xff]   ;;  %v603_v29 = vld [vmem:[%s852_s0 + $0x74] ss:$8 sps:$4 sm:$0xff]  }
   0xb   :  { %491 = vmatpush3.bf16.msra.mxu0 %v571_v5  ;;  %560 = vmatpush3.bf16.msra.mxu1 %v571_v5  ;;  %v599_v30 = vld [vmem:[%s852_s0 + $0x30] ss:$8 sps:$4 sm:$0xff]  }
   0xc   :  { %492 = vmatprep.subr.bf16.mxu0 %v572_v6  ;;  %553 = vmatprep.subr.bf16.mxu1 %v572_v6  ;;  %v605_v31 = vld [vmem:[%s852_s0 + $0x70] ss:$8 sps:$4 sm:$0xff]  }
   0xf   :  { %493 = vmatpush3.bf16.msra.mxu0 %v573_v7  ;;  %561 = vmatpush3.bf16.msra.mxu1 %v573_v7 }
  0x10   :  { %494 = vmatprep.subr.bf16.mxu0 %v574_v8  ;;  %554 = vmatprep.subr.bf16.mxu1 %v574_v8 }
  0x13   :  { %495 = vmatpush3.bf16.msra.mxu0 %v575_v9  ;;  %562 = vmatpush3.bf16.msra.mxu1 %v575_v9 }
  0x14   :  { %496 = vmatprep.subr.bf16.mxu0 %v576_v10  ;;  %555 = vmatprep.subr.bf16.mxu1 %v576_v10 }
  0x17   :  { %497 = vmatpush3.bf16.msra.mxu0 %v577_v12  ;;  %563 = vmatpush3.bf16.msra.mxu1 %v577_v12 }
  0x18   :  { %498 = vmatprep.subr.bf16.mxu0 %v578_v14  ;;  %556 = vmatprep.subr.bf16.mxu1 %v578_v14 }
  0x1b   :  { %499 = vmatpush3.bf16.msra.mxu0 %v579_v15  ;;  %564 = vmatpush3.bf16.msra.mxu1 %v579_v15 }
  0x1c   :  { %500 = vmatprep.subr.bf16.mxu0 %v580_v16  ;;  %557 = vmatprep.subr.bf16.mxu1 %v580_v16 }
  0x1f   :  { %501 = vmatpush3.bf16.msra.mxu0 %v581_v17  ;;  %565 = vmatpush3.bf16.msra.mxu1 %v581_v17 }
  0x22   :  { %271 = vmatmul.mubr.bf16.vlgmr.msra.gmra.mrb[0].mxu0 %v582_v18  ;;  %303 = vmatmul.mubr.bf16.vlgmr.msra.gmra.mrb[0].mxu1 %v588_v19 }
  0x23   :  { %278 = vmatprep.mubr.bf16.mxu0 %v585_v20  ;;  %310 = vmatprep.mubr.bf16.mxu1 %v594_v21 }
  0x2a   :  { %279 = vmatmul.mubr.bf16.gmra.mrb[4].mxu0 %v587_v22  ;;  %311 = vmatmul.mubr.bf16.gmra.mrb[4].mxu1 %v596_v23 }
  0x2b   :  { %286 = vmatprep.mubr.bf16.mxu0 %v591_v24  ;;  %318 = vmatprep.mubr.bf16.mxu1 %v600_v25 }
  0x32   :  { %287 = vmatmul.mubr.bf16.gmra.mrb[8].mxu0 %v593_v26  ;;  %319 = vmatmul.mubr.bf16.gmra.mrb[8].mxu1 %v602_v27 }
  0x33   :  { %294 = vmatprep.mubr.bf16.mxu0 %v597_v28  ;;  %326 = vmatprep.mubr.bf16.mxu1 %v603_v29 }
  0x3a   :  { %295 = vmatmul.mubr.bf16.gmra.mrb[12].mxu0 %v599_v30  ;;  %327 = vmatmul.mubr.bf16.gmra.mrb[12].mxu1 %v605_v31 }
  0xf5   :  { %v502_v32 = vpop.f32.mrb[0].mxu0  ;;  %v526_v33 = vpop.f32.mrb[0].mxu1 }
  0xf6   :  { %v503_v34 = vpop.f32.mrb[1].mxu0  ;;  %v527_v35 = vpop.f32.mrb[1].mxu1 }
  0xf7   :  { %v504_v36 = vadd.f32 %v503_v34, %v502_v32  ;;  %v505_v37 = vpop.f32.mrb[2].mxu0  ;;  %v722_v38 = vadd.f32 %v527_v35, %v526_v33  ;;  %v529_v39 = vpop.f32.mrb[2].mxu1 }
  0xf8   :  { %v506_v40 = vpop.f32.mrb[3].mxu0  ;;  %v530_v41 = vpop.f32.mrb[3].mxu1 }
  0xf9   :  { %336 = vst.msk [vmem:[%s853_s2] sm:$0xff] %vm335_vm0, %v504_v36  ;;  %v389_v42 = vmul.f32 %v504_v36, %v504_v36  ;;  %v507_v43 = vadd.f32 %v506_v40, %v505_v37  ;;  %344 = vst.msk [vmem:[%s853_s2 + $0x40] sm:$0xff] %vm335_vm0, %v722_v38  ;;  %v733_v44 = vadd.f32 %v530_v41, %v529_v39  ;;  %v352_v45 = vsel %vm335_vm0, %v504_v36, 0.0 }
  0xfb   :  { %337 = vst.msk [vmem:[%s853_s2 + $0x8] sm:$0xff] %vm335_vm0, %v507_v43  ;;  %v353_v46 = vsel %vm335_vm0, %v507_v43, 0.0  ;;  %v390_v47 = vmul.f32 %v507_v43, %v507_v43  ;;  %345 = vst.msk [vmem:[%s853_s2 + $0x48] sm:$0xff] %vm335_vm0, %v733_v44  ;;  %v405_v49 = vsel %vm335_vm0, %v389_v42, 0.0 }
  0xfc   :  { %v354_v48 = vadd.f32 %v353_v46, %v352_v45 }
  0xfd   :  { %v406_v50 = vsel %vm335_vm0, %v390_v47, 0.0  ;;  %v508_v51 = vpop.f32.mrb[4].mxu0  ;;  %v532_v52 = vpop.f32.mrb[4].mxu1 }
  0xfe   :  { %v407_v53 = vadd.f32 %v406_v50, %v405_v49  ;;  %v509_v54 = vpop.f32.mrb[5].mxu0  ;;  %v533_v55 = vpop.f32.mrb[5].mxu1  ;;  %v397_v49 = vmul.f32 %v722_v38, %v722_v38 }
  0xff   :  { %v510_v56 = vadd.f32 %v509_v54, %v508_v51  ;;  %v511_v57 = vpop.f32.mrb[6].mxu0  ;;  %v748_v58 = vadd.f32 %v533_v55, %v532_v52  ;;  %v535_v59 = vpop.f32.mrb[6].mxu1  ;;  %v367_v55 = vsel %vm335_vm0, %v722_v38, 0.0 }
 0x100   :  { %v512_v60 = vpop.f32.mrb[7].mxu0  ;;  %v536_v61 = vpop.f32.mrb[7].mxu1 }
 0x101   :  { %338 = vst.msk [vmem:[%s853_s2 + $0x10] sm:$0xff] %vm335_vm0, %v510_v56  ;;  %v355_v62 = vsel %vm335_vm0, %v510_v56, 0.0  ;;  %v391_v63 = vmul.f32 %v510_v56, %v510_v56  ;;  %v513_v0 = vadd.f32 %v512_v60, %v511_v57  ;;  %346 = vst.msk [vmem:[%s853_s2 + $0x50] sm:$0xff] %vm335_vm0, %v748_v58  ;;  %v760_v2 = vadd.f32 %v536_v61, %v535_v59 }
 0x102   :  { %v356_v1 = vadd.f32 %v355_v62, %v354_v48  ;;  %v398_v56 = vmul.f32 %v733_v44, %v733_v44  ;;  %v420_v61 = vsel %vm335_vm0, %v397_v49, 0.0  ;;  %v369_v62 = vsel %vm335_vm0, %v733_v44, 0.0 }
 0x103   :  { %v408_v3 = vsel %vm335_vm0, %v391_v63, 0.0  ;;  %339 = vst.msk [vmem:[%s853_s2 + $0x18] sm:$0xff] %vm335_vm0, %v513_v0  ;;  %v357_v4 = vsel %vm335_vm0, %v513_v0, 0.0  ;;  %v392_v5 = vmul.f32 %v513_v0, %v513_v0  ;;  %347 = vst.msk [vmem:[%s853_s2 + $0x58] sm:$0xff] %vm335_vm0, %v760_v2  ;;  %v399_v63 = vmul.f32 %v748_v58, %v748_v58 }
 0x104   :  { %v409_v6 = vadd.f32 %v408_v3, %v407_v53  ;;  %v358_v7 = vadd.f32 %v357_v4, %v356_v1  ;;  %v422_v3 = vsel %vm335_vm0, %v398_v56, 0.0  ;;  %v371_v38 = vsel %vm335_vm0, %v748_v58, 0.0 }
 0x105   :  { %v410_v8 = vsel %vm335_vm0, %v392_v5, 0.0  ;;  %v514_v9 = vpop.f32.mrb[8].mxu0  ;;  %v538_v10 = vpop.f32.mrb[8].mxu1  ;;  %v400_v4 = vmul.f32 %v760_v2, %v760_v2  ;;  %v373_v44 = vsel %vm335_vm0, %v760_v2, 0.0 }
 0x106   :  { %v411_v11 = vadd.f32 %v410_v8, %v409_v6  ;;  %v515_v12 = vpop.f32.mrb[9].mxu0  ;;  %v539_v13 = vpop.f32.mrb[9].mxu1 }
 0x107   :  { %v516_v14 = vadd.f32 %v515_v12, %v514_v9  ;;  %v517_v15 = vpop.f32.mrb[10].mxu0  ;;  %v774_v16 = vadd.f32 %v539_v13, %v538_v10  ;;  %v541_v17 = vpop.f32.mrb[10].mxu1 }
 0x108   :  { %v518_v18 = vpop.f32.mrb[11].mxu0  ;;  %v542_v19 = vpop.f32.mrb[11].mxu1 }
 0x109   :  { %340 = vst.msk [vmem:[%s853_s2 + $0x20] sm:$0xff] %vm335_vm0, %v516_v14  ;;  %v359_v20 = vsel %vm335_vm0, %v516_v14, 0.0  ;;  %v393_v21 = vmul.f32 %v516_v14, %v516_v14  ;;  %v519_v22 = vadd.f32 %v518_v18, %v517_v15  ;;  %348 = vst.msk [vmem:[%s853_s2 + $0x60] sm:$0xff] %vm335_vm0, %v774_v16  ;;  %v543_v24 = vadd.f32 %v542_v19, %v541_v17 }
 0x10a   :  { %v360_v23 = vadd.f32 %v359_v20, %v358_v7  ;;  %v424_v7 = vsel %vm335_vm0, %v399_v63, 0.0  ;;  %v401_v8 = vmul.f32 %v774_v16, %v774_v16  ;;  %v375_v58 = vsel %vm335_vm0, %v774_v16, 0.0 }
 0x10b   :  { %v412_v25 = vsel %vm335_vm0, %v393_v21, 0.0  ;;  %341 = vst.msk [vmem:[%s853_s2 + $0x28] sm:$0xff] %vm335_vm0, %v519_v22  ;;  %v361_v26 = vsel %vm335_vm0, %v519_v22, 0.0  ;;  %v394_v27 = vmul.f32 %v519_v22, %v519_v22  ;;  %349 = vst.msk [vmem:[%s853_s2 + $0x68] sm:$0xff] %vm335_vm0, %v543_v24  ;;  %v402_v12 = vmul.f32 %v543_v24, %v543_v24 }
 0x10c   :  { %v413_v28 = vadd.f32 %v412_v25, %v411_v11  ;;  %v362_v29 = vadd.f32 %v361_v26, %v360_v23  ;;  %v426_v11 = vsel %vm335_vm0, %v400_v4, 0.0  ;;  %v428_v17 = vsel %vm335_vm0, %v401_v8, 0.0 }
 0x10d   :  { %v414_v30 = vsel %vm335_vm0, %v394_v27, 0.0  ;;  %v520_v31 = vpop.f32.mrb[12].mxu0  ;;  %v544_v32 = vpop.f32.mrb[12].mxu1  ;;  %v377_v18 = vsel %vm335_vm0, %v543_v24, 0.0  ;;  %v430_v21 = vsel %vm335_vm0, %v402_v12, 0.0 }
 0x10e   :  { %v415_v33 = vadd.f32 %v414_v30, %v413_v28  ;;  %v521_v34 = vpop.f32.mrb[13].mxu0  ;;  %v545_v35 = vpop.f32.mrb[13].mxu1 }
 0x10f   :  { %v522_v36 = vadd.f32 %v521_v34, %v520_v31  ;;  %v523_v37 = vpop.f32.mrb[14].mxu0  ;;  %v546_v39 = vadd.f32 %v545_v35, %v544_v32  ;;  %v547_v40 = vpop.f32.mrb[14].mxu1 }
 0x110   :  { %v524_v41 = vpop.f32.mrb[15].mxu0  ;;  %v548_v42 = vpop.f32.mrb[15].mxu1 }
 0x111   :  { %342 = vst.msk [vmem:[%s853_s2 + $0x30] sm:$0xff] %vm335_vm0, %v522_v36  ;;  %v363_v43 = vsel %vm335_vm0, %v522_v36, 0.0  ;;  %v395_v45 = vmul.f32 %v522_v36, %v522_v36  ;;  %v525_v46 = vadd.f32 %v524_v41, %v523_v37  ;;  %350 = vst.msk [vmem:[%s853_s2 + $0x70] sm:$0xff] %vm335_vm0, %v546_v39  ;;  %v549_v48 = vadd.f32 %v548_v42, %v547_v40 }
 0x112   :  { %v364_v47 = vadd.f32 %v363_v43, %v362_v29  ;;  %v403_v13 = vmul.f32 %v546_v39, %v546_v39  ;;  %v379_v2 = vsel %vm335_vm0, %v546_v39, 0.0 }
 0x113   :  { %v416_v50 = vsel %vm335_vm0, %v395_v45, 0.0  ;;  %343 = vst.msk [vmem:[%s853_s2 + $0x38] sm:$0xff] %vm335_vm0, %v525_v46  ;;  %v365_v51 = vsel %vm335_vm0, %v525_v46, 0.0  ;;  %v396_v52 = vmul.f32 %v525_v46, %v525_v46  ;;  %351 = vst.msk [vmem:[%s853_s2 + $0x78] sm:$0xff] %vm335_vm0, %v549_v48  ;;  %v404_v23 = vmul.f32 %v549_v48, %v549_v48 }
 0x114   :  { %v417_v53 = vadd.f32 %v416_v50, %v415_v33  ;;  %v366_v54 = vadd.f32 %v365_v51, %v364_v47  ;;  %v432_v22 = vsel %vm335_vm0, %v403_v13, 0.0  ;;  %v381_v16 = vsel %vm335_vm0, %v549_v48, 0.0 }
 0x115   :  { %v418_v57 = vsel %vm335_vm0, %v396_v52, 0.0  ;;  %v434_v29 = vsel %vm335_vm0, %v404_v23, 0.0 }
 0x116   :  { %v368_v59 = vadd.f32 %v367_v55, %v366_v54  ;;  %v419_v60 = vadd.f32 %v418_v57, %v417_v53 }
 0x118   :  { %v370_v0 = vadd.f32 %v369_v62, %v368_v59  ;;  %v421_v1 = vadd.f32 %v420_v61, %v419_v60 }
 0x11a   :  { %v423_v5 = vadd.f32 %v422_v3, %v421_v1  ;;  %v372_v6 = vadd.f32 %v371_v38, %v370_v0 }
 0x11c   :  { %v374_v9 = vadd.f32 %v373_v44, %v372_v6  ;;  %v425_v10 = vadd.f32 %v424_v7, %v423_v5 }
 0x11e   :  { %v376_v14 = vadd.f32 %v375_v58, %v374_v9  ;;  %v427_v15 = vadd.f32 %v426_v11, %v425_v10 }
 0x120   :  { %v429_v19 = vadd.f32 %v428_v17, %v427_v15  ;;  %v378_v20 = vadd.f32 %v377_v18, %v376_v14 }
 0x122   :  { %v431_v25 = vadd.f32 %v430_v21, %v429_v19  ;;  %v380_v26 = vadd.f32 %v379_v2, %v378_v20 }
 0x124   :  { %v433_v27 = vadd.f32 %v432_v22, %v431_v25  ;;  %v382_v28 = vadd.f32 %v381_v16, %v380_v26 }
 0x126   :  { %v383_v30 = vrot.slane %v382_v28, 4  ;;  %v435_v31 = vadd.f32 %v434_v29, %v433_v27 }
 0x128   :  { %v384_v24 = vadd.f32 %v383_v30, %v382_v28  ;;  %v436_v32 = vrot.slane %v435_v31, 4 }
 0x12a   :  { %v385_v33 = vrot.slane %v384_v24, 2  ;;  %v437_v34 = vadd.f32 %v436_v32, %v435_v31 }
 0x12c   :  { %v386_v35 = vadd.f32 %v385_v33, %v384_v24  ;;  %v438_v36 = vrot.slane %v437_v34, 2 }
 0x12e   :  { %v387_v37 = vrot.slane %v386_v35, 1  ;;  %v439_v39 = vadd.f32 %v438_v36, %v437_v34 }
 0x130   :  { %v440_v40 = vrot.slane %v439_v39, 1  ;;  %v388_v41 = vadd.f32 %v387_v37, %v386_v35 }
 0x132   :  { %v441_v42 = vadd.f32 %v440_v40, %v439_v39 }
 0x134   :  { %v443_v43 = vsel %vm442_vm1, %v388_v41, %v441_v42 }
 0x135   :  { %445 = vst.msk [vmem:[%s854_s3] sm:$0x3] %vm444_vm2, %v443_v43 }

// kernel: discriminator_forward.11
= control target key start
LH: loop header
LB: loop body
LE: loop exit
PB: predicated region body
PF: predicated region fallthrough
CT: control target
= control target key end

     0   :  { %vm188_vm0 = vcmask 257024   ;;  %s417_s0 = inlined_call_operand.vmem [shape: f32[128,32], index: 0, kind: input, shape index: {}]   ;;  %s418_s1 = inlined_call_operand.vmem [shape: f32[1,32], index: 1, kind: input, shape index: {}]   ;;  %s419_s2 = inlined_call_operand.vmem [shape: f32[1,32], index: 2, kind: input, shape index: {}]   ;;  %s420_s3 = inlined_call_operand.vmem [shape: bf16[128,32], index: 3, kind: output, shape index: {}]  }
   0x1   :  { %v14_v0 = vld [vmem:[%s417_s0] sm:$0xff]  ;;  %v15_v4 = vld [vmem:[%s417_s0 + $0x8] sm:$0xff]  ;;  %v16_v5 = vld [vmem:[%s417_s0 + $0x10] sm:$0xff] }
   0x2   :  { %v269_v1 = vld [vmem:[%s418_s1] ss:$0 sm:$0xff]  ;;  %v17_v6 = vld [vmem:[%s417_s0 + $0x18] sm:$0xff]  ;;  %v19_v11 = vld [vmem:[%s417_s0 + $0x28] sm:$0xff] }
   0x3   :  { %v274_v2 = vld [vmem:[%s419_s2] ss:$0 sm:$0xff]  ;;  %v37_v3 = vmul.f32 %v269_v1, %v14_v0  ;;  %v38_v7 = vmul.f32 %v269_v1, %v15_v4  ;;  %v39_v8 = vmul.f32 %v269_v1, %v16_v5  ;;  %v40_v9 = vmul.f32 %v269_v1, %v17_v6  ;;  %v20_v12 = vld [vmem:[%s417_s0 + $0x30] sm:$0xff]  ;;  %v21_v17 = vld [vmem:[%s417_s0 + $0x38] sm:$0xff] }
   0x4   :  { %v18_v10 = vld [vmem:[%s417_s0 + $0x20] sm:$0xff]  ;;  %v42_v15 = vmul.f32 %v269_v1, %v19_v11  ;;  %v43_v16 = vmul.f32 %v269_v1, %v20_v12  ;;  %v44_v21 = vmul.f32 %v269_v1, %v21_v17  ;;  %v23_v34 = vld [vmem:[%s417_s0 + $0x48] sm:$0xff]  ;;  %v24_v38 = vld [vmem:[%s417_s0 + $0x50] sm:$0xff] }
   0x5   :  { %v60_v13 = vadd.f32 %v274_v2, %v37_v3  ;;  %v41_v14 = vmul.f32 %v269_v1, %v18_v10  ;;  %v61_v18 = vadd.f32 %v274_v2, %v38_v7  ;;  %v62_v19 = vadd.f32 %v274_v2, %v39_v8  ;;  %v22_v33 = vld [vmem:[%s417_s0 + $0x40] sm:$0xff]  ;;  %v25_v47 = vld [vmem:[%s417_s0 + $0x58] sm:$0xff]  ;;  %v27_v62 = vld [vmem:[%s417_s0 + $0x68] sm:$0xff] }
   0x6   :  { %v63_v20 = vadd.f32 %v274_v2, %v40_v9  ;;  %v65_v24 = vadd.f32 %v274_v2, %v42_v15  ;;  %v66_v42 = vadd.f32 %v274_v2, %v43_v16  ;;  %v67_v44 = vadd.f32 %v274_v2, %v44_v21  ;;  %v26_v58 = vld [vmem:[%s417_s0 + $0x60] sm:$0xff]  ;;  %v28_v63 = vld [vmem:[%s417_s0 + $0x70] sm:$0xff]  ;;  %v29_v12 = vld [vmem:[%s417_s0 + $0x78] sm:$0xff] }
   0x7   :  { %vm76_vm1 = vcmp.gt.f32.partialorder %v60_v13, 0.0  ;;  %v92_v22 = vmul.f32 0.2, %v60_v13  ;;  %v64_v23 = vadd.f32 %v274_v2, %v41_v14  ;;  %vm77_vm2 = vcmp.gt.f32.partialorder %v61_v18, 0.0 }
   0x8   :  { %v93_v25 = vmul.f32 0.2, %v61_v18  ;;  %vm78_vm3 = vcmp.gt.f32.partialorder %v62_v19, 0.0  ;;  %v94_v26 = vmul.f32 0.2, %v62_v19  ;;  %vm79_vm4 = vcmp.gt.f32.partialorder %v63_v20, 0.0 }
   0x9   :  { %v108_v27 = vsel %vm76_vm1, %v60_v13, %v92_v22  ;;  %v95_v28 = vmul.f32 0.2, %v63_v20  ;;  %vm80_vm5 = vcmp.gt.f32.partialorder %v64_v23, 0.0  ;;  %v96_v32 = vmul.f32 0.2, %v64_v23 }
   0xa   :  { %v227_v29 = vpack.c.bf16 %v108_v27, %v108_v27  ;;  %v109_v30 = vsel %vm77_vm2, %v61_v18, %v93_v25  ;;  %v110_v31 = vsel %vm78_vm3, %v62_v19, %v94_v26  ;;  %vm81_vm6 = vcmp.gt.f32.partialorder %v65_v24, 0.0 }
   0xb   :  { %v228_v35 = vpack.c.bf16 %v109_v30, %v109_v30  ;;  %v229_v36 = vpack.c.bf16 %v110_v31, %v110_v31  ;;  %v111_v37 = vsel %vm79_vm4, %v63_v20, %v95_v28  ;;  %v112_v40 = vsel %vm80_vm5, %v64_v23, %v96_v32 }
   0xc   :  { %189 = vst.msk [vmem:[%s420_s3] sm:$0xf] %vm188_vm0, %v227_v29  ;;  %v230_v39 = vpack.c.bf16 %v111_v37, %v111_v37  ;;  %v97_v41 = vmul.f32 0.2, %v65_v24  ;;  %v231_v43 = vpack.c.bf16 %v112_v40, %v112_v40  ;;  %v45_v45 = vmul.f32 %v269_v1, %v22_v33 }
   0xd   :  { %190 = vst.msk [vmem:[%s420_s3 + $0x4] sm:$0xf] %vm188_vm0, %v228_v35  ;;  %191 = vst.msk [vmem:[%s420_s3 + $0x8] sm:$0xf] %vm188_vm0, %v229_v36  ;;  %v46_v46 = vmul.f32 %v269_v1, %v23_v34  ;;  %vm82_vm7 = vcmp.gt.f32.partialorder %v66_v42, 0.0  ;;  %v47_v50 = vmul.f32 %v269_v1, %v24_v38  ;;  %vm83_vm8 = vcmp.gt.f32.partialorder %v67_v44, 0.0 }
   0xe   :  { %192 = vst.msk [vmem:[%s420_s3 + $0xc] sm:$0xf] %vm188_vm0, %v230_v39  ;;  %v113_v48 = vsel %vm81_vm6, %v65_v24, %v97_v41  ;;  %v98_v49 = vmul.f32 0.2, %v66_v42  ;;  %193 = vst.msk [vmem:[%s420_s3 + $0x10] sm:$0xf] %vm188_vm0, %v231_v43  ;;  %v68_v53 = vadd.f32 %v274_v2, %v45_v45  ;;  %v48_v57 = vmul.f32 %v269_v1, %v25_v47 }
   0xf   :  { %v232_v51 = vpack.c.bf16 %v113_v48, %v113_v48  ;;  %v99_v52 = vmul.f32 0.2, %v67_v44  ;;  %v69_v55 = vadd.f32 %v274_v2, %v46_v46  ;;  %v70_v56 = vadd.f32 %v274_v2, %v47_v50 }
  0x10   :  { %v114_v54 = vsel %vm82_vm7, %v66_v42, %v98_v49  ;;  %vm84_vm9 = vcmp.gt.f32.partialorder %v68_v53, 0.0  ;;  %v100_v61 = vmul.f32 0.2, %v68_v53  ;;  %v71_v6 = vadd.f32 %v274_v2, %v48_v57 }
  0x11   :  { %194 = vst.msk [vmem:[%s420_s3 + $0x14] sm:$0xf] %vm188_vm0, %v232_v51  ;;  %v233_v59 = vpack.c.bf16 %v114_v54, %v114_v54  ;;  %v115_v60 = vsel %vm83_vm8, %v67_v44, %v99_v52  ;;  %vm85_vm10 = vcmp.gt.f32.partialorder %v69_v55, 0.0  ;;  %v101_v3 = vmul.f32 0.2, %v69_v55 }
  0x12   :  { %v234_v0 = vpack.c.bf16 %v115_v60, %v115_v60  ;;  %vm86_vm11 = vcmp.gt.f32.partialorder %v70_v56, 0.0  ;;  %v116_v4 = vsel %vm84_vm9, %v68_v53, %v100_v61  ;;  %v102_v5 = vmul.f32 0.2, %v70_v56 }
  0x13   :  { %195 = vst.msk [vmem:[%s420_s3 + $0x18] sm:$0xf] %vm188_vm0, %v233_v59  ;;  %v49_v7 = vmul.f32 %v269_v1, %v26_v58  ;;  %v235_v8 = vpack.c.bf16 %v116_v4, %v116_v4  ;;  %v117_v9 = vsel %vm85_vm10, %v69_v55, %v101_v3  ;;  %v50_v10 = vmul.f32 %v269_v1, %v27_v62 }
  0x14   :  { %196 = vst.msk [vmem:[%s420_s3 + $0x1c] sm:$0xf] %vm188_vm0, %v234_v0  ;;  %v51_v11 = vmul.f32 %v269_v1, %v28_v63  ;;  %v236_v13 = vpack.c.bf16 %v117_v9, %v117_v9  ;;  %v118_v14 = vsel %vm86_vm11, %v70_v56, %v102_v5  ;;  %vm87_vm12 = vcmp.gt.f32.partialorder %v71_v6, 0.0 }
  0x15   :  { %v103_v15 = vmul.f32 0.2, %v71_v6  ;;  %197 = vst.msk [vmem:[%s420_s3 + $0x20] sm:$0xf] %vm188_vm0, %v235_v8  ;;  %v237_v16 = vpack.c.bf16 %v118_v14, %v118_v14  ;;  %v72_v17 = vadd.f32 %v274_v2, %v49_v7  ;;  %v73_v18 = vadd.f32 %v274_v2, %v50_v10 }
  0x16   :  { %v74_v19 = vadd.f32 %v274_v2, %v51_v11  ;;  %198 = vst.msk [vmem:[%s420_s3 + $0x24] sm:$0xf] %vm188_vm0, %v236_v13  ;;  %v52_v21 = vmul.f32 %v269_v1, %v29_v12 }
  0x17   :  { %v119_v20 = vsel %vm87_vm12, %v71_v6, %v103_v15  ;;  %199 = vst.msk [vmem:[%s420_s3 + $0x28] sm:$0xf] %vm188_vm0, %v237_v16  ;;  %vm88_vm13 = vcmp.gt.f32.partialorder %v72_v17, 0.0  ;;  %v104_v23 = vmul.f32 0.2, %v72_v17  ;;  %vm89_vm14 = vcmp.gt.f32.partialorder %v73_v18, 0.0 }
  0x18   :  { %v238_v22 = vpack.c.bf16 %v119_v20, %v119_v20  ;;  %v105_v24 = vmul.f32 0.2, %v73_v18  ;;  %vm90_vm15 = vcmp.gt.f32.partialorder %v74_v19, 0.0  ;;  %v106_v25 = vmul.f32 0.2, %v74_v19 }
  0x19   :  { %v75_v26 = vadd.f32 %v274_v2, %v52_v21  ;;  %v120_v1 = vsel %vm88_vm13, %v72_v17, %v104_v23 }
  0x1a   :  { %200 = vst.msk [vmem:[%s420_s3 + $0x2c] sm:$0xf] %vm188_vm0, %v238_v22  ;;  %v239_v27 = vpack.c.bf16 %v120_v1, %v120_v1  ;;  %v121_v28 = vsel %vm89_vm14, %v73_v18, %v105_v24  ;;  %v122_v29 = vsel %vm90_vm15, %v74_v19, %v106_v25 }
  0x1b   :  { %vm91_vm1 = vcmp.gt.f32.partialorder %v75_v26, 0.0  ;;  %v240_v30 = vpack.c.bf16 %v121_v28, %v121_v28  ;;  %v241_v31 = vpack.c.bf16 %v122_v29, %v122_v29  ;;  %v107_v32 = vmul.f32 0.2, %v75_v26 }
  0x1c   :  { %201 = vst.msk [vmem:[%s420_s3 + $0x30] sm:$0xf] %vm188_vm0, %v239_v27 }
  0x1d   :  { %202 = vst.msk [vmem:[%s420_s3 + $0x34] sm:$0xf] %vm188_vm0, %v240_v30  ;;  %203 = vst.msk [vmem:[%s420_s3 + $0x38] sm:$0xf] %vm188_vm0, %v241_v31  ;;  %v123_v2 = vsel %vm91_vm1, %v75_v26, %v107_v32 }
  0x1e   :  { %v242_v33 = vpack.c.bf16 %v123_v2, %v123_v2 }
  0x20   :  { %204 = vst.msk [vmem:[%s420_s3 + $0x3c] sm:$0xf] %vm188_vm0, %v242_v33 }

// kernel: discriminator_forward.12
= control target key start
LH: loop header
LB: loop body
LE: loop exit
PB: predicated region body
PF: predicated region fallthrough
CT: control target
= control target key end

     0   :  { %vm416_vm0 = vcmask 523264   ;;  %vm451_vm1 = vcmask 1040384   ;;  %vm453_vm2 = vcmask 517120   ;;  %s770_s1 = inlined_call_operand.vmem [shape: bf16[512,64], index: 1, kind: input, shape index: {}]   ;;  %s771_s0 = inlined_call_operand.vmem [shape: bf16[32,512], index: 0, kind: input, shape index: {}]   ;;  %s772_s2 = inlined_call_operand.vmem [shape: f32[32,64], index: 2, kind: output, shape index: {0}]   ;;  %s773_s3 = inlined_call_operand.vmem [shape: f32[1,2,64], index: 3, kind: output, shape index: {1}]  }
   0x1   :  { %v559_v0 = vld [vmem:[%s770_s1 + $0x40] sm:$0xff]   ;;  %v563_v4 = vld [vmem:[%s770_s1 + $0x48] sm:$0xff]   ;;  %v567_v8 = vld [vmem:[%s770_s1 + $0x50] sm:$0xff]  }
   0x2   :  { %v560_v1 = vld [vmem:[%s770_s1 + $0xc0] sm:$0xff]   ;;  %503 = vmatprep.subr.bf16.mxu0 %v559_v0  ;;  %v564_v5 = vld [vmem:[%s770_s1 + $0xc8] sm:$0xff]   ;;  %v568_v9 = vld [vmem:[%s770_s1 + $0xd0] sm:$0xff]  }
   0x3   :  { %v561_v2 = vld [vmem:[%s770_s1] sm:$0xff]   ;;  %531 = vmatprep.subr.bf16.mxu1 %v560_v1  ;;  %v565_v6 = vld [vmem:[%s770_s1 + $0x8] sm:$0xff]   ;;  %v569_v10 = vld [vmem:[%s770_s1 + $0x10] sm:$0xff]  }
   0x4   :  { %v562_v3 = vld [vmem:[%s770_s1 + $0x80] sm:$0xff]   ;;  %504 = vmatpush3.bf16.msra.mxu0 %v561_v2  ;;  %v566_v7 = vld [vmem:[%s770_s1 + $0x88] sm:$0xff]   ;;  %v570_v11 = vld [vmem:[%s770_s1 + $0x90] sm:$0xff]  }
   0x5   :  { %532 = vmatpush3.bf16.msra.mxu1 %v562_v3  ;;  %505 = vmatprep.subr.bf16.mxu0 %v563_v4  ;;  %v571_v12 = vld [vmem:[%s770_s1 + $0x58] sm:$0xff]   ;;  %v575_v16 = vld [vmem:[%s770_s1 + $0x60] sm:$0xff]   ;;  %v579_v20 = vld [vmem:[%s770_s1 + $0x68] sm:$0xff]  }
   0x6   :  { %533 = vmatprep.subr.bf16.mxu1 %v564_v5  ;;  %v572_v13 = vld [vmem:[%s770_s1 + $0xd8] sm:$0xff]   ;;  %v576_v17 = vld [vmem:[%s770_s1 + $0xe0] sm:$0xff]   ;;  %v580_v21 = vld [vmem:[%s770_s1 + $0xe8] sm:$0xff]  }
   0x7   :  { %v573_v14 = vld [vmem:[%s770_s1 + $0x18] sm:$0xff]   ;;  %v577_v18 = vld [vmem:[%s770_s1 + $0x20] sm:$0xff]   ;;  %v581_v22 = vld [vmem:[%s770_s1 + $0x28] sm:$0xff]  }
   0x8   :  { %506 = vmatpush3.bf16.msra.mxu0 %v565_v6  ;;  %v574_v15 = vld [vmem:[%s770_s1 + $0x98] sm:$0xff]   ;;  %v578_v19 = vld [vmem:[%s770_s1 + $0xa0] sm:$0xff]   ;;  %v582_v23 = vld [vmem:[%s770_s1 + $0xa8] sm:$0xff]  }
   0x9   :  { %534 = vmatpush3.bf16.msra.mxu1 %v566_v7  ;;  %507 = vmatprep.subr.bf16.mxu0 %v567_v8  ;;  %v583_v24 = vld [vmem:[%s770_s1 + $0x70] sm:$0xff]   ;;  %v587_v28 = vld [vmem:[%s770_s1 + $0x78] sm:$0xff]  }
   0xa   :  { %535 = vmatprep.subr.bf16.mxu1 %v568_v9  ;;  %v584_v25 = vld [vmem:[%s770_s1 + $0xf0] sm:$0xff]   ;;  %v588_v29 = vld [vmem:[%s770_s1 + $0xf8] sm:$0xff]  }
   0xb   :  { %v585_v26 = vld [vmem:[%s770_s1 + $0x30] sm:$0xff]   ;;  %v589_v30 = vld [vmem:[%s770_s1 + $0x38] sm:$0xff]  }
   0xc   :  { %508 = vmatpush3.bf16.msra.mxu0 %v569_v10  ;;  %v586_v27 = vld [vmem:[%s770_s1 + $0xb0] sm:$0xff]   ;;  %v590_v31 = vld [vmem:[%s770_s1 + $0xb8] sm:$0xff]  }
   0xd   :  { %536 = vmatpush3.bf16.msra.mxu1 %v570_v11  ;;  %509 = vmatprep.subr.bf16.mxu0 %v571_v12  ;;  %v591_v32 = vld [vmem:[%s771_s0] ss:$16 sps:$4 sm:$0xff]   ;;  %v593_v33 = vld [vmem:[%s771_s0 + $0x4] ss:$16 sps:$4 sm:$0xff]   ;;  %v594_v34 = vld [vmem:[%s771_s0 + $0x8] ss:$16 sps:$4 sm:$0xff]  }
   0xe   :  { %537 = vmatprep.subr.bf16.mxu1 %v572_v13  ;;  %v596_v35 = vld [vmem:[%s771_s0 + $0xc] ss:$16 sps:$4 sm:$0xff]   ;;  %350 = vmatprep.mubr.bf16.mxu0 %v593_v33  ;;  %v597_v36 = vld [vmem:[%s771_s0 + $0x24] ss:$16 sps:$4 sm:$0xff]   ;;  %v601_v38 = vld [vmem:[%s771_s0 + $0x20] ss:$16 sps:$4 sm:$0xff]  }
   0xf   :  { %399 = vmatprep.mubr.bf16.mxu1 %v596_v35  ;;  %v599_v37 = vld [vmem:[%s771_s0 + $0x2c] ss:$16 sps:$4 sm:$0xff]   ;;  %v602_v39 = vld [vmem:[%s771_s0 + $0x28] ss:$16 sps:$4 sm:$0xff]  }
  0x10   :  { %510 = vmatpush3.bf16.msra.mxu0 %v573_v14 }
  0x11   :  { %538 = vmatpush3.bf16.msra.mxu1 %v574_v15  ;;  %511 = vmatprep.subr.bf16.mxu0 %v575_v16 }
  0x12   :  { %539 = vmatprep.subr.bf16.mxu1 %v576_v17 }
  0x14   :  { %512 = vmatpush3.bf16.msra.mxu0 %v577_v18 }
  0x15   :  { %540 = vmatpush3.bf16.msra.mxu1 %v578_v19  ;;  %513 = vmatprep.subr.bf16.mxu0 %v579_v20 }
  0x16   :  { %541 = vmatprep.subr.bf16.mxu1 %v580_v21 }
  0x18   :  { %514 = vmatpush3.bf16.msra.mxu0 %v581_v22 }
  0x19   :  { %542 = vmatpush3.bf16.msra.mxu1 %v582_v23  ;;  %515 = vmatprep.subr.bf16.mxu0 %v583_v24 }
  0x1a   :  { %543 = vmatprep.subr.bf16.mxu1 %v584_v25 }
  0x1c   :  { %516 = vmatpush3.bf16.msra.mxu0 %v585_v26 }
  0x1d   :  { %544 = vmatpush3.bf16.msra.mxu1 %v586_v27  ;;  %517 = vmatprep.subr.bf16.mxu0 %v587_v28 }
  0x1e   :  { %545 = vmatprep.subr.bf16.mxu1 %v588_v29 }
  0x20   :  { %518 = vmatpush3.bf16.msra.mxu0 %v589_v30 }
  0x21   :  { %546 = vmatpush3.bf16.msra.mxu1 %v590_v31 }
  0x23   :  { %351 = vmatmul.mubr.bf16.vlgmr.msra.gmra.mrb[0].mxu0 %v591_v32 }
  0x24   :  { %400 = vmatmul.mubr.bf16.vlgmr.msra.gmra.mrb[0].mxu1 %v594_v34  ;;  %358 = vmatprep.mubr.bf16.mxu0 %v597_v36 }
  0x25   :  { %407 = vmatprep.mubr.bf16.mxu1 %v599_v37 }
  0x2b   :  { %359 = vmatmul.mubr.bf16.gmra.mrb[4].mxu0 %v601_v38 }
  0x2c   :  { %408 = vmatmul.mubr.bf16.gmra.mrb[4].mxu1 %v602_v39 }
  0xf6   :  { %v519_v40 = vpop.f32.mrb[0].mxu0 }
  0xf7   :  { %v547_v41 = vpop.f32.mrb[0].mxu1  ;;  %v520_v42 = vpop.f32.mrb[1].mxu0 }
  0xf8   :  { %v521_v43 = vadd.f32 %v520_v42, %v519_v40  ;;  %v548_v44 = vpop.f32.mrb[1].mxu1  ;;  %v522_v45 = vpop.f32.mrb[2].mxu0 }
  0xf9   :  { %v549_v46 = vadd.f32 %v548_v44, %v547_v41  ;;  %v550_v47 = vpop.f32.mrb[2].mxu1  ;;  %v523_v48 = vpop.f32.mrb[3].mxu0 }
  0xfa   :  { %v524_v49 = vadd.f32 %v523_v48, %v522_v45  ;;  %v551_v50 = vpop.f32.mrb[3].mxu1 }
  0xfb   :  { %v402_v51 = vadd.f32 %v549_v46, %v521_v43  ;;  %v552_v52 = vadd.f32 %v551_v50, %v550_v47 }
  0xfd   :  { %417 = vst.msk [vmem:[%s772_s2] sm:$0xff] %vm416_vm0, %v402_v51  ;;  %v434_v53 = vmul.f32 %v402_v51, %v402_v51  ;;  %v405_v54 = vadd.f32 %v552_v52, %v524_v49  ;;  %v421_v56 = vsel %vm416_vm0, %v402_v51, 0.0 }
  0xfe   :  { %v525_v55 = vpop.f32.mrb[4].mxu0 }
  0xff   :  { %418 = vst.msk [vmem:[%s772_s2 + $0x8] sm:$0xff] %vm416_vm0, %v405_v54  ;;  %v422_v57 = vsel %vm416_vm0, %v405_v54, 0.0  ;;  %v435_v58 = vmul.f32 %v405_v54, %v405_v54  ;;  %v553_v59 = vpop.f32.mrb[4].mxu1  ;;  %v526_v60 = vpop.f32.mrb[5].mxu0  ;;  %v438_v1 = vsel %vm416_vm0, %v434_v53, 0.0 }
 0x100   :  { %v423_v61 = vadd.f32 %v422_v57, %v421_v56  ;;  %v527_v62 = vadd.f32 %v526_v60, %v525_v55  ;;  %v554_v63 = vpop.f32.mrb[5].mxu1  ;;  %v528_v0 = vpop.f32.mrb[6].mxu0 }
 0x101   :  { %v439_v2 = vsel %vm416_vm0, %v435_v58, 0.0  ;;  %v555_v3 = vadd.f32 %v554_v63, %v553_v59  ;;  %v556_v4 = vpop.f32.mrb[6].mxu1  ;;  %v529_v5 = vpop.f32.mrb[7].mxu0 }
 0x102   :  { %v440_v6 = vadd.f32 %v439_v2, %v438_v1  ;;  %v530_v7 = vadd.f32 %v529_v5, %v528_v0  ;;  %v557_v8 = vpop.f32.mrb[7].mxu1 }
 0x103   :  { %v410_v9 = vadd.f32 %v555_v3, %v527_v62  ;;  %v558_v10 = vadd.f32 %v557_v8, %v556_v4 }
 0x105   :  { %419 = vst.msk [vmem:[%s772_s2 + $0x10] sm:$0xff] %vm416_vm0, %v410_v9  ;;  %v424_v11 = vsel %vm416_vm0, %v410_v9, 0.0  ;;  %v436_v12 = vmul.f32 %v410_v9, %v410_v9  ;;  %v413_v13 = vadd.f32 %v558_v10, %v530_v7 }
 0x106   :  { %v425_v14 = vadd.f32 %v424_v11, %v423_v61 }
 0x107   :  { %v441_v15 = vsel %vm416_vm0, %v436_v12, 0.0  ;;  %420 = vst.msk [vmem:[%s772_s2 + $0x18] sm:$0xff] %vm416_vm0, %v413_v13  ;;  %v426_v16 = vsel %vm416_vm0, %v413_v13, 0.0  ;;  %v437_v17 = vmul.f32 %v413_v13, %v413_v13 }
 0x108   :  { %v442_v18 = vadd.f32 %v441_v15, %v440_v6  ;;  %v427_v19 = vadd.f32 %v426_v16, %v425_v14 }
 0x109   :  { %v443_v20 = vsel %vm416_vm0, %v437_v17, 0.0 }
 0x10a   :  { %v428_v21 = vrot.slane %v427_v19, 4  ;;  %v444_v22 = vadd.f32 %v443_v20, %v442_v18 }
 0x10c   :  { %v429_v23 = vadd.f32 %v428_v21, %v427_v19  ;;  %v445_v24 = vrot.slane %v444_v22, 4 }
 0x10e   :  { %v430_v25 = vrot.slane %v429_v23, 2  ;;  %v446_v26 = vadd.f32 %v445_v24, %v444_v22 }
 0x110   :  { %v431_v27 = vadd.f32 %v430_v25, %v429_v23  ;;  %v447_v28 = vrot.slane %v446_v26, 2 }
 0x112   :  { %v432_v29 = vrot.slane %v431_v27, 1  ;;  %v448_v30 = vadd.f32 %v447_v28, %v446_v26 }
 0x114   :  { %v449_v31 = vrot.slane %v448_v30, 1  ;;  %v433_v32 = vadd.f32 %v432_v29, %v431_v27 }
 0x116   :  { %v450_v33 = vadd.f32 %v449_v31, %v448_v30 }
 0x118   :  { %v452_v34 = vsel %vm451_vm1, %v433_v32, %v450_v33 }
 0x119   :  { %454 = vst.msk [vmem:[%s773_s3] sm:$0x3] %vm453_vm2, %v452_v34 }

// kernel: discriminator_forward.13
= control target key start
LH: loop header
LB: loop body
LE: loop exit
PB: predicated region body
PF: predicated region fallthrough
CT: control target
= control target key end

     0   :  { %vm68_vm3 = vcmask 519168   ;;  %s137_s0 = inlined_call_operand.vmem [shape: f32[32,64], index: 0, kind: input, shape index: {}]   ;;  %s138_s1 = inlined_call_operand.vmem [shape: f32[1,64], index: 1, kind: input, shape index: {}]   ;;  %s139_s2 = inlined_call_operand.vmem [shape: f32[1,64], index: 2, kind: input, shape index: {}]   ;;  %s140_s3 = inlined_call_operand.vmem [shape: bf16[32,64], index: 3, kind: output, shape index: {}]  }
   0x1   :  { %v14_v0 = vld [vmem:[%s137_s0] sm:$0xff]  ;;  %v15_v4 = vld [vmem:[%s137_s0 + $0x8] sm:$0xff]  ;;  %v16_v5 = vld [vmem:[%s137_s0 + $0x10] sm:$0xff] }
   0x2   :  { %v77_v1 = vld [vmem:[%s138_s1] ss:$0 sm:$0xff]  ;;  %v17_v6 = vld [vmem:[%s137_s0 + $0x18] sm:$0xff] }
   0x3   :  { %v78_v2 = vld [vmem:[%s139_s2] ss:$0 sm:$0xff]  ;;  %v25_v3 = vmul.f32 %v77_v1, %v14_v0  ;;  %v26_v7 = vmul.f32 %v77_v1, %v15_v4  ;;  %v27_v8 = vmul.f32 %v77_v1, %v16_v5  ;;  %v28_v9 = vmul.f32 %v77_v1, %v17_v6 }
   0x5   :  { %v36_v10 = vadd.f32 %v78_v2, %v25_v3  ;;  %v37_v11 = vadd.f32 %v78_v2, %v26_v7  ;;  %v38_v12 = vadd.f32 %v78_v2, %v27_v8  ;;  %v39_v13 = vadd.f32 %v78_v2, %v28_v9 }
   0x7   :  { %vm40_vm0 = vcmp.gt.f32.partialorder %v36_v10, 0.0  ;;  %v44_v14 = vmul.f32 0.2, %v36_v10  ;;  %vm41_vm1 = vcmp.gt.f32.partialorder %v37_v11, 0.0  ;;  %v45_v15 = vmul.f32 0.2, %v37_v11 }
   0x8   :  { %vm42_vm2 = vcmp.gt.f32.partialorder %v38_v12, 0.0  ;;  %v46_v16 = vmul.f32 0.2, %v38_v12  ;;  %vm43_vm4 = vcmp.gt.f32.partialorder %v39_v13, 0.0  ;;  %v47_v18 = vmul.f32 0.2, %v39_v13 }
   0x9   :  { %v48_v17 = vsel %vm40_vm0, %v36_v10, %v44_v14  ;;  %v49_v20 = vsel %vm41_vm1, %v37_v11, %v45_v15 }
   0xa   :  { %v83_v19 = vpack.c.bf16 %v48_v17, %v48_v17  ;;  %v50_v21 = vsel %vm42_vm2, %v38_v12, %v46_v16  ;;  %v84_v22 = vpack.c.bf16 %v49_v20, %v49_v20  ;;  %v51_v24 = vsel %vm43_vm4, %v39_v13, %v47_v18 }
   0xb   :  { %v85_v23 = vpack.c.bf16 %v50_v21, %v50_v21  ;;  %v86_v25 = vpack.c.bf16 %v51_v24, %v51_v24 }
   0xc   :  { %69 = vst.msk [vmem:[%s140_s3] sm:$0xf] %vm68_vm3, %v83_v19  ;;  %70 = vst.msk [vmem:[%s140_s3 + $0x4] sm:$0xf] %vm68_vm3, %v84_v22 }
   0xd   :  { %71 = vst.msk [vmem:[%s140_s3 + $0x8] sm:$0xf] %vm68_vm3, %v85_v23  ;;  %72 = vst.msk [vmem:[%s140_s3 + $0xc] sm:$0xf] %vm68_vm3, %v86_v25 }

</bundles_post_ra>
